<compile_context>
chip_gen: v5e
topology: v5e:2x2
jax: 0.10.0
libtpu: 0.0.40
codegen_flags: <defaults>
</compile_context>

<pallas_src>
import jax
import jax.numpy as jnp
from jax.experimental import pallas as pl
from jax.experimental.pallas import tpu as pltpu


_VMEM = pl.BlockSpec(memory_space=pltpu.MemorySpace.VMEM)
_ANY = pl.BlockSpec(memory_space=pl.ANY)


# ---------------------------------------------------------------------------
# Fused kernel: merged dual-LSTM recurrence + output projections + fusion MLP.
# ---------------------------------------------------------------------------
def cmam_kernel(lens_ref, x_ref,
                wih_ref, bih_ref, whh_ref, wout_ref, bout_ref,
                w1, b1, w2, b2, w3_hbm, b3, w4_hbm, b4, w5_hbm, b5,
                o_ref,
                w3_v, w4_v, w5_v, sem):
    # -- kick off prefetch of the big fusion weights; hidden behind the LSTM --
    cp3 = pltpu.make_async_copy(w3_hbm, w3_v, sem.at[0])
    cp4 = pltpu.make_async_copy(w4_hbm, w4_v, sem.at[1])
    cp5 = pltpu.make_async_copy(w5_hbm, w5_v, sem.at[2])
    cp3.start()
    cp4.start()
    cp5.start()

    TB, _ = x_ref.shape
    HH = whh_ref.shape[0]          # 2*H = 16  ([h_audio | h_video])
    B = lens_ref.shape[0]
    T = TB // B
    S = 3 * HH                     # width of the packed sigmoid block [i|f|o]

    # Hoisted input projection for BOTH encoders: one matmul instead of 2*T.
    # Columns are packed [i_a,i_v | f_a,f_v | o_a,o_v | g_a,g_v].
    gih = jnp.dot(x_ref[...].astype(jnp.bfloat16), wih_ref[...],
                  preferred_element_type=jnp.float32) + bih_ref[...]  # (T*B,4HH)

    whh = whh_ref[...]             # (HH, 4*HH) bf16, block-diagonal per gate
    lens = lens_ref[...]           # (B, HH) int32: audio_len cols | video_len cols

    h = jnp.zeros((B, HH), jnp.float32)
    c = jnp.zeros((B, HH), jnp.float32)
    # T is tiny & static -> fully unrolled straight-line recurrence.
    for t in range(T):
        # ONE packed recurrence matmul (single MXU push) per step; the per-step
        # gate rows are a static, 8-aligned sublane slice of the hoisted gih.
        pre = gih[t * B:(t + 1) * B, :] + jnp.dot(
            h.astype(jnp.bfloat16), whh, preferred_element_type=jnp.float32)
        sig = jax.nn.sigmoid(pre[:, :S])        # packed [i | f | o]: 1 EUP push
        g_g = jnp.tanh(pre[:, S:])              # [g]:                1 EUP push
        i_g = sig[:, 0:HH]
        f_g = sig[:, HH:2 * HH]
        o_g = sig[:, 2 * HH:S]
        c_new = f_g * c + i_g * g_g
        h_new = o_g * jnp.tanh(c_new)
        # pack_padded_sequence semantics: freeze each modality's state once
        # t >= its own length (assumes lengths >= 1).
        valid = t < lens                        # (B, HH) per-modality mask
        h = jnp.where(valid, h_new, h)
        c = jnp.where(valid, c_new, c)

    # Encoder output Linears + torch.cat fused into one block-diagonal matmul.
    emb = jnp.dot(h.astype(jnp.bfloat16), wout_ref[...],
                  preferred_element_type=jnp.float32) + bout_ref[...]  # (B, 32)

    # Fusion MLP (eval BatchNorm folded into the Linears; Dropout = identity).
    x = jnp.maximum(jnp.dot(emb.astype(jnp.bfloat16), w1[...],
                            preferred_element_type=jnp.float32) + b1[...], 0.0)
    x = jnp.maximum(jnp.dot(x.astype(jnp.bfloat16), w2[...],
                            preferred_element_type=jnp.float32) + b2[...], 0.0)
    cp3.wait()
    x = jnp.maximum(jnp.dot(x.astype(jnp.bfloat16), w3_v[...],
                            preferred_element_type=jnp.float32) + b3[...], 0.0)
    cp4.wait()
    x = jnp.maximum(jnp.dot(x.astype(jnp.bfloat16), w4_v[...],
                            preferred_element_type=jnp.float32) + b4[...], 0.0)
    cp5.wait()
    o_ref[...] = (jnp.dot(x.astype(jnp.bfloat16), w5_v[...],
                          preferred_element_type=jnp.float32) + b5[...])


# ---------------------------------------------------------------------------
# Wrapper
# ---------------------------------------------------------------------------
def cmam_forward(audio, audio_len, video, video_len, packed):
    """audio: (T,B,d_ain) f32, video: (T,B,d_vin) f32, *_len: (B,) int."""
    T, B, _ = audio.shape
    h_a, h_v = packed["h_a"], packed["h_v"]
    # Wrapper-side relayouts (plain XLA): (T,B,D)->(T*B,D) + feature concat,
    # plus the per-modality length mask. Keeps in-kernel slicing static/aligned.
    x_cat = jnp.concatenate([audio.reshape(T * B, -1),
                             video.reshape(T * B, -1)], axis=1)
    lens_cat = jnp.concatenate(
        [jnp.broadcast_to(audio_len.astype(jnp.int32)[:, None], (B, h_a)),
         jnp.broadcast_to(video_len.astype(jnp.int32)[:, None], (B, h_v))],
        axis=1)
    (w1, b1), (w2, b2), (w3, b3), (w4, b4), (w5, b5) = packed["fusion"]
    args = (lens_cat, x_cat,
            packed["w_ih"], packed["b_ih"], packed["w_hh"],
            packed["w_out"], packed["b_out"],
            w1, b1, w2, b2, w3, b3, w4, b4, w5, b5)
    in_specs = [_VMEM] * 11 + [_ANY, _VMEM, _ANY, _VMEM, _ANY, _VMEM]
    # TODO(synk): for large serving batches, add a grid over batch tiles with
    #             dimension_semantics=("parallel",) so v7x's two TensorCores
    #             share the work and the weights amortize; at B=8 a single
    #             invocation is the right call.
    return pl.pallas_call(
        cmam_kernel,
        out_shape=jax.ShapeDtypeStruct((B, w5.shape[1]), jnp.float32),
        in_specs=in_specs,
        out_specs=_VMEM,
        scratch_shapes=[
            pltpu.VMEM(w3.shape, w3.dtype),
            pltpu.VMEM(w4.shape, w4.dtype),
            pltpu.VMEM(w5.shape, w5.dtype),
            pltpu.SemaphoreType.DMA((3,)),
        ],
    )(*args)


# ---------------------------------------------------------------------------
# Parameter construction (synthetic; mirrors the PyTorch checkpoint layout).
# ---------------------------------------------------------------------------
def init_lstm_params(key, d_in, d_h, d_out):
    """Per-encoder params in PyTorch-equivalent (transposed) layout:
    w_ih (d_in,4H), w_hh (d_h,4H), gate order (i,f,g,o) along columns,
    b = b_ih + b_hh (1,4H). A real checkpoint maps via weight_ih_l0.T etc."""
    ks = jax.random.split(key, 5)
    s = 0.2
    return dict(
        w_ih=s * jax.random.normal(ks[0], (d_in, 4 * d_h), jnp.float32),
        w_hh=s * jax.random.normal(ks[1], (d_h, 4 * d_h), jnp.float32),
        b=s * jax.random.normal(ks[2], (1, 4 * d_h), jnp.float32),
        w_out=s * jax.random.normal(ks[3], (d_h, d_out), jnp.float32),
        b_out=s * jax.random.normal(ks[4], (1, d_out), jnp.float32),
    )


def folded_linear_bn(key, d_in, d_out, with_bn):
    """Linear (+ eval-mode BatchNorm1d folded in). f32; cast to bf16 at pack."""
    ks = jax.random.split(key, 6)
    w = 0.1 * jax.random.normal(ks[0], (d_in, d_out), jnp.float32)
    b = 0.1 * jax.random.normal(ks[1], (1, d_out), jnp.float32)
    if not with_bn:
        return w, b
    gamma = 1.0 + 0.1 * jax.random.normal(ks[2], (d_out,), jnp.float32)
    beta = 0.1 * jax.random.normal(ks[3], (d_out,), jnp.float32)
    mean = 0.1 * jax.random.normal(ks[4], (d_out,), jnp.float32)
    var = jnp.abs(jax.random.normal(ks[5], (d_out,), jnp.float32)) + 0.5
    scale = gamma / jnp.sqrt(var + 1e-5)
    return w * scale[None, :], (b - mean[None, :]) * scale[None, :] + beta[None, :]


def pack_cmam_params(a_p, v_p, fusion_p):
    """Merge the two encoders into one packed recurrence + fold torch.cat.

    Packed gate order along the 4*(Ha+Hv) axis is [i|f|o|g]; each gate block is
    laid out [audio | video]. W_hh and W_out are block-diagonal, so the two
    encoders stay numerically independent (zero off-diagonal MACs are free)."""
    Ha = a_p["w_hh"].shape[0]
    Hv = v_p["w_hh"].shape[0]
    HH = Ha + Hv
    d_ai = a_p["w_ih"].shape[0]
    d_vi = v_p["w_ih"].shape[0]
    order = (0, 1, 3, 2)                       # PyTorch (i,f,g,o) -> (i,f,o,g)

    w_ih = jnp.zeros((d_ai + d_vi, 4 * HH), jnp.float32)
    w_hh = jnp.zeros((HH, 4 * HH), jnp.float32)
    b_ih = jnp.zeros((1, 4 * HH), jnp.float32)
    for slot, gate in enumerate(order):
        ca = slot * HH            # audio columns of this packed gate block
        cv = ca + Ha              # video columns
        w_ih = w_ih.at[:d_ai, ca:ca + Ha].set(a_p["w_ih"][:, gate * Ha:(gate + 1) * Ha])
        w_ih = w_ih.at[d_ai:, cv:cv + Hv].set(v_p["w_ih"][:, gate * Hv:(gate + 1) * Hv])
        w_hh = w_hh.at[:Ha, ca:ca + Ha].set(a_p["w_hh"][:, gate * Ha:(gate + 1) * Ha])
        w_hh = w_hh.at[Ha:, cv:cv + Hv].set(v_p["w_hh"][:, gate * Hv:(gate + 1) * Hv])
        b_ih = b_ih.at[:, ca:ca + Ha].set(a_p["b"][:, gate * Ha:(gate + 1) * Ha])
        b_ih = b_ih.at[:, cv:cv + Hv].set(v_p["b"][:, gate * Hv:(gate + 1) * Hv])

    d_ao = a_p["w_out"].shape[1]
    d_vo = v_p["w_out"].shape[1]
    w_out = jnp.zeros((HH, d_ao + d_vo), jnp.float32)
    w_out = w_out.at[:Ha, :d_ao].set(a_p["w_out"])
    w_out = w_out.at[Ha:, d_ao:].set(v_p["w_out"])
    b_out = jnp.concatenate([a_p["b_out"], v_p["b_out"]], axis=1)

    return dict(
        h_a=Ha, h_v=Hv,
        w_ih=w_ih.astype(jnp.bfloat16), b_ih=b_ih,
        w_hh=w_hh.astype(jnp.bfloat16),
        w_out=w_out.astype(jnp.bfloat16), b_out=b_out,
        fusion=[(w.astype(jnp.bfloat16), b) for (w, b) in fusion_p],
    )


# ---------------------------------------------------------------------------
# Pure-JAX f32 reference (PyTorch semantics) for a numerical sanity check.
# ---------------------------------------------------------------------------
def _ref_lstm_last_hidden(x, lengths, w_ih, w_hh, b):
    T, B, _ = x.shape
    H = w_hh.shape[0]
    h = jnp.zeros((B, H), jnp.float32)
    c = jnp.zeros((B, H), jnp.float32)
    for t in range(T):
        g = x[t] @ w_ih + h @ w_hh + b
        i_g = jax.nn.sigmoid(g[:, 0:H])
        f_g = jax.nn.sigmoid(g[:, H:2 * H])
        g_g = jnp.tanh(g[:, 2 * H:3 * H])
        o_g = jax.nn.sigmoid(g[:, 3 * H:4 * H])
        c_new = f_g * c + i_g * g_g
        h_new = o_g * jnp.tanh(c_new)
        valid = (t < lengths)[:, None]
        h = jnp.where(valid, h_new, h)
        c = jnp.where(valid, c_new, c)
    return h


def cmam_reference(audio, audio_len, video, video_len, a_p, v_p, fusion_p):
    a_h = _ref_lstm_last_hidden(audio, audio_len, a_p["w_ih"], a_p["w_hh"], a_p["b"])
    v_h = _ref_lstm_last_hidden(video, video_len, v_p["w_ih"], v_p["w_hh"], v_p["b"])
    a_emb = a_h @ a_p["w_out"] + a_p["b_out"]
    v_emb = v_h @ v_p["w_out"] + v_p["b_out"]
    h = jnp.concatenate([a_emb, v_emb], axis=1)
    for w, b_ in fusion_p[:-1]:
        h = jnp.maximum(h @ w + b_, 0.0)
    w5, b5 = fusion_p[-1]
    return h @ w5 + b5


if __name__ == "__main__":
    # hp: d_ain=16, d_ah=8, d_aout=16, d_vin=20, d_vh=8, d_vout=16, n_layer=1,
    # bidirectional=False; inference mode (Dropout/BatchNorm in eval).
    # TODO(synk): bidirectional / multi-layer LSTM variants not implemented.
    T, B = 8, 8          # B=8 fills every vreg sublane group
    d_ain, d_ah, d_aout = 16, 8, 16
    d_vin, d_vh, d_vout = 20, 8, 16

    key = jax.random.PRNGKey(0)
    k = jax.random.split(key, 8)
    audio = jax.random.normal(k[0], (T, B, d_ain), jnp.float32)
    video = jax.random.normal(k[1], (T, B, d_vin), jnp.float32)
    audio_len = jnp.array([8, 5, 6, 8, 3, 7, 1, 4], dtype=jnp.int32)
    video_len = jnp.array([6, 8, 8, 2, 7, 5, 8, 3], dtype=jnp.int32)

    acoustic_p = init_lstm_params(k[2], d_ain, d_ah, d_aout)
    visual_p = init_lstm_params(k[3], d_vin, d_vh, d_vout)
    dims = [32, 64, 128, 256, 512, 768]
    fkeys = jax.random.split(k[4], 5)
    fusion_p = [folded_linear_bn(fkeys[i], dims[i], dims[i + 1], with_bn=(i < 4))
                for i in range(5)]

    packed = pack_cmam_params(acoustic_p, visual_p, fusion_p)
    out = cmam_forward(audio, audio_len, video, video_len, packed)
    jax.block_until_ready(out)
    assert out.shape == (B, 768) and out.dtype == jnp.float32

    # Sanity check vs. the f32 reference (kernel uses bf16 weights -> generous
    # drift margin; a gate-order / packing bug would blow far past this).
    ref = cmam_reference(audio, audio_len, video, video_len,
                         acoustic_p, visual_p, fusion_p)
    err = float(jnp.max(jnp.abs(out - ref)))
    scale = float(jnp.max(jnp.abs(ref)))
    assert err <= 0.05 + 0.1 * scale, f"max|err|={err} vs max|ref|={scale}"
    print("KERNEL_OK")
</pallas_src>

<mosaic_0001>
module attributes {stable_mosaic.version = 11 : i64} {
  func.func @cmam_kernel(%arg0: memref<8x16xi32, #tpu.memory_space<vmem>>, %arg1: memref<64x36xf32, #tpu.memory_space<vmem>>, %arg2: memref<36x64xbf16, #tpu.memory_space<vmem>>, %arg3: memref<1x64xf32, #tpu.memory_space<vmem>>, %arg4: memref<16x64xbf16, #tpu.memory_space<vmem>>, %arg5: memref<16x32xbf16, #tpu.memory_space<vmem>>, %arg6: memref<1x32xf32, #tpu.memory_space<vmem>>, %arg7: memref<32x64xbf16, #tpu.memory_space<vmem>>, %arg8: memref<1x64xf32, #tpu.memory_space<vmem>>, %arg9: memref<64x128xbf16, #tpu.memory_space<vmem>>, %arg10: memref<1x128xf32, #tpu.memory_space<vmem>>, %arg11: memref<128x256xbf16, #tpu.memory_space<any>>, %arg12: memref<1x256xf32, #tpu.memory_space<vmem>>, %arg13: memref<256x512xbf16, #tpu.memory_space<any>>, %arg14: memref<1x512xf32, #tpu.memory_space<vmem>>, %arg15: memref<512x768xbf16, #tpu.memory_space<any>>, %arg16: memref<1x768xf32, #tpu.memory_space<vmem>>, %arg17: memref<8x768xf32, #tpu.memory_space<vmem>>, %arg18: memref<128x256xbf16, #tpu.memory_space<vmem>>, %arg19: memref<256x512xbf16, #tpu.memory_space<vmem>>, %arg20: memref<512x768xbf16, #tpu.memory_space<vmem>>, %arg21: memref<3x!tpu.dma_semaphore, #tpu.memory_space<semaphore_mem>>) attributes {dimension_semantics = [], scalar_prefetch = 0 : i64, scratch_operands = 4 : i64, tpu.core_type = #tpu.core_type<tc>} {
    %c0_i32 = arith.constant 0 : i32
    %0 = tpu.memref_slice %arg21[%c0_i32] : memref<3x!tpu.dma_semaphore, #tpu.memory_space<semaphore_mem>> -> memref<1x!tpu.dma_semaphore, #tpu.memory_space<semaphore_mem>>
    %1 = tpu.memref_squeeze %0 : memref<1x!tpu.dma_semaphore, #tpu.memory_space<semaphore_mem>> -> memref<!tpu.dma_semaphore, #tpu.memory_space<semaphore_mem>>
    tpu.enqueue_dma source(%arg11 : memref<128x256xbf16, #tpu.memory_space<any>>) target(%arg18 : memref<128x256xbf16, #tpu.memory_space<vmem>>) target_semaphore(%1 : memref<!tpu.dma_semaphore, #tpu.memory_space<semaphore_mem>>)
    %c1_i32 = arith.constant 1 : i32
    %2 = tpu.memref_slice %arg21[%c1_i32] : memref<3x!tpu.dma_semaphore, #tpu.memory_space<semaphore_mem>> -> memref<1x!tpu.dma_semaphore, #tpu.memory_space<semaphore_mem>>
    %3 = tpu.memref_squeeze %2 : memref<1x!tpu.dma_semaphore, #tpu.memory_space<semaphore_mem>> -> memref<!tpu.dma_semaphore, #tpu.memory_space<semaphore_mem>>
    tpu.enqueue_dma source(%arg13 : memref<256x512xbf16, #tpu.memory_space<any>>) target(%arg19 : memref<256x512xbf16, #tpu.memory_space<vmem>>) target_semaphore(%3 : memref<!tpu.dma_semaphore, #tpu.memory_space<semaphore_mem>>)
    %c2_i32 = arith.constant 2 : i32
    %4 = tpu.memref_slice %arg21[%c2_i32] : memref<3x!tpu.dma_semaphore, #tpu.memory_space<semaphore_mem>> -> memref<1x!tpu.dma_semaphore, #tpu.memory_space<semaphore_mem>>
    %5 = tpu.memref_squeeze %4 : memref<1x!tpu.dma_semaphore, #tpu.memory_space<semaphore_mem>> -> memref<!tpu.dma_semaphore, #tpu.memory_space<semaphore_mem>>
    tpu.enqueue_dma source(%arg15 : memref<512x768xbf16, #tpu.memory_space<any>>) target(%arg20 : memref<512x768xbf16, #tpu.memory_space<vmem>>) target_semaphore(%5 : memref<!tpu.dma_semaphore, #tpu.memory_space<semaphore_mem>>)
    %c0 = arith.constant 0 : index
    %c0_0 = arith.constant 0 : index
    %6 = vector.load %arg1[%c0, %c0_0] : memref<64x36xf32, #tpu.memory_space<vmem>>, vector<64x36xf32>
    %7 = arith.truncf %6 : vector<64x36xf32> to vector<64x36xbf16>
    %c0_1 = arith.constant 0 : index
    %c0_2 = arith.constant 0 : index
    %8 = vector.load %arg2[%c0_1, %c0_2] : memref<36x64xbf16, #tpu.memory_space<vmem>>, vector<36x64xbf16>
    %cst = arith.constant dense<0.000000e+00> : vector<64x64xf32>
    %9 = tpu.matmul %7, %8, %cst {dimension_numbers = #tpu.dot_dimension_numbers<[1], [0], [0], [1], [0, 0, 1, 1], [], []>} : vector<64x36xbf16>, vector<36x64xbf16>, vector<64x64xf32> -> vector<64x64xf32>
    %c0_3 = arith.constant 0 : index
    %c0_4 = arith.constant 0 : index
    %10 = vector.load %arg3[%c0_3, %c0_4] : memref<1x64xf32, #tpu.memory_space<vmem>>, vector<1x64xf32>
    %11 = vector.broadcast %10 : vector<1x64xf32> to vector<64x64xf32>
    %12 = arith.addf %9, %11 : vector<64x64xf32>
    %c0_5 = arith.constant 0 : index
    %c0_6 = arith.constant 0 : index
    %13 = vector.load %arg4[%c0_5, %c0_6] : memref<16x64xbf16, #tpu.memory_space<vmem>>, vector<16x64xbf16>
    %c0_7 = arith.constant 0 : index
    %c0_8 = arith.constant 0 : index
    %14 = vector.load %arg0[%c0_7, %c0_8] : memref<8x16xi32, #tpu.memory_space<vmem>>, vector<8x16xi32>
    %cst_9 = arith.constant 0.000000e+00 : f32
    %15 = vector.broadcast %cst_9 : f32 to vector<8x16xf32>
    %cst_10 = arith.constant 0.000000e+00 : f32
    %16 = vector.broadcast %cst_10 : f32 to vector<8x16xf32>
    %17 = vector.extract_strided_slice %12 {offsets = [0, 0], sizes = [8, 64], strides = [1, 1]} : vector<64x64xf32> to vector<8x64xf32>
    %18 = arith.truncf %15 : vector<8x16xf32> to vector<8x16xbf16>
    %cst_11 = arith.constant dense<0.000000e+00> : vector<8x64xf32>
    %19 = tpu.matmul %18, %13, %cst_11 {dimension_numbers = #tpu.dot_dimension_numbers<[1], [0], [0], [1], [0, 0, 1, 1], [], []>} : vector<8x16xbf16>, vector<16x64xbf16>, vector<8x64xf32> -> vector<8x64xf32>
    %20 = arith.addf %17, %19 : vector<8x64xf32>
    %21 = vector.extract_strided_slice %20 {offsets = [0, 0], sizes = [8, 48], strides = [1, 1]} : vector<8x64xf32> to vector<8x48xf32>
    %22 = arith.negf %21 : vector<8x48xf32>
    %23 = math.exp %22 : vector<8x48xf32>
    %cst_12 = arith.constant 1.000000e+00 : f32
    %24 = vector.broadcast %cst_12 : f32 to vector<8x48xf32>
    %25 = arith.addf %24, %23 : vector<8x48xf32>
    %26 = arith.divf %24, %25 : vector<8x48xf32>
    %27 = vector.extract_strided_slice %20 {offsets = [0, 48], sizes = [8, 16], strides = [1, 1]} : vector<8x64xf32> to vector<8x16xf32>
    %28 = math.tanh %27 : vector<8x16xf32>
    %29 = vector.extract_strided_slice %26 {offsets = [0, 0], sizes = [8, 16], strides = [1, 1]} : vector<8x48xf32> to vector<8x16xf32>
    %30 = vector.extract_strided_slice %26 {offsets = [0, 16], sizes = [8, 16], strides = [1, 1]} : vector<8x48xf32> to vector<8x16xf32>
    %31 = vector.extract_strided_slice %26 {offsets = [0, 32], sizes = [8, 16], strides = [1, 1]} : vector<8x48xf32> to vector<8x16xf32>
    %32 = arith.mulf %30, %16 : vector<8x16xf32>
    %33 = arith.mulf %29, %28 : vector<8x16xf32>
    %34 = arith.addf %32, %33 : vector<8x16xf32>
    %35 = math.tanh %34 : vector<8x16xf32>
    %36 = arith.mulf %31, %35 : vector<8x16xf32>
    %c0_i32_13 = arith.constant 0 : i32
    %37 = vector.broadcast %c0_i32_13 : i32 to vector<8x16xi32>
    %38 = arith.cmpi sgt, %14, %37 : vector<8x16xi32>
    %39 = arith.select %38, %36, %15 : vector<8x16xi1>, vector<8x16xf32>
    %40 = arith.select %38, %34, %16 : vector<8x16xi1>, vector<8x16xf32>
    %41 = vector.extract_strided_slice %12 {offsets = [8, 0], sizes = [8, 64], strides = [1, 1]} : vector<64x64xf32> to vector<8x64xf32>
    %42 = arith.truncf %39 : vector<8x16xf32> to vector<8x16xbf16>
    %cst_14 = arith.constant dense<0.000000e+00> : vector<8x64xf32>
    %43 = tpu.matmul %42, %13, %cst_14 {dimension_numbers = #tpu.dot_dimension_numbers<[1], [0], [0], [1], [0, 0, 1, 1], [], []>} : vector<8x16xbf16>, vector<16x64xbf16>, vector<8x64xf32> -> vector<8x64xf32>
    %44 = arith.addf %41, %43 : vector<8x64xf32>
    %45 = vector.extract_strided_slice %44 {offsets = [0, 0], sizes = [8, 48], strides = [1, 1]} : vector<8x64xf32> to vector<8x48xf32>
    %46 = arith.negf %45 : vector<8x48xf32>
    %47 = math.exp %46 : vector<8x48xf32>
    %cst_15 = arith.constant 1.000000e+00 : f32
    %48 = vector.broadcast %cst_15 : f32 to vector<8x48xf32>
    %49 = arith.addf %48, %47 : vector<8x48xf32>
    %50 = arith.divf %48, %49 : vector<8x48xf32>
    %51 = vector.extract_strided_slice %44 {offsets = [0, 48], sizes = [8, 16], strides = [1, 1]} : vector<8x64xf32> to vector<8x16xf32>
    %52 = math.tanh %51 : vector<8x16xf32>
    %53 = vector.extract_strided_slice %50 {offsets = [0, 0], sizes = [8, 16], strides = [1, 1]} : vector<8x48xf32> to vector<8x16xf32>
    %54 = vector.extract_strided_slice %50 {offsets = [0, 16], sizes = [8, 16], strides = [1, 1]} : vector<8x48xf32> to vector<8x16xf32>
    %55 = vector.extract_strided_slice %50 {offsets = [0, 32], sizes = [8, 16], strides = [1, 1]} : vector<8x48xf32> to vector<8x16xf32>
    %56 = arith.mulf %54, %40 : vector<8x16xf32>
    %57 = arith.mulf %53, %52 : vector<8x16xf32>
    %58 = arith.addf %56, %57 : vector<8x16xf32>
    %59 = math.tanh %58 : vector<8x16xf32>
    %60 = arith.mulf %55, %59 : vector<8x16xf32>
    %c1_i32_16 = arith.constant 1 : i32
    %61 = vector.broadcast %c1_i32_16 : i32 to vector<8x16xi32>
    %62 = arith.cmpi sgt, %14, %61 : vector<8x16xi32>
    %63 = arith.select %62, %60, %39 : vector<8x16xi1>, vector<8x16xf32>
    %64 = arith.select %62, %58, %40 : vector<8x16xi1>, vector<8x16xf32>
    %65 = vector.extract_strided_slice %12 {offsets = [16, 0], sizes = [8, 64], strides = [1, 1]} : vector<64x64xf32> to vector<8x64xf32>
    %66 = arith.truncf %63 : vector<8x16xf32> to vector<8x16xbf16>
    %cst_17 = arith.constant dense<0.000000e+00> : vector<8x64xf32>
    %67 = tpu.matmul %66, %13, %cst_17 {dimension_numbers = #tpu.dot_dimension_numbers<[1], [0], [0], [1], [0, 0, 1, 1], [], []>} : vector<8x16xbf16>, vector<16x64xbf16>, vector<8x64xf32> -> vector<8x64xf32>
    %68 = arith.addf %65, %67 : vector<8x64xf32>
    %69 = vector.extract_strided_slice %68 {offsets = [0, 0], sizes = [8, 48], strides = [1, 1]} : vector<8x64xf32> to vector<8x48xf32>
    %70 = arith.negf %69 : vector<8x48xf32>
    %71 = math.exp %70 : vector<8x48xf32>
    %cst_18 = arith.constant 1.000000e+00 : f32
    %72 = vector.broadcast %cst_18 : f32 to vector<8x48xf32>
    %73 = arith.addf %72, %71 : vector<8x48xf32>
    %74 = arith.divf %72, %73 : vector<8x48xf32>
    %75 = vector.extract_strided_slice %68 {offsets = [0, 48], sizes = [8, 16], strides = [1, 1]} : vector<8x64xf32> to vector<8x16xf32>
    %76 = math.tanh %75 : vector<8x16xf32>
    %77 = vector.extract_strided_slice %74 {offsets = [0, 0], sizes = [8, 16], strides = [1, 1]} : vector<8x48xf32> to vector<8x16xf32>
    %78 = vector.extract_strided_slice %74 {offsets = [0, 16], sizes = [8, 16], strides = [1, 1]} : vector<8x48xf32> to vector<8x16xf32>
    %79 = vector.extract_strided_slice %74 {offsets = [0, 32], sizes = [8, 16], strides = [1, 1]} : vector<8x48xf32> to vector<8x16xf32>
    %80 = arith.mulf %78, %64 : vector<8x16xf32>
    %81 = arith.mulf %77, %76 : vector<8x16xf32>
    %82 = arith.addf %80, %81 : vector<8x16xf32>
    %83 = math.tanh %82 : vector<8x16xf32>
    %84 = arith.mulf %79, %83 : vector<8x16xf32>
    %c2_i32_19 = arith.constant 2 : i32
    %85 = vector.broadcast %c2_i32_19 : i32 to vector<8x16xi32>
    %86 = arith.cmpi sgt, %14, %85 : vector<8x16xi32>
    %87 = arith.select %86, %84, %63 : vector<8x16xi1>, vector<8x16xf32>
    %88 = arith.select %86, %82, %64 : vector<8x16xi1>, vector<8x16xf32>
    %89 = vector.extract_strided_slice %12 {offsets = [24, 0], sizes = [8, 64], strides = [1, 1]} : vector<64x64xf32> to vector<8x64xf32>
    %90 = arith.truncf %87 : vector<8x16xf32> to vector<8x16xbf16>
    %cst_20 = arith.constant dense<0.000000e+00> : vector<8x64xf32>
    %91 = tpu.matmul %90, %13, %cst_20 {dimension_numbers = #tpu.dot_dimension_numbers<[1], [0], [0], [1], [0, 0, 1, 1], [], []>} : vector<8x16xbf16>, vector<16x64xbf16>, vector<8x64xf32> -> vector<8x64xf32>
    %92 = arith.addf %89, %91 : vector<8x64xf32>
    %93 = vector.extract_strided_slice %92 {offsets = [0, 0], sizes = [8, 48], strides = [1, 1]} : vector<8x64xf32> to vector<8x48xf32>
    %94 = arith.negf %93 : vector<8x48xf32>
    %95 = math.exp %94 : vector<8x48xf32>
    %cst_21 = arith.constant 1.000000e+00 : f32
    %96 = vector.broadcast %cst_21 : f32 to vector<8x48xf32>
    %97 = arith.addf %96, %95 : vector<8x48xf32>
    %98 = arith.divf %96, %97 : vector<8x48xf32>
    %99 = vector.extract_strided_slice %92 {offsets = [0, 48], sizes = [8, 16], strides = [1, 1]} : vector<8x64xf32> to vector<8x16xf32>
    %100 = math.tanh %99 : vector<8x16xf32>
    %101 = vector.extract_strided_slice %98 {offsets = [0, 0], sizes = [8, 16], strides = [1, 1]} : vector<8x48xf32> to vector<8x16xf32>
    %102 = vector.extract_strided_slice %98 {offsets = [0, 16], sizes = [8, 16], strides = [1, 1]} : vector<8x48xf32> to vector<8x16xf32>
    %103 = vector.extract_strided_slice %98 {offsets = [0, 32], sizes = [8, 16], strides = [1, 1]} : vector<8x48xf32> to vector<8x16xf32>
    %104 = arith.mulf %102, %88 : vector<8x16xf32>
    %105 = arith.mulf %101, %100 : vector<8x16xf32>
    %106 = arith.addf %104, %105 : vector<8x16xf32>
    %107 = math.tanh %106 : vector<8x16xf32>
    %108 = arith.mulf %103, %107 : vector<8x16xf32>
    %c3_i32 = arith.constant 3 : i32
    %109 = vector.broadcast %c3_i32 : i32 to vector<8x16xi32>
    %110 = arith.cmpi sgt, %14, %109 : vector<8x16xi32>
    %111 = arith.select %110, %108, %87 : vector<8x16xi1>, vector<8x16xf32>
    %112 = arith.select %110, %106, %88 : vector<8x16xi1>, vector<8x16xf32>
    %113 = vector.extract_strided_slice %12 {offsets = [32, 0], sizes = [8, 64], strides = [1, 1]} : vector<64x64xf32> to vector<8x64xf32>
    %114 = arith.truncf %111 : vector<8x16xf32> to vector<8x16xbf16>
    %cst_22 = arith.constant dense<0.000000e+00> : vector<8x64xf32>
    %115 = tpu.matmul %114, %13, %cst_22 {dimension_numbers = #tpu.dot_dimension_numbers<[1], [0], [0], [1], [0, 0, 1, 1], [], []>} : vector<8x16xbf16>, vector<16x64xbf16>, vector<8x64xf32> -> vector<8x64xf32>
    %116 = arith.addf %113, %115 : vector<8x64xf32>
    %117 = vector.extract_strided_slice %116 {offsets = [0, 0], sizes = [8, 48], strides = [1, 1]} : vector<8x64xf32> to vector<8x48xf32>
    %118 = arith.negf %117 : vector<8x48xf32>
    %119 = math.exp %118 : vector<8x48xf32>
    %cst_23 = arith.constant 1.000000e+00 : f32
    %120 = vector.broadcast %cst_23 : f32 to vector<8x48xf32>
    %121 = arith.addf %120, %119 : vector<8x48xf32>
    %122 = arith.divf %120, %121 : vector<8x48xf32>
    %123 = vector.extract_strided_slice %116 {offsets = [0, 48], sizes = [8, 16], strides = [1, 1]} : vector<8x64xf32> to vector<8x16xf32>
    %124 = math.tanh %123 : vector<8x16xf32>
    %125 = vector.extract_strided_slice %122 {offsets = [0, 0], sizes = [8, 16], strides = [1, 1]} : vector<8x48xf32> to vector<8x16xf32>
    %126 = vector.extract_strided_slice %122 {offsets = [0, 16], sizes = [8, 16], strides = [1, 1]} : vector<8x48xf32> to vector<8x16xf32>
    %127 = vector.extract_strided_slice %122 {offsets = [0, 32], sizes = [8, 16], strides = [1, 1]} : vector<8x48xf32> to vector<8x16xf32>
    %128 = arith.mulf %126, %112 : vector<8x16xf32>
    %129 = arith.mulf %125, %124 : vector<8x16xf32>
    %130 = arith.addf %128, %129 : vector<8x16xf32>
    %131 = math.tanh %130 : vector<8x16xf32>
    %132 = arith.mulf %127, %131 : vector<8x16xf32>
    %c4_i32 = arith.constant 4 : i32
    %133 = vector.broadcast %c4_i32 : i32 to vector<8x16xi32>
    %134 = arith.cmpi sgt, %14, %133 : vector<8x16xi32>
    %135 = arith.select %134, %132, %111 : vector<8x16xi1>, vector<8x16xf32>
    %136 = arith.select %134, %130, %112 : vector<8x16xi1>, vector<8x16xf32>
    %137 = vector.extract_strided_slice %12 {offsets = [40, 0], sizes = [8, 64], strides = [1, 1]} : vector<64x64xf32> to vector<8x64xf32>
    %138 = arith.truncf %135 : vector<8x16xf32> to vector<8x16xbf16>
    %cst_24 = arith.constant dense<0.000000e+00> : vector<8x64xf32>
    %139 = tpu.matmul %138, %13, %cst_24 {dimension_numbers = #tpu.dot_dimension_numbers<[1], [0], [0], [1], [0, 0, 1, 1], [], []>} : vector<8x16xbf16>, vector<16x64xbf16>, vector<8x64xf32> -> vector<8x64xf32>
    %140 = arith.addf %137, %139 : vector<8x64xf32>
    %141 = vector.extract_strided_slice %140 {offsets = [0, 0], sizes = [8, 48], strides = [1, 1]} : vector<8x64xf32> to vector<8x48xf32>
    %142 = arith.negf %141 : vector<8x48xf32>
    %143 = math.exp %142 : vector<8x48xf32>
    %cst_25 = arith.constant 1.000000e+00 : f32
    %144 = vector.broadcast %cst_25 : f32 to vector<8x48xf32>
    %145 = arith.addf %144, %143 : vector<8x48xf32>
    %146 = arith.divf %144, %145 : vector<8x48xf32>
    %147 = vector.extract_strided_slice %140 {offsets = [0, 48], sizes = [8, 16], strides = [1, 1]} : vector<8x64xf32> to vector<8x16xf32>
    %148 = math.tanh %147 : vector<8x16xf32>
    %149 = vector.extract_strided_slice %146 {offsets = [0, 0], sizes = [8, 16], strides = [1, 1]} : vector<8x48xf32> to vector<8x16xf32>
    %150 = vector.extract_strided_slice %146 {offsets = [0, 16], sizes = [8, 16], strides = [1, 1]} : vector<8x48xf32> to vector<8x16xf32>
    %151 = vector.extract_strided_slice %146 {offsets = [0, 32], sizes = [8, 16], strides = [1, 1]} : vector<8x48xf32> to vector<8x16xf32>
    %152 = arith.mulf %150, %136 : vector<8x16xf32>
    %153 = arith.mulf %149, %148 : vector<8x16xf32>
    %154 = arith.addf %152, %153 : vector<8x16xf32>
    %155 = math.tanh %154 : vector<8x16xf32>
    %156 = arith.mulf %151, %155 : vector<8x16xf32>
    %c5_i32 = arith.constant 5 : i32
    %157 = vector.broadcast %c5_i32 : i32 to vector<8x16xi32>
    %158 = arith.cmpi sgt, %14, %157 : vector<8x16xi32>
    %159 = arith.select %158, %156, %135 : vector<8x16xi1>, vector<8x16xf32>
    %160 = arith.select %158, %154, %136 : vector<8x16xi1>, vector<8x16xf32>
    %161 = vector.extract_strided_slice %12 {offsets = [48, 0], sizes = [8, 64], strides = [1, 1]} : vector<64x64xf32> to vector<8x64xf32>
    %162 = arith.truncf %159 : vector<8x16xf32> to vector<8x16xbf16>
    %cst_26 = arith.constant dense<0.000000e+00> : vector<8x64xf32>
    %163 = tpu.matmul %162, %13, %cst_26 {dimension_numbers = #tpu.dot_dimension_numbers<[1], [0], [0], [1], [0, 0, 1, 1], [], []>} : vector<8x16xbf16>, vector<16x64xbf16>, vector<8x64xf32> -> vector<8x64xf32>
    %164 = arith.addf %161, %163 : vector<8x64xf32>
    %165 = vector.extract_strided_slice %164 {offsets = [0, 0], sizes = [8, 48], strides = [1, 1]} : vector<8x64xf32> to vector<8x48xf32>
    %166 = arith.negf %165 : vector<8x48xf32>
    %167 = math.exp %166 : vector<8x48xf32>
    %cst_27 = arith.constant 1.000000e+00 : f32
    %168 = vector.broadcast %cst_27 : f32 to vector<8x48xf32>
    %169 = arith.addf %168, %167 : vector<8x48xf32>
    %170 = arith.divf %168, %169 : vector<8x48xf32>
    %171 = vector.extract_strided_slice %164 {offsets = [0, 48], sizes = [8, 16], strides = [1, 1]} : vector<8x64xf32> to vector<8x16xf32>
    %172 = math.tanh %171 : vector<8x16xf32>
    %173 = vector.extract_strided_slice %170 {offsets = [0, 0], sizes = [8, 16], strides = [1, 1]} : vector<8x48xf32> to vector<8x16xf32>
    %174 = vector.extract_strided_slice %170 {offsets = [0, 16], sizes = [8, 16], strides = [1, 1]} : vector<8x48xf32> to vector<8x16xf32>
    %175 = vector.extract_strided_slice %170 {offsets = [0, 32], sizes = [8, 16], strides = [1, 1]} : vector<8x48xf32> to vector<8x16xf32>
    %176 = arith.mulf %174, %160 : vector<8x16xf32>
    %177 = arith.mulf %173, %172 : vector<8x16xf32>
    %178 = arith.addf %176, %177 : vector<8x16xf32>
    %179 = math.tanh %178 : vector<8x16xf32>
    %180 = arith.mulf %175, %179 : vector<8x16xf32>
    %c6_i32 = arith.constant 6 : i32
    %181 = vector.broadcast %c6_i32 : i32 to vector<8x16xi32>
    %182 = arith.cmpi sgt, %14, %181 : vector<8x16xi32>
    %183 = arith.select %182, %180, %159 : vector<8x16xi1>, vector<8x16xf32>
    %184 = arith.select %182, %178, %160 : vector<8x16xi1>, vector<8x16xf32>
    %185 = vector.extract_strided_slice %12 {offsets = [56, 0], sizes = [8, 64], strides = [1, 1]} : vector<64x64xf32> to vector<8x64xf32>
    %186 = arith.truncf %183 : vector<8x16xf32> to vector<8x16xbf16>
    %cst_28 = arith.constant dense<0.000000e+00> : vector<8x64xf32>
    %187 = tpu.matmul %186, %13, %cst_28 {dimension_numbers = #tpu.dot_dimension_numbers<[1], [0], [0], [1], [0, 0, 1, 1], [], []>} : vector<8x16xbf16>, vector<16x64xbf16>, vector<8x64xf32> -> vector<8x64xf32>
    %188 = arith.addf %185, %187 : vector<8x64xf32>
    %189 = vector.extract_strided_slice %188 {offsets = [0, 0], sizes = [8, 48], strides = [1, 1]} : vector<8x64xf32> to vector<8x48xf32>
    %190 = arith.negf %189 : vector<8x48xf32>
    %191 = math.exp %190 : vector<8x48xf32>
    %cst_29 = arith.constant 1.000000e+00 : f32
    %192 = vector.broadcast %cst_29 : f32 to vector<8x48xf32>
    %193 = arith.addf %192, %191 : vector<8x48xf32>
    %194 = arith.divf %192, %193 : vector<8x48xf32>
    %195 = vector.extract_strided_slice %188 {offsets = [0, 48], sizes = [8, 16], strides = [1, 1]} : vector<8x64xf32> to vector<8x16xf32>
    %196 = math.tanh %195 : vector<8x16xf32>
    %197 = vector.extract_strided_slice %194 {offsets = [0, 0], sizes = [8, 16], strides = [1, 1]} : vector<8x48xf32> to vector<8x16xf32>
    %198 = vector.extract_strided_slice %194 {offsets = [0, 16], sizes = [8, 16], strides = [1, 1]} : vector<8x48xf32> to vector<8x16xf32>
    %199 = vector.extract_strided_slice %194 {offsets = [0, 32], sizes = [8, 16], strides = [1, 1]} : vector<8x48xf32> to vector<8x16xf32>
    %200 = arith.mulf %198, %184 : vector<8x16xf32>
    %201 = arith.mulf %197, %196 : vector<8x16xf32>
    %202 = arith.addf %200, %201 : vector<8x16xf32>
    %203 = math.tanh %202 : vector<8x16xf32>
    %204 = arith.mulf %199, %203 : vector<8x16xf32>
    %c7_i32 = arith.constant 7 : i32
    %205 = vector.broadcast %c7_i32 : i32 to vector<8x16xi32>
    %206 = arith.cmpi sgt, %14, %205 : vector<8x16xi32>
    %207 = arith.select %206, %204, %183 : vector<8x16xi1>, vector<8x16xf32>
    %208 = arith.truncf %207 : vector<8x16xf32> to vector<8x16xbf16>
    %c0_30 = arith.constant 0 : index
    %c0_31 = arith.constant 0 : index
    %209 = vector.load %arg5[%c0_30, %c0_31] : memref<16x32xbf16, #tpu.memory_space<vmem>>, vector<16x32xbf16>
    %cst_32 = arith.constant dense<0.000000e+00> : vector<8x32xf32>
    %210 = tpu.matmul %208, %209, %cst_32 {dimension_numbers = #tpu.dot_dimension_numbers<[1], [0], [0], [1], [0, 0, 1, 1], [], []>} : vector<8x16xbf16>, vector<16x32xbf16>, vector<8x32xf32> -> vector<8x32xf32>
    %c0_33 = arith.constant 0 : index
    %c0_34 = arith.constant 0 : index
    %211 = vector.load %arg6[%c0_33, %c0_34] : memref<1x32xf32, #tpu.memory_space<vmem>>, vector<1x32xf32>
    %212 = vector.broadcast %211 : vector<1x32xf32> to vector<8x32xf32>
    %213 = arith.addf %210, %212 : vector<8x32xf32>
    %214 = arith.truncf %213 : vector<8x32xf32> to vector<8x32xbf16>
    %c0_35 = arith.constant 0 : index
    %c0_36 = arith.constant 0 : index
    %215 = vector.load %arg7[%c0_35, %c0_36] : memref<32x64xbf16, #tpu.memory_space<vmem>>, vector<32x64xbf16>
    %cst_37 = arith.constant dense<0.000000e+00> : vector<8x64xf32>
    %216 = tpu.matmul %214, %215, %cst_37 {dimension_numbers = #tpu.dot_dimension_numbers<[1], [0], [0], [1], [0, 0, 1, 1], [], []>} : vector<8x32xbf16>, vector<32x64xbf16>, vector<8x64xf32> -> vector<8x64xf32>
    %c0_38 = arith.constant 0 : index
    %c0_39 = arith.constant 0 : index
    %217 = vector.load %arg8[%c0_38, %c0_39] : memref<1x64xf32, #tpu.memory_space<vmem>>, vector<1x64xf32>
    %218 = vector.broadcast %217 : vector<1x64xf32> to vector<8x64xf32>
    %219 = arith.addf %216, %218 : vector<8x64xf32>
    %cst_40 = arith.constant 0.000000e+00 : f32
    %220 = vector.broadcast %cst_40 : f32 to vector<8x64xf32>
    %221 = arith.maximumf %219, %220 : vector<8x64xf32>
    %222 = arith.truncf %221 : vector<8x64xf32> to vector<8x64xbf16>
    %c0_41 = arith.constant 0 : index
    %c0_42 = arith.constant 0 : index
    %223 = vector.load %arg9[%c0_41, %c0_42] : memref<64x128xbf16, #tpu.memory_space<vmem>>, vector<64x128xbf16>
    %cst_43 = arith.constant dense<0.000000e+00> : vector<8x128xf32>
    %224 = tpu.matmul %222, %223, %cst_43 {dimension_numbers = #tpu.dot_dimension_numbers<[1], [0], [0], [1], [0, 0, 1, 1], [], []>} : vector<8x64xbf16>, vector<64x128xbf16>, vector<8x128xf32> -> vector<8x128xf32>
    %c0_44 = arith.constant 0 : index
    %c0_45 = arith.constant 0 : index
    %225 = vector.load %arg10[%c0_44, %c0_45] : memref<1x128xf32, #tpu.memory_space<vmem>>, vector<1x128xf32>
    %226 = vector.broadcast %225 : vector<1x128xf32> to vector<8x128xf32>
    %227 = arith.addf %224, %226 : vector<8x128xf32>
    %cst_46 = arith.constant 0.000000e+00 : f32
    %228 = vector.broadcast %cst_46 : f32 to vector<8x128xf32>
    %229 = arith.maximumf %227, %228 : vector<8x128xf32>
    %c0_i32_47 = arith.constant 0 : i32
    %230 = tpu.memref_slice %arg21[%c0_i32_47] : memref<3x!tpu.dma_semaphore, #tpu.memory_space<semaphore_mem>> -> memref<1x!tpu.dma_semaphore, #tpu.memory_space<semaphore_mem>>
    %231 = tpu.memref_squeeze %230 : memref<1x!tpu.dma_semaphore, #tpu.memory_space<semaphore_mem>> -> memref<!tpu.dma_semaphore, #tpu.memory_space<semaphore_mem>>
    tpu.wait_dma2 semaphore(%231 : memref<!tpu.dma_semaphore, #tpu.memory_space<semaphore_mem>>) src(%arg11 : memref<128x256xbf16, #tpu.memory_space<any>>) dst(%arg18 : memref<128x256xbf16, #tpu.memory_space<vmem>>)
    %232 = arith.truncf %229 : vector<8x128xf32> to vector<8x128xbf16>
    %c0_48 = arith.constant 0 : index
    %c0_49 = arith.constant 0 : index
    %233 = vector.load %arg18[%c0_48, %c0_49] : memref<128x256xbf16, #tpu.memory_space<vmem>>, vector<128x256xbf16>
    %cst_50 = arith.constant dense<0.000000e+00> : vector<8x256xf32>
    %234 = tpu.matmul %232, %233, %cst_50 {dimension_numbers = #tpu.dot_dimension_numbers<[1], [0], [0], [1], [0, 0, 1, 1], [], []>} : vector<8x128xbf16>, vector<128x256xbf16>, vector<8x256xf32> -> vector<8x256xf32>
    %c0_51 = arith.constant 0 : index
    %c0_52 = arith.constant 0 : index
    %235 = vector.load %arg12[%c0_51, %c0_52] : memref<1x256xf32, #tpu.memory_space<vmem>>, vector<1x256xf32>
    %236 = vector.broadcast %235 : vector<1x256xf32> to vector<8x256xf32>
    %237 = arith.addf %234, %236 : vector<8x256xf32>
    %cst_53 = arith.constant 0.000000e+00 : f32
    %238 = vector.broadcast %cst_53 : f32 to vector<8x256xf32>
    %239 = arith.maximumf %237, %238 : vector<8x256xf32>
    %c1_i32_54 = arith.constant 1 : i32
    %240 = tpu.memref_slice %arg21[%c1_i32_54] : memref<3x!tpu.dma_semaphore, #tpu.memory_space<semaphore_mem>> -> memref<1x!tpu.dma_semaphore, #tpu.memory_space<semaphore_mem>>
    %241 = tpu.memref_squeeze %240 : memref<1x!tpu.dma_semaphore, #tpu.memory_space<semaphore_mem>> -> memref<!tpu.dma_semaphore, #tpu.memory_space<semaphore_mem>>
    tpu.wait_dma2 semaphore(%241 : memref<!tpu.dma_semaphore, #tpu.memory_space<semaphore_mem>>) src(%arg13 : memref<256x512xbf16, #tpu.memory_space<any>>) dst(%arg19 : memref<256x512xbf16, #tpu.memory_space<vmem>>)
    %242 = arith.truncf %239 : vector<8x256xf32> to vector<8x256xbf16>
    %c0_55 = arith.constant 0 : index
    %c0_56 = arith.constant 0 : index
    %243 = vector.load %arg19[%c0_55, %c0_56] : memref<256x512xbf16, #tpu.memory_space<vmem>>, vector<256x512xbf16>
    %cst_57 = arith.constant dense<0.000000e+00> : vector<8x512xf32>
    %244 = tpu.matmul %242, %243, %cst_57 {dimension_numbers = #tpu.dot_dimension_numbers<[1], [0], [0], [1], [0, 0, 1, 1], [], []>} : vector<8x256xbf16>, vector<256x512xbf16>, vector<8x512xf32> -> vector<8x512xf32>
    %c0_58 = arith.constant 0 : index
    %c0_59 = arith.constant 0 : index
    %245 = vector.load %arg14[%c0_58, %c0_59] : memref<1x512xf32, #tpu.memory_space<vmem>>, vector<1x512xf32>
    %246 = vector.broadcast %245 : vector<1x512xf32> to vector<8x512xf32>
    %247 = arith.addf %244, %246 : vector<8x512xf32>
    %cst_60 = arith.constant 0.000000e+00 : f32
    %248 = vector.broadcast %cst_60 : f32 to vector<8x512xf32>
    %249 = arith.maximumf %247, %248 : vector<8x512xf32>
    %c2_i32_61 = arith.constant 2 : i32
    %250 = tpu.memref_slice %arg21[%c2_i32_61] : memref<3x!tpu.dma_semaphore, #tpu.memory_space<semaphore_mem>> -> memref<1x!tpu.dma_semaphore, #tpu.memory_space<semaphore_mem>>
    %251 = tpu.memref_squeeze %250 : memref<1x!tpu.dma_semaphore, #tpu.memory_space<semaphore_mem>> -> memref<!tpu.dma_semaphore, #tpu.memory_space<semaphore_mem>>
    tpu.wait_dma2 semaphore(%251 : memref<!tpu.dma_semaphore, #tpu.memory_space<semaphore_mem>>) src(%arg15 : memref<512x768xbf16, #tpu.memory_space<any>>) dst(%arg20 : memref<512x768xbf16, #tpu.memory_space<vmem>>)
    %252 = arith.truncf %249 : vector<8x512xf32> to vector<8x512xbf16>
    %c0_62 = arith.constant 0 : index
    %c0_63 = arith.constant 0 : index
    %253 = vector.load %arg20[%c0_62, %c0_63] : memref<512x768xbf16, #tpu.memory_space<vmem>>, vector<512x768xbf16>
    %cst_64 = arith.constant dense<0.000000e+00> : vector<8x768xf32>
    %254 = tpu.matmul %252, %253, %cst_64 {dimension_numbers = #tpu.dot_dimension_numbers<[1], [0], [0], [1], [0, 0, 1, 1], [], []>} : vector<8x512xbf16>, vector<512x768xbf16>, vector<8x768xf32> -> vector<8x768xf32>
    %c0_65 = arith.constant 0 : index
    %c0_66 = arith.constant 0 : index
    %255 = vector.load %arg16[%c0_65, %c0_66] : memref<1x768xf32, #tpu.memory_space<vmem>>, vector<1x768xf32>
    %256 = vector.broadcast %255 : vector<1x768xf32> to vector<8x768xf32>
    %257 = arith.addf %254, %256 : vector<8x768xf32>
    %c0_67 = arith.constant 0 : index
    %c0_68 = arith.constant 0 : index
    %258 = vector.load %arg17[%c0_67, %c0_68] : memref<8x768xf32, #tpu.memory_space<vmem>>, vector<8x768xf32>
    tpu.vector_store %arg17[%c0_67, %c0_68], %257 {strides = array<i32>} : memref<8x768xf32, #tpu.memory_space<vmem>>, vector<8x768xf32>,
    return
  }
}

</mosaic_0001>

<bundles_post_ra>
// kernel: tpu_custom_call.1
= control target key start
LH: loop header
LB: loop body
LE: loop exit
PB: predicated region body
PF: predicated region fallthrough
CT: control target
= control target key end

     0   :  { %s5019_s0 = inlined_call_operand.vmem [shape: s32[8,16], index: 0, kind: input, shape index: {}]   ;;  %s5020_s1 = inlined_call_operand.vmem [shape: f32[64,36], index: 1, kind: input, shape index: {}]   ;;  %s5021_s2 = inlined_call_operand.vmem [shape: bf16[36,64], index: 2, kind: input, shape index: {}]   ;;  %s5022_s3 = inlined_call_operand.vmem [shape: f32[1,64], index: 3, kind: input, shape index: {}]   ;;  %s5023_s4 = inlined_call_operand.vmem [shape: bf16[16,64], index: 4, kind: input, shape index: {}]   ;;  %s5024_s5 = inlined_call_operand.vmem [shape: bf16[16,32], index: 5, kind: input, shape index: {}]   ;;  %s5025_s6 = inlined_call_operand.vmem [shape: f32[1,32], index: 6, kind: input, shape index: {}]   ;;  %s5026_s7 = inlined_call_operand.vmem [shape: bf16[32,64], index: 7, kind: input, shape index: {}]   ;;  %s5027_s8 = inlined_call_operand.vmem [shape: f32[1,64], index: 8, kind: input, shape index: {}]   ;;  %s5028_s9 = inlined_call_operand.vmem [shape: bf16[64,128], index: 9, kind: input, shape index: {}]   ;;  %s5029_s10 = inlined_call_operand.vmem [shape: f32[1,128], index: 10, kind: input, shape index: {}]   ;;  %s5030_s11 = inlined_call_operand.hbm [shape: bf16[128,256], index: 11, kind: input, shape index: {}]   ;;  %s5031_s12 = inlined_call_operand.vmem [shape: f32[1,256], index: 12, kind: input, shape index: {}]   ;;  %s5032_s13 = inlined_call_operand.hbm [shape: bf16[256,512], index: 13, kind: input, shape index: {}]   ;;  %s5033_s14 = inlined_call_operand.vmem [shape: f32[1,512], index: 14, kind: input, shape index: {}]   ;;  %s5034_s15 = inlined_call_operand.hbm [shape: bf16[512,768], index: 15, kind: input, shape index: {}]   ;;  %s5035_s16 = inlined_call_operand.vmem [shape: f32[1,768], index: 16, kind: input, shape index: {}]   ;;  %s5036_s17 = inlined_call_operand.hbm [shape: f32[8,768], index: 17, kind: output, shape index: {}]  }
   0x1   :  { %5038 = sst [smem:[#allocation20_spill]] %s5019_s0 }
   0x2   :  { %5039 = sst [smem:[#allocation21_spill]] %s5020_s1 }
   0x3   :  { %v109_v0 = vld [vmem:[%s5021_s2 + $0x10] sm:$0x3]  ;;  %v4750_v1 = vld [vmem:[%s5023_s4] sm:$0xff]  ;;  %vm142_vm0 = vcmask 1041408  }
   0x4   :  { %v123_v2 = vunpack.c.l.b16 %v109_v0  ;;  %195 = vmatpush.bf16.msra.mxu1 %v4750_v1  ;;  %261 = vmatpush.bf16.msra.mxu2 %v4750_v1 }
   0x5   :  { %331 = vmatpush.bf16.msra.mxu3 %v4750_v1 }
   0x6   :  { %v126_v3 = vpack.c.b16 %v123_v2, %v123_v2 }
   0x8   :  { %401 = vmatpush.bf16.msrb.mxu1 %v4750_v1 }
   0x9   :  { %22 = vsyncpa [#allocation7], 0  ;;  %471 = vmatpush.bf16.msrb.mxu2 %v4750_v1  ;;  %541 = vmatpush.bf16.msrb.mxu3 %v4750_v1  ;;  %v144_v4 = vsel %vm142_vm0, %v126_v3, 0  ;;  %v4645_v5 = vmov 0   ;;  %v4183_v6 = vld [vmem:[%s5021_s2 + $0x8] sm:$0xff]  ;;  %v4182_v7 = vld [vmem:[%s5021_s2] sm:$0xff] }
   0xa   :  { %196 = vmatmul.bf16.vlgmr.msra.gmra.mxu1 %v4645_v5  ;;  %151 = vmatpush.bf16.msra.mxu0 %v144_v4  ;;  %s5040_s19 = sld [smem:[#allocation21_spill]]  ;;  %vm129_vm1 = vcmask 293888   ;;  %v4775_v13 = vld [vmem:[%s5022_s3] ss:$0 sm:$0xff]  ;;  %s4646_s2 = smov 80   ;;  %vm184_vm7 = vcmask 130048  }
   0xb   :  { %s4647_s3 = smov 16   ;;  %s4648_s23 = smov 112  }
   0xc   :  { %611 = vmatpush.bf16.msra.mxu1 %v4750_v1  ;;  %s5041_s26 = sld [smem:[#allocation20_spill]]  ;;  %s4649_s27 = smov 96  }
   0xd   :  { %s59_s25 = sshll.u32 %s5030_s11, 4  ;;  %s4652_s11 = smov [#allocation4]   ;;  %s60_s25 = int_to_ptr.hbm [resolvable:$true] %s59_s25 }
   0xe   :  { %152 = vmatpush.bf16.msra.mxu0 %v4183_v6 }
  0x10   :  { %v93_v8 = vld [vmem:[%s5040_s19] sm:$0xff]  ;;  %v94_v9 = vld [vmem:[%s5040_s19 + $0x8] sm:$0xff] }
  0x11   :  { %v101_v10 = vpack.c.bf16 %v94_v9, %v93_v8  ;;  %v96_v8 = vld [vmem:[%s5040_s19 + $0x18] sm:$0xff] }
  0x12   :  { %153 = vmatpush.bf16.msra.mxu0 %v4182_v7  ;;  %v4785_v37 = vld [vmem:[%s5041_s26] sm:$0xff]  ;;  %v95_v7 = vld [vmem:[%s5040_s19 + $0x10] sm:$0xff]  ;;  %s73_s26 = sshll.u32 %s5032_s13, 4  ;;  %s74_s26 = int_to_ptr.hbm [resolvable:$true] %s73_s26 }
  0x13   :  { %vm239_vm6 = vcmp.gt.s32.totalorder %v4785_v37, 0  ;;  %v102_v9 = vpack.c.bf16 %v96_v8, %v95_v7  ;;  %vm309_vm12 = vcmp.gt.s32.totalorder %v4785_v37, 1 }
  0x15   :  { %3037 = vmatmul.msk.bf16.vlgmr.msra.gmra.mxu0 %vm129_vm1, %v101_v10 }
  0x25   :  { %3038 = vmatmul.msk.bf16.gmra.mxu0 %vm129_vm1, %v102_v9 }
  0x87   :  { %v197_v11 = vpop.f32.mrf.mxu1 }
  0x8f   :  { %v199_v12 = vpop.f32.mrf.mxu1 }
  0x92   :  { %v155_v14 = vpop.f32.mrf.mxu0 }
  0x93   :  { %v156_v15 = vadd.f32 %v4775_v13, %v155_v14 }
  0x95   :  { %v201_v16 = vadd.f32 %v197_v11, %v156_v15 }
  0x97   :  { %4477 = vtanh.f32 %v201_v16  ;;  %v3045_v18 = vmul.f32 -1.442695, %v201_v16 }
  0x99   :  { %4479 = vpow2.f32 %v3045_v18 }
  0x9a   :  { %v157_v45 = vpop.f32.mrf.mxu0 }
  0x9b   :  { %v158_v46 = vadd.f32 %v4775_v13, %v157_v45 }
  0x9d   :  { %v4478_v17 = vpop.eup %4477 }
  0x9e   :  { %224 = vrot.lane.b32.xlu0 %v4478_v17, %s4646_s2 }
  0x9f   :  { %v4480_v19 = vpop.eup %4479 }
  0xa0   :  { %v205_v20 = vadd.f32 1.0, %v4480_v19 }
  0xa2   :  { %4481 = vrcp.f32 %v205_v20  ;;  %v217_v26 = vand.u32 2147483648, %v205_v20  ;;  %vm211_vm3 = vweird.f32 %v205_v20  ;;  %v215_v27 = vand.u32 2147483647, %v205_v20  ;;  %v160_v18 = vpop.f32.mrf.mxu0 }
  0xa3   :  { %v161_v19 = vadd.f32 %v4775_v13, %v160_v18 }
  0xa4   :  { %v218_v29 = vor.u32 1.1754944e-38, %v217_v26  ;;  %vm216_vm5 = vcmp.eq.f32.partialorder %v215_v27, 8.507059e+37 }
  0xa8   :  { %v4482_v21 = vpop.eup %4481 }
  0xa9   :  { %v207_v22 = vmul.f32 %v4482_v21, %v205_v20  ;;  %vm212_vm2 = vweird.f32 %v4482_v21 }
  0xaa   :  { %vm213_vm4 = vmor %vm211_vm3, %vm212_vm2  ;;  %vm379_vm2 = vcmp.gt.s32.totalorder %v4785_v37, 2 }
  0xab   :  { %v208_v23 = vsub.f32 1.0, %v207_v22 }
  0xad   :  { %v209_v24 = vmul.f32 %v4482_v21, %v208_v23 }
  0xaf   :  { %v210_v25 = vadd.f32 %v4482_v21, %v209_v24 }
  0xb1   :  { %v214_v28 = vsel %vm213_vm4, %v4482_v21, %v210_v25 }
  0xb2   :  { %v219_v31 = vsel %vm216_vm5, %v218_v29, %v214_v28 }
  0xb3   :  { %v222_v33 = vmul.f32 0.0, %v219_v31 }
 0x110   :  { %v225_v30 = vpop.permute.xlu0 %224 }
 0x111   :  { %v227_v32 = vmul.f32 %v225_v30, %v219_v31 }
 0x113   :  { %229 = vrot.lane.b32.xlu0 %v227_v32, %s4647_s3 }
 0x185   :  { %v230_v34 = vpop.permute.xlu0 %229 }
 0x186   :  { %v232_v35 = vadd.f32 %v230_v34, %v222_v33 }
 0x188   :  { %4483 = vtanh.f32 %v232_v35  ;;  %246 = vrot.lane.b32.xlu2 %v232_v35, %s4648_s23 }
 0x18e   :  { %v4484_v36 = vpop.eup %4483 }
 0x18f   :  { %235 = vrot.lane.b32.xlu1 %v4484_v36, %s4647_s3 }
 0x1e2   :  { %v247_v38 = vpop.permute.xlu2 %246 }
 0x1e3   :  { %v249_v39 = vsel %vm239_vm6, %v247_v38, 0.0 }
 0x1e4   :  { %289 = vrot.lane.b32.xlu0 %v249_v39, %s4647_s3 }
 0x201   :  { %v236_v40 = vpop.permute.xlu1 %235 }
 0x202   :  { %v238_v41 = vmul.f32 %v236_v40, %v219_v31 }
 0x204   :  { %241 = vrot.lane.b32.xlu1 %v238_v41, %s4649_s27 }
 0x256   :  { %v290_v2 = vpop.permute.xlu0 %289 }
 0x276   :  { %v242_v42 = vpop.permute.xlu1 %241 }
 0x277   :  { %v244_v43 = vsel %vm239_vm6, %v242_v42, 0.0 }
 0x278   :  { %v250_v44 = vpack.c.bf16 %v244_v43, %v244_v43 }
 0x27a   :  { %3046 = vmatmul.msk.bf16.vlgmr.msra.gmra.mxu2 %vm184_vm7, %v250_v44 }
 0x27b   :  { %681 = vmatpush.bf16.msra.mxu2 %v4750_v1 }
 0x2fd   :  { %v263_v47 = vpop.f32.mrf.mxu2 }
 0x2fe   :  { %v267_v48 = vadd.f32 %v263_v47, %v158_v46 }
 0x300   :  { %4485 = vtanh.f32 %v267_v48  ;;  %v3047_v51 = vmul.f32 -1.442695, %v267_v48 }
 0x302   :  { %4487 = vpow2.f32 %v3047_v51 }
 0x305   :  { %v265_v49 = vpop.f32.mrf.mxu2 }
 0x306   :  { %v4486_v50 = vpop.eup %4485 }
 0x307   :  { %294 = vrot.lane.b32.xlu2 %v4486_v50, %s4646_s2 }
 0x308   :  { %v4488_v52 = vpop.eup %4487 }
 0x309   :  { %v271_v53 = vadd.f32 1.0, %v4488_v52  ;;  %v162_v52 = vpop.f32.mrf.mxu0 }
 0x30b   :  { %4489 = vrcp.f32 %v271_v53  ;;  %v283_v59 = vand.u32 2147483648, %v271_v53  ;;  %vm277_vm9 = vweird.f32 %v271_v53  ;;  %v281_v60 = vand.u32 2147483647, %v271_v53 }
 0x30d   :  { %v284_v62 = vor.u32 1.1754944e-38, %v283_v59  ;;  %vm282_vm11 = vcmp.eq.f32.partialorder %v281_v60, 8.507059e+37 }
 0x311   :  { %v4490_v54 = vpop.eup %4489 }
 0x312   :  { %v273_v55 = vmul.f32 %v4490_v54, %v271_v53  ;;  %vm278_vm8 = vweird.f32 %v4490_v54  ;;  %v163_v53 = vadd.f32 %v4775_v13, %v162_v52 }
 0x313   :  { %vm279_vm10 = vmor %vm277_vm9, %vm278_vm8  ;;  %vm449_vm8 = vcmp.gt.s32.totalorder %v4785_v37, 3 }
 0x314   :  { %v274_v56 = vsub.f32 1.0, %v273_v55 }
 0x316   :  { %v275_v57 = vmul.f32 %v4490_v54, %v274_v56 }
 0x318   :  { %v276_v58 = vadd.f32 %v4490_v54, %v275_v57 }
 0x31a   :  { %v280_v61 = vsel %vm279_vm10, %v4490_v54, %v276_v58 }
 0x31b   :  { %v285_v0 = vsel %vm282_vm11, %v284_v62, %v280_v61 }
 0x31c   :  { %v292_v3 = vmul.f32 %v290_v2, %v285_v0 }
 0x361   :  { %v295_v63 = vpop.permute.xlu2 %294 }
 0x362   :  { %v297_v1 = vmul.f32 %v295_v63, %v285_v0 }
 0x364   :  { %299 = vrot.lane.b32.xlu1 %v297_v1, %s4647_s3 }
 0x3d6   :  { %v300_v4 = vpop.permute.xlu1 %299 }
 0x3d7   :  { %v302_v5 = vadd.f32 %v300_v4, %v292_v3 }
 0x3d9   :  { %4491 = vtanh.f32 %v302_v5  ;;  %316 = vrot.lane.b32.xlu1 %v302_v5, %s4648_s23 }
 0x3df   :  { %v4492_v6 = vpop.eup %4491 }
 0x3e0   :  { %305 = vrot.lane.b32.xlu2 %v4492_v6, %s4647_s3 }
 0x43a   :  { %v306_v10 = vpop.permute.xlu2 %305 }
 0x43b   :  { %v308_v11 = vmul.f32 %v306_v10, %v285_v0 }
 0x43d   :  { %311 = vrot.lane.b32.xlu0 %v308_v11, %s4649_s27 }
 0x44b   :  { %v317_v12 = vpop.permute.xlu1 %316 }
 0x44c   :  { %v319_v14 = vsel %vm309_vm12, %v317_v12, %v249_v39 }
 0x44d   :  { %359 = vrot.lane.b32.xlu0 %v319_v14, %s4647_s3 }
 0x4af   :  { %v312_v15 = vpop.permute.xlu0 %311 }
 0x4b0   :  { %v314_v16 = vsel %vm309_vm12, %v312_v15, %v244_v43  ;;  %v97_v15 = vld [vmem:[%s5040_s19 + $0x20] sm:$0xff] }
 0x4b1   :  { %v320_v17 = vpack.c.bf16 %v314_v16, %v314_v16 }
 0x4b3   :  { %3048 = vmatmul.msk.bf16.vlgmr.msra.gmra.mxu3 %vm184_vm7, %v320_v17 }
 0x4bf   :  { %v360_v40 = vpop.permute.xlu0 %359 }
 0x536   :  { %v333_v20 = vpop.f32.mrf.mxu3 }
 0x537   :  { %v337_v21 = vadd.f32 %v333_v20, %v161_v19 }
 0x539   :  { %4493 = vtanh.f32 %v337_v21  ;;  %v3049_v24 = vmul.f32 -1.442695, %v337_v21 }
 0x53b   :  { %4495 = vpow2.f32 %v3049_v24 }
 0x53e   :  { %v335_v22 = vpop.f32.mrf.mxu3 }
 0x53f   :  { %v4494_v23 = vpop.eup %4493 }
 0x540   :  { %364 = vrot.lane.b32.xlu2 %v4494_v23, %s4646_s2 }
 0x541   :  { %v4496_v25 = vpop.eup %4495 }
 0x542   :  { %v341_v26 = vadd.f32 1.0, %v4496_v25 }
 0x544   :  { %4497 = vrcp.f32 %v341_v26  ;;  %v353_v32 = vand.u32 2147483648, %v341_v26  ;;  %vm347_vm14 = vweird.f32 %v341_v26  ;;  %v351_v33 = vand.u32 2147483647, %v341_v26 }
 0x546   :  { %v354_v35 = vor.u32 1.1754944e-38, %v353_v32  ;;  %vm352_vm0 = vcmp.eq.f32.partialorder %v351_v33, 8.507059e+37 }
 0x54a   :  { %v4498_v27 = vpop.eup %4497 }
 0x54b   :  { %v343_v28 = vmul.f32 %v4498_v27, %v341_v26  ;;  %vm348_vm13 = vweird.f32 %v4498_v27 }
 0x54c   :  { %vm349_vm15 = vmor %vm347_vm14, %vm348_vm13  ;;  %vm519_vm13 = vcmp.gt.s32.totalorder %v4785_v37, 4 }
 0x54d   :  { %v344_v29 = vsub.f32 1.0, %v343_v28 }
 0x54f   :  { %v345_v30 = vmul.f32 %v4498_v27, %v344_v29 }
 0x551   :  { %v346_v31 = vadd.f32 %v4498_v27, %v345_v30 }
 0x553   :  { %v350_v34 = vsel %vm349_vm15, %v4498_v27, %v346_v31 }
 0x554   :  { %v355_v38 = vsel %vm352_vm0, %v354_v35, %v350_v34 }
 0x555   :  { %v362_v41 = vmul.f32 %v360_v40, %v355_v38 }
 0x59a   :  { %v365_v36 = vpop.permute.xlu2 %364 }
 0x59b   :  { %v367_v39 = vmul.f32 %v365_v36, %v355_v38 }
 0x59d   :  { %369 = vrot.lane.b32.xlu1 %v367_v39, %s4647_s3 }
 0x60f   :  { %v370_v42 = vpop.permute.xlu1 %369 }
 0x610   :  { %v372_v43 = vadd.f32 %v370_v42, %v362_v41 }
 0x612   :  { %4499 = vtanh.f32 %v372_v43  ;;  %386 = vrot.lane.b32.xlu1 %v372_v43, %s4648_s23 }
 0x618   :  { %v4500_v44 = vpop.eup %4499 }
 0x619   :  { %375 = vrot.lane.b32.xlu2 %v4500_v44, %s4647_s3 }
 0x673   :  { %v376_v45 = vpop.permute.xlu2 %375 }
 0x674   :  { %v378_v46 = vmul.f32 %v376_v45, %v355_v38 }
 0x676   :  { %381 = vrot.lane.b32.xlu0 %v378_v46, %s4649_s27 }
 0x684   :  { %v387_v47 = vpop.permute.xlu1 %386 }
 0x685   :  { %v389_v48 = vsel %vm379_vm2, %v387_v47, %v319_v14 }
 0x686   :  { %429 = vrot.lane.b32.xlu0 %v389_v48, %s4647_s3 }
 0x6e8   :  { %v382_v49 = vpop.permute.xlu0 %381 }
 0x6e9   :  { %v384_v50 = vsel %vm379_vm2, %v382_v49, %v314_v16  ;;  %v98_v16 = vld [vmem:[%s5040_s19 + $0x28] sm:$0xff] }
 0x6ea   :  { %v390_v51 = vpack.c.bf16 %v384_v50, %v384_v50  ;;  %v103_v17 = vpack.c.bf16 %v98_v16, %v97_v15 }
 0x6ec   :  { %3050 = vmatmul.msk.bf16.vlgmr.msrb.gmra.mxu1 %vm184_vm7, %v390_v51  ;;  %3039 = vmatmul.msk.bf16.gmra.mxu0 %vm129_vm1, %v103_v17 }
 0x6f8   :  { %v430_v9 = vpop.permute.xlu0 %429 }
 0x769   :  { %v403_v54 = vpop.f32.mrf.mxu1  ;;  %v165_v25 = vpop.f32.mrf.mxu0 }
 0x76a   :  { %v407_v55 = vadd.f32 %v403_v54, %v163_v53  ;;  %v166_v26 = vadd.f32 %v4775_v13, %v165_v25 }
 0x76c   :  { %4501 = vtanh.f32 %v407_v55  ;;  %v3051_v58 = vmul.f32 -1.442695, %v407_v55 }
 0x76e   :  { %4503 = vpow2.f32 %v3051_v58 }
 0x771   :  { %v405_v56 = vpop.f32.mrf.mxu1 }
 0x772   :  { %v4502_v57 = vpop.eup %4501 }
 0x773   :  { %434 = vrot.lane.b32.xlu2 %v4502_v57, %s4646_s2 }
 0x774   :  { %v4504_v59 = vpop.eup %4503 }
 0x775   :  { %v411_v60 = vadd.f32 1.0, %v4504_v59  ;;  %v167_v59 = vpop.f32.mrf.mxu0 }
 0x777   :  { %4505 = vrcp.f32 %v411_v60  ;;  %v423_v2 = vand.u32 2147483648, %v411_v60  ;;  %vm417_vm4 = vweird.f32 %v411_v60  ;;  %v421_v3 = vand.u32 2147483647, %v411_v60 }
 0x779   :  { %v424_v5 = vor.u32 1.1754944e-38, %v423_v2  ;;  %vm422_vm6 = vcmp.eq.f32.partialorder %v421_v3, 8.507059e+37 }
 0x77d   :  { %v4506_v61 = vpop.eup %4505 }
 0x77e   :  { %v413_v62 = vmul.f32 %v4506_v61, %v411_v60  ;;  %vm418_vm3 = vweird.f32 %v4506_v61  ;;  %v168_v60 = vadd.f32 %v4775_v13, %v167_v59 }
 0x77f   :  { %vm419_vm5 = vmor %vm417_vm4, %vm418_vm3  ;;  %vm589_vm3 = vcmp.gt.s32.totalorder %v4785_v37, 5 }
 0x780   :  { %v414_v63 = vsub.f32 1.0, %v413_v62 }
 0x782   :  { %v415_v0 = vmul.f32 %v4506_v61, %v414_v63 }
 0x784   :  { %v416_v1 = vadd.f32 %v4506_v61, %v415_v0 }
 0x786   :  { %v420_v4 = vsel %vm419_vm5, %v4506_v61, %v416_v1 }
 0x787   :  { %v425_v7 = vsel %vm422_vm6, %v424_v5, %v420_v4 }
 0x788   :  { %v432_v10 = vmul.f32 %v430_v9, %v425_v7 }
 0x7cd   :  { %v435_v6 = vpop.permute.xlu2 %434 }
 0x7ce   :  { %v437_v8 = vmul.f32 %v435_v6, %v425_v7 }
 0x7d0   :  { %439 = vrot.lane.b32.xlu1 %v437_v8, %s4647_s3 }
 0x842   :  { %v440_v11 = vpop.permute.xlu1 %439 }
 0x843   :  { %v442_v12 = vadd.f32 %v440_v11, %v432_v10 }
 0x845   :  { %4507 = vtanh.f32 %v442_v12  ;;  %456 = vrot.lane.b32.xlu1 %v442_v12, %s4648_s23 }
 0x84b   :  { %v4508_v14 = vpop.eup %4507 }
 0x84c   :  { %445 = vrot.lane.b32.xlu2 %v4508_v14, %s4647_s3 }
 0x8a6   :  { %v446_v18 = vpop.permute.xlu2 %445 }
 0x8a7   :  { %v448_v19 = vmul.f32 %v446_v18, %v425_v7 }
 0x8a9   :  { %451 = vrot.lane.b32.xlu0 %v448_v19, %s4649_s27 }
 0x8b7   :  { %v457_v20 = vpop.permute.xlu1 %456 }
 0x8b8   :  { %v459_v21 = vsel %vm449_vm8, %v457_v20, %v389_v48 }
 0x8b9   :  { %499 = vrot.lane.b32.xlu0 %v459_v21, %s4647_s3 }
 0x91b   :  { %v452_v22 = vpop.permute.xlu0 %451 }
 0x91c   :  { %v454_v23 = vsel %vm449_vm8, %v452_v22, %v384_v50  ;;  %v99_v22 = vld [vmem:[%s5040_s19 + $0x30] sm:$0xff]  ;;  %vm659_vm8 = vcmp.gt.s32.totalorder %v4785_v37, 6 }
 0x91d   :  { %v460_v24 = vpack.c.bf16 %v454_v23, %v454_v23 }
 0x91f   :  { %3052 = vmatmul.msk.bf16.vlgmr.msrb.gmra.mxu2 %vm184_vm7, %v460_v24 }
 0x92b   :  { %v500_v47 = vpop.permute.xlu0 %499 }
 0x9a2   :  { %v473_v27 = vpop.f32.mrf.mxu2 }
 0x9a3   :  { %v477_v28 = vadd.f32 %v473_v27, %v166_v26 }
 0x9a5   :  { %4509 = vtanh.f32 %v477_v28  ;;  %v3053_v31 = vmul.f32 -1.442695, %v477_v28 }
 0x9a7   :  { %4511 = vpow2.f32 %v3053_v31 }
 0x9aa   :  { %v475_v29 = vpop.f32.mrf.mxu2 }
 0x9ab   :  { %v4510_v30 = vpop.eup %4509 }
 0x9ac   :  { %504 = vrot.lane.b32.xlu2 %v4510_v30, %s4646_s2 }
 0x9ad   :  { %v4512_v32 = vpop.eup %4511 }
 0x9ae   :  { %v481_v33 = vadd.f32 1.0, %v4512_v32 }
 0x9b0   :  { %4513 = vrcp.f32 %v481_v33  ;;  %v493_v40 = vand.u32 2147483648, %v481_v33  ;;  %vm487_vm10 = vweird.f32 %v481_v33  ;;  %v491_v41 = vand.u32 2147483647, %v481_v33 }
 0x9b2   :  { %v494_v43 = vor.u32 1.1754944e-38, %v493_v40  ;;  %vm492_vm12 = vcmp.eq.f32.partialorder %v491_v41, 8.507059e+37 }
 0x9b6   :  { %v4514_v34 = vpop.eup %4513 }
 0x9b7   :  { %v483_v35 = vmul.f32 %v4514_v34, %v481_v33  ;;  %vm488_vm9 = vweird.f32 %v4514_v34 }
 0x9b8   :  { %vm489_vm11 = vmor %vm487_vm10, %vm488_vm9 }
 0x9b9   :  { %v484_v36 = vsub.f32 1.0, %v483_v35 }
 0x9bb   :  { %v485_v38 = vmul.f32 %v4514_v34, %v484_v36 }
 0x9bd   :  { %v486_v39 = vadd.f32 %v4514_v34, %v485_v38 }
 0x9bf   :  { %v490_v42 = vsel %vm489_vm11, %v4514_v34, %v486_v39 }
 0x9c0   :  { %v495_v45 = vsel %vm492_vm12, %v494_v43, %v490_v42 }
 0x9c1   :  { %v502_v48 = vmul.f32 %v500_v47, %v495_v45 }
 0xa06   :  { %v505_v44 = vpop.permute.xlu2 %504 }
 0xa07   :  { %v507_v46 = vmul.f32 %v505_v44, %v495_v45 }
 0xa09   :  { %509 = vrot.lane.b32.xlu1 %v507_v46, %s4647_s3 }
 0xa7b   :  { %v510_v49 = vpop.permute.xlu1 %509 }
 0xa7c   :  { %v512_v50 = vadd.f32 %v510_v49, %v502_v48 }
 0xa7e   :  { %4515 = vtanh.f32 %v512_v50  ;;  %526 = vrot.lane.b32.xlu1 %v512_v50, %s4648_s23 }
 0xa84   :  { %v4516_v51 = vpop.eup %4515 }
 0xa85   :  { %515 = vrot.lane.b32.xlu2 %v4516_v51, %s4647_s3 }
 0xadf   :  { %v516_v52 = vpop.permute.xlu2 %515 }
 0xae0   :  { %v518_v53 = vmul.f32 %v516_v52, %v495_v45 }
 0xae2   :  { %521 = vrot.lane.b32.xlu0 %v518_v53, %s4649_s27 }
 0xaf0   :  { %v527_v54 = vpop.permute.xlu1 %526 }
 0xaf1   :  { %v529_v55 = vsel %vm519_vm13, %v527_v54, %v459_v21 }
 0xaf2   :  { %569 = vrot.lane.b32.xlu0 %v529_v55, %s4647_s3 }
 0xb54   :  { %v522_v56 = vpop.permute.xlu0 %521 }
 0xb55   :  { %v524_v57 = vsel %vm519_vm13, %v522_v56, %v454_v23  ;;  %v100_v23 = vld [vmem:[%s5040_s19 + $0x38] sm:$0xff]  ;;  %vm729_vm13 = vcmp.gt.s32.totalorder %v4785_v37, 7  ;;  %v4474_v37 = vld [vmem:[%s5025_s6] ss:$0 sm:$0xff]  ;;  %s4650_s19 = smov [#allocation2]  }
 0xb56   :  { %v530_v58 = vpack.c.bf16 %v524_v57, %v524_v57  ;;  %v104_v24 = vpack.c.bf16 %v100_v23, %v99_v22 }
 0xb58   :  { %3054 = vmatmul.msk.bf16.vlgmr.msrb.gmra.mxu3 %vm184_vm7, %v530_v58  ;;  %3040 = vmatmul.msk.bf16.gmra.mxu0 %vm129_vm1, %v104_v24 }
 0xb64   :  { %v570_v17 = vpop.permute.xlu0 %569 }
 0xbd5   :  { %v170_v32 = vpop.f32.mrf.mxu0 }
 0xbd6   :  { %v171_v33 = vadd.f32 %v4775_v13, %v170_v32  ;;  %v4186_v32 = vld [vmem:[%s5026_s7] sm:$0xff] }
 0xbdb   :  { %v543_v61 = vpop.f32.mrf.mxu3 }
 0xbdc   :  { %v547_v62 = vadd.f32 %v543_v61, %v168_v60 }
 0xbde   :  { %4517 = vtanh.f32 %v547_v62  ;;  %v3055_v1 = vmul.f32 -1.442695, %v547_v62 }
 0xbe0   :  { %4519 = vpow2.f32 %v3055_v1 }
 0xbe3   :  { %v545_v63 = vpop.f32.mrf.mxu3 }
 0xbe4   :  { %v4518_v0 = vpop.eup %4517 }
 0xbe5   :  { %574 = vrot.lane.b32.xlu2 %v4518_v0, %s4646_s2 }
 0xbe6   :  { %v4520_v2 = vpop.eup %4519 }
 0xbe7   :  { %v551_v3 = vadd.f32 1.0, %v4520_v2  ;;  %v172_v2 = vpop.f32.mrf.mxu0 }
 0xbe9   :  { %4521 = vrcp.f32 %v551_v3  ;;  %v563_v9 = vand.u32 2147483648, %v551_v3  ;;  %vm557_vm15 = vweird.f32 %v551_v3  ;;  %v561_v10 = vand.u32 2147483647, %v551_v3 }
 0xbeb   :  { %v564_v12 = vor.u32 1.1754944e-38, %v563_v9  ;;  %vm562_vm2 = vcmp.eq.f32.partialorder %v561_v10, 8.507059e+37 }
 0xbef   :  { %v4522_v4 = vpop.eup %4521 }
 0xbf0   :  { %v553_v5 = vmul.f32 %v4522_v4, %v551_v3  ;;  %vm558_vm14 = vweird.f32 %v4522_v4  ;;  %v173_v3 = vadd.f32 %v4775_v13, %v172_v2 }
 0xbf1   :  { %vm559_vm0 = vmor %vm557_vm15, %vm558_vm14  ;;  %vm840_vm14 = vcmask 523264  }
 0xbf2   :  { %v554_v6 = vsub.f32 1.0, %v553_v5 }
 0xbf4   :  { %v555_v7 = vmul.f32 %v4522_v4, %v554_v6 }
 0xbf6   :  { %v556_v8 = vadd.f32 %v4522_v4, %v555_v7 }
 0xbf8   :  { %v560_v11 = vsel %vm559_vm0, %v4522_v4, %v556_v8 }
 0xbf9   :  { %v565_v15 = vsel %vm562_vm2, %v564_v12, %v560_v11 }
 0xbfa   :  { %v572_v18 = vmul.f32 %v570_v17, %v565_v15 }
 0xc3f   :  { %v575_v14 = vpop.permute.xlu2 %574 }
 0xc40   :  { %v577_v16 = vmul.f32 %v575_v14, %v565_v15 }
 0xc42   :  { %579 = vrot.lane.b32.xlu1 %v577_v16, %s4647_s3 }
 0xcb4   :  { %v580_v19 = vpop.permute.xlu1 %579 }
 0xcb5   :  { %v582_v20 = vadd.f32 %v580_v19, %v572_v18 }
 0xcb7   :  { %4523 = vtanh.f32 %v582_v20  ;;  %596 = vrot.lane.b32.xlu1 %v582_v20, %s4648_s23 }
 0xcbd   :  { %v4524_v21 = vpop.eup %4523 }
 0xcbe   :  { %585 = vrot.lane.b32.xlu2 %v4524_v21, %s4647_s3 }
 0xd18   :  { %v586_v25 = vpop.permute.xlu2 %585 }
 0xd19   :  { %v588_v26 = vmul.f32 %v586_v25, %v565_v15 }
 0xd1b   :  { %591 = vrot.lane.b32.xlu0 %v588_v26, %s4649_s27 }
 0xd29   :  { %v597_v27 = vpop.permute.xlu1 %596 }
 0xd2a   :  { %v599_v28 = vsel %vm589_vm3, %v597_v27, %v529_v55 }
 0xd2b   :  { %639 = vrot.lane.b32.xlu0 %v599_v28, %s4647_s3 }
 0xd8d   :  { %v592_v29 = vpop.permute.xlu0 %591 }
 0xd8e   :  { %v594_v30 = vsel %vm589_vm3, %v592_v29, %v524_v57 }
 0xd8f   :  { %v600_v31 = vpack.c.bf16 %v594_v30, %v594_v30 }
 0xd91   :  { %3056 = vmatmul.msk.bf16.vlgmr.msra.gmra.mxu1 %vm184_vm7, %v600_v31  ;;  %v4187_v31 = vld [vmem:[%s5026_s7 + $0x8] sm:$0xff] }
 0xd92   :  { %795 = vmatpush.bf16.msrb.mxu1 %v4187_v31 }
 0xd96   :  { %796 = vmatpush.bf16.msrb.mxu1 %v4186_v32 }
 0xd9d   :  { %v640_v54 = vpop.permute.xlu0 %639 }
 0xe0e   :  { %v613_v34 = vpop.f32.mrf.mxu1 }
 0xe0f   :  { %v617_v35 = vadd.f32 %v613_v34, %v171_v33 }
 0xe11   :  { %4525 = vtanh.f32 %v617_v35  ;;  %v3057_v39 = vmul.f32 -1.442695, %v617_v35 }
 0xe13   :  { %4527 = vpow2.f32 %v3057_v39  ;;  %v4189_v39 = vld [vmem:[%s5028_s9 + $0x8] sm:$0xff] }
 0xe16   :  { %v615_v36 = vpop.f32.mrf.mxu1 }
 0xe17   :  { %v4526_v38 = vpop.eup %4525  ;;  %v4191_v36 = vld [vmem:[%s5028_s9 + $0x18] sm:$0xff] }
 0xe18   :  { %644 = vrot.lane.b32.xlu2 %v4526_v38, %s4646_s2  ;;  %848 = vmatpush.bf16.msrb.mxu2 %v4191_v36  ;;  %v4190_v38 = vld [vmem:[%s5028_s9 + $0x10] sm:$0xff] }
 0xe19   :  { %v4528_v40 = vpop.eup %4527 }
 0xe1a   :  { %v621_v41 = vadd.f32 1.0, %v4528_v40 }
 0xe1c   :  { %4529 = vrcp.f32 %v621_v41  ;;  %v633_v47 = vand.u32 2147483648, %v621_v41  ;;  %vm627_vm4 = vweird.f32 %v621_v41  ;;  %v631_v48 = vand.u32 2147483647, %v621_v41  ;;  %849 = vmatpush.bf16.msrb.mxu2 %v4190_v38 }
 0xe1e   :  { %v634_v50 = vor.u32 1.1754944e-38, %v633_v47  ;;  %vm632_vm6 = vcmp.eq.f32.partialorder %v631_v48, 8.507059e+37 }
 0xe20   :  { %850 = vmatpush.bf16.msrb.mxu2 %v4189_v39 }
 0xe22   :  { %v4530_v42 = vpop.eup %4529 }
 0xe23   :  { %v623_v43 = vmul.f32 %v4530_v42, %v621_v41  ;;  %vm628_vm1 = vweird.f32 %v4530_v42 }
 0xe24   :  { %vm629_vm5 = vmor %vm627_vm4, %vm628_vm1 }
 0xe25   :  { %v624_v44 = vsub.f32 1.0, %v623_v43 }
 0xe27   :  { %v625_v45 = vmul.f32 %v4530_v42, %v624_v44  ;;  %v4188_v44 = vld [vmem:[%s5028_s9] sm:$0xff] }
 0xe28   :  { %851 = vmatpush.bf16.msrb.mxu2 %v4188_v44 }
 0xe29   :  { %v626_v46 = vadd.f32 %v4530_v42, %v625_v45  ;;  %v4475_v45 = vld [vmem:[%s5027_s8] ss:$0 sm:$0xff]  ;;  %s4651_s8 = smov [#allocation3]  }
 0xe2a   :  { %s75_s4 = sshll.u32 %s4651_s8, 4  ;;  %s76_s4 = int_to_ptr.vmem [resolvable:$true] %s75_s4 }
 0xe2b   :  { %v630_v49 = vsel %vm629_vm5, %v4530_v42, %v626_v46 }
 0xe2c   :  { %v635_v52 = vsel %vm632_vm6, %v634_v50, %v630_v49 }
 0xe2d   :  { %v642_v55 = vmul.f32 %v640_v54, %v635_v52 }
 0xe72   :  { %v645_v51 = vpop.permute.xlu2 %644 }
 0xe73   :  { %v647_v53 = vmul.f32 %v645_v51, %v635_v52  ;;  %v4476_v51 = vld [vmem:[%s5029_s10] ss:$0 sm:$0xff] }
 0xe75   :  { %649 = vrot.lane.b32.xlu1 %v647_v53, %s4647_s3 }
 0xee7   :  { %v650_v56 = vpop.permute.xlu1 %649 }
 0xee8   :  { %v652_v57 = vadd.f32 %v650_v56, %v642_v55 }
 0xeea   :  { %4531 = vtanh.f32 %v652_v57  ;;  %666 = vrot.lane.b32.xlu1 %v652_v57, %s4648_s23 }
 0xef0   :  { %v4532_v58 = vpop.eup %4531 }
 0xef1   :  { %655 = vrot.lane.b32.xlu2 %v4532_v58, %s4647_s3 }
 0xf4b   :  { %v656_v59 = vpop.permute.xlu2 %655 }
 0xf4c   :  { %v658_v60 = vmul.f32 %v656_v59, %v635_v52 }
 0xf4e   :  { %661 = vrot.lane.b32.xlu0 %v658_v60, %s4649_s27 }
 0xf5c   :  { %v667_v61 = vpop.permute.xlu1 %666 }
 0xf5d   :  { %v669_v62 = vsel %vm659_vm8, %v667_v61, %v599_v28  ;;  %v4185_v28 = vld [vmem:[%s5024_s5] sm:$0xff] }
 0xf5e   :  { %709 = vrot.lane.b32.xlu0 %v669_v62, %s4647_s3  ;;  %758 = vmatpush.bf16.msra.mxu3 %v4185_v28 }
 0xfc0   :  { %v662_v63 = vpop.permute.xlu0 %661 }
 0xfc1   :  { %v664_v0 = vsel %vm659_vm8, %v662_v63, %v594_v30 }
 0xfc2   :  { %v670_v1 = vpack.c.bf16 %v664_v0, %v664_v0 }
 0xfc4   :  { %3058 = vmatmul.msk.bf16.vlgmr.msra.gmra.mxu2 %vm184_vm7, %v670_v1 }
 0xfd0   :  { %v710_v23 = vpop.permute.xlu0 %709 }
0x1047   :  { %v683_v4 = vpop.f32.mrf.mxu2 }
0x1048   :  { %v687_v5 = vadd.f32 %v683_v4, %v173_v3 }
0x104a   :  { %4533 = vtanh.f32 %v687_v5  ;;  %v3059_v8 = vmul.f32 -1.442695, %v687_v5 }
0x104c   :  { %4535 = vpow2.f32 %v3059_v8 }
0x104f   :  { %v685_v6 = vpop.f32.mrf.mxu2 }
0x1050   :  { %v4534_v7 = vpop.eup %4533 }
0x1051   :  { %714 = vrot.lane.b32.xlu2 %v4534_v7, %s4646_s2  ;;  %s61_s2 = sshll.u32 %s4650_s19, 4  ;;  %s62_s2 = int_to_ptr.vmem [resolvable:$true] %s61_s2 }
0x1052   :  { %v4536_v9 = vpop.eup %4535  ;;  %64 = dma.hbm_to_vmem [thread:$0]  %s60_s25, 2048, %s62_s2, [#allocation5] }
0x1053   :  { %v691_v10 = vadd.f32 1.0, %v4536_v9  ;;  %78 = dma.hbm_to_vmem [thread:$0]  %s74_s26, 8192, %s76_s4, [#allocation5 + $0x1] }
0x1055   :  { %4537 = vrcp.f32 %v691_v10  ;;  %v703_v17 = vand.u32 2147483648, %v691_v10  ;;  %vm697_vm10 = vweird.f32 %v691_v10  ;;  %v701_v13 = vand.u32 2147483647, %v691_v10 }
0x1057   :  { %v704_v19 = vor.u32 1.1754944e-38, %v703_v17  ;;  %vm702_vm12 = vcmp.eq.f32.partialorder %v701_v13, 8.507059e+37 }
0x105b   :  { %v4538_v11 = vpop.eup %4537 }
0x105c   :  { %v693_v12 = vmul.f32 %v4538_v11, %v691_v10  ;;  %vm698_vm9 = vweird.f32 %v4538_v11 }
0x105d   :  { %vm699_vm11 = vmor %vm697_vm10, %vm698_vm9 }
0x105e   :  { %v694_v14 = vsub.f32 1.0, %v693_v12 }
0x1060   :  { %v695_v15 = vmul.f32 %v4538_v11, %v694_v14 }
0x1062   :  { %v696_v16 = vadd.f32 %v4538_v11, %v695_v15 }
0x1064   :  { %v700_v18 = vsel %vm699_vm11, %v4538_v11, %v696_v16 }
0x1065   :  { %v705_v21 = vsel %vm702_vm12, %v704_v19, %v700_v18 }
0x1066   :  { %v712_v24 = vmul.f32 %v710_v23, %v705_v21 }
0x10ab   :  { %v715_v20 = vpop.permute.xlu2 %714 }
0x10ac   :  { %v717_v22 = vmul.f32 %v715_v20, %v705_v21 }
0x10ae   :  { %719 = vrot.lane.b32.xlu1 %v717_v22, %s4647_s3 }
0x1120   :  { %v720_v25 = vpop.permute.xlu1 %719 }
0x1121   :  { %v722_v26 = vadd.f32 %v720_v25, %v712_v24 }
0x1123   :  { %4539 = vtanh.f32 %v722_v26 }
0x1129   :  { %v4540_v27 = vpop.eup %4539 }
0x112a   :  { %725 = vrot.lane.b32.xlu2 %v4540_v27, %s4647_s3  ;;  %s87_s3 = sshll.u32 %s5034_s15, 4  ;;  %s88_s3 = int_to_ptr.hbm [resolvable:$true] %s87_s3 }
0x1184   :  { %v726_v29 = vpop.permute.xlu2 %725 }
0x1185   :  { %v728_v30 = vmul.f32 %v726_v29, %v705_v21 }
0x1187   :  { %731 = vrot.lane.b32.xlu0 %v728_v30, %s4649_s27  ;;  %s89_s27 = sshll.u32 %s4652_s11, 4  ;;  %s90_s27 = int_to_ptr.vmem [resolvable:$true] %s89_s27 }
0x1188   :  { %92 = dma.hbm_to_vmem [thread:$0]  %s88_s3, 24576, %s90_s27, [#allocation5 + $0x2] }
0x11f9   :  { %v732_v33 = vpop.permute.xlu0 %731 }
0x11fa   :  { %v734_v34 = vsel %vm729_vm13, %v732_v33, %v664_v0 }
0x11fb   :  { %v735_v35 = vpack.c.bf16 %v734_v34, %v734_v34 }
0x11fd   :  { %3064 = vmatmul.msk.bf16.vlgmr.msra.gmra.mxu3 %vm184_vm7, %v735_v35  ;;  %vm785_vm7 = vcmask 261120  }
0x1280   :  { %v760_v40 = vpop.f32.mrf.mxu3 }
0x1281   :  { %v761_v41 = vadd.f32 %v4474_v37, %v760_v40 }
0x1283   :  { %v764_v42 = vpack.c.bf16 %v761_v41, %v761_v41 }
0x1285   :  { %3073 = vmatmul.msk.bf16.vlgmr.msrb.gmra.mxu1 %vm785_vm7, %v764_v42 }
0x1288   :  { %v762_v43 = vpop.f32.mrf.mxu3 }
0x1302   :  { %v798_v46 = vpop.f32.mrf.mxu1 }
0x1303   :  { %v799_v47 = vadd.f32 %v4475_v45, %v798_v46 }
0x1305   :  { %v802_v48 = vmax.f32 %v799_v47, 0.0 }
0x1307   :  { %v803_v49 = vpack.c.bf16 %v802_v48, %v802_v48 }
0x1309   :  { %3090 = vmatmul.msk.bf16.vlgmr.msrb.gmra.mxu2 %vm840_vm14, %v803_v49 }
0x130a   :  { %v800_v50 = vpop.f32.mrf.mxu1 }
0x138c   :  { %v853_v52 = vpop.f32.mrf.mxu2 }
0x138d   :  { %v4913_v53 = vadd.f32 %v4476_v51, %v853_v52 }
0x138f   :  { %v857_v54 = vmax.f32 %v4913_v53, 0.0 }
0x1394   :  { %v855_v55 = vpop.f32.mrf.mxu2 }
0x1395   :  { %4637 = dma.done.wait [#allocation5], 2048 }
0x1396   :  { %4638 = vsyncadd [#allocation5], 4294965248  ;;  %v3149_v56 = vld [vmem:[#allocation2 + $0x70] sm:$0xf]  ;;  %v4207_v57 = vld [vmem:[#allocation2 + $0x74] sm:$0xf0]  ;;  %v862_v40 = vpack.c.bf16 %v857_v54, %v857_v54 }
0x1397   :  { %v4206_v58 = vld [vmem:[#allocation2 + $0x74] sm:$0xf]  ;;  %v3150_v59 = vor.u32 %v4207_v57, %v3149_v56  ;;  %v3151_v60 = vld [vmem:[#allocation2 + $0x78] sm:$0xf0]  ;;  %v3141_v61 = vld [vmem:[#allocation2 + $0x60] sm:$0xf] }
0x1398   :  { %v4205_v62 = vld [vmem:[#allocation2 + $0x64] sm:$0xf0]  ;;  %v3154_v63 = vor.u32 %v4206_v58, %v3151_v60  ;;  %v4204_v0 = vld [vmem:[#allocation2 + $0x64] sm:$0xf]  ;;  %v3143_v1 = vld [vmem:[#allocation2 + $0x68] sm:$0xf0] }
0x1399   :  { %965 = vmatpush.bf16.msrb.mxu3 %v3150_v59  ;;  %v3142_v2 = vor.u32 %v4205_v62, %v3141_v61  ;;  %v3146_v3 = vor.u32 %v4204_v0, %v3143_v1  ;;  %v3133_v4 = vld [vmem:[#allocation2 + $0x50] sm:$0xf]  ;;  %v4203_v5 = vld [vmem:[#allocation2 + $0x54] sm:$0xf0]  ;;  %v4202_v6 = vld [vmem:[#allocation2 + $0x54] sm:$0xf] }
0x139a   :  { %978 = vmatpush.bf16.msrb.mxu0 %v3154_v63  ;;  %v3135_v7 = vld [vmem:[#allocation2 + $0x58] sm:$0xf0]  ;;  %v3134_v8 = vor.u32 %v4203_v5, %v3133_v4  ;;  %v3125_v10 = vld [vmem:[#allocation2 + $0x40] sm:$0xf]  ;;  %v4201_v11 = vld [vmem:[#allocation2 + $0x44] sm:$0xf0] }
0x139b   :  { %v3138_v9 = vor.u32 %v4202_v6, %v3135_v7  ;;  %v4200_v12 = vld [vmem:[#allocation2 + $0x44] sm:$0xf]  ;;  %v3127_v14 = vld [vmem:[#allocation2 + $0x48] sm:$0xf0]  ;;  %v3126_v15 = vor.u32 %v4201_v11, %v3125_v10  ;;  %v3117_v17 = vld [vmem:[#allocation2 + $0x30] sm:$0xf] }
0x139c   :  { %v3130_v16 = vor.u32 %v4200_v12, %v3127_v14  ;;  %v4199_v13 = vld [vmem:[#allocation2 + $0x34] sm:$0xf0]  ;;  %v4198_v18 = vld [vmem:[#allocation2 + $0x34] sm:$0xf]  ;;  %v3119_v19 = vld [vmem:[#allocation2 + $0x38] sm:$0xf0] }
0x139d   :  { %966 = vmatpush.bf16.msrb.mxu3 %v3142_v2  ;;  %v3118_v20 = vor.u32 %v4199_v13, %v3117_v17  ;;  %v3122_v21 = vor.u32 %v4198_v18, %v3119_v19  ;;  %v3109_v22 = vld [vmem:[#allocation2 + $0x20] sm:$0xf]  ;;  %v4197_v23 = vld [vmem:[#allocation2 + $0x24] sm:$0xf0]  ;;  %v4196_v24 = vld [vmem:[#allocation2 + $0x24] sm:$0xf] }
0x139e   :  { %979 = vmatpush.bf16.msrb.mxu0 %v3146_v3  ;;  %v3111_v25 = vld [vmem:[#allocation2 + $0x28] sm:$0xf0]  ;;  %v3110_v26 = vor.u32 %v4197_v23, %v3109_v22  ;;  %v3101_v28 = vld [vmem:[#allocation2 + $0x10] sm:$0xf]  ;;  %v4195_v29 = vld [vmem:[#allocation2 + $0x14] sm:$0xf0] }
0x139f   :  { %v3114_v27 = vor.u32 %v4196_v24, %v3111_v25  ;;  %v4194_v30 = vld [vmem:[#allocation2 + $0x14] sm:$0xf]  ;;  %v3103_v31 = vld [vmem:[#allocation2 + $0x18] sm:$0xf0]  ;;  %v3102_v32 = vor.u32 %v4195_v29, %v3101_v28  ;;  %v3093_v34 = vld [vmem:[#allocation2] sm:$0xf] }
0x13a0   :  { %v3106_v33 = vor.u32 %v4194_v30, %v3103_v31  ;;  %v4193_v35 = vld [vmem:[#allocation2 + $0x4] sm:$0xf0]  ;;  %v4192_v36 = vld [vmem:[#allocation2 + $0x4] sm:$0xf]  ;;  %v3095_v38 = vld [vmem:[#allocation2 + $0x8] sm:$0xf0] }
0x13a1   :  { %967 = vmatpush.bf16.msrb.mxu3 %v3134_v8  ;;  %v3094_v39 = vor.u32 %v4193_v35, %v3093_v34  ;;  %v3098_v37 = vor.u32 %v4192_v36, %v3095_v38  ;;  %v879_v41 = vld [vmem:[%s5031_s12] sm:$0x3] }
0x13a2   :  { %980 = vmatpush.bf16.msrb.mxu0 %v3138_v9  ;;  %v882_v42 = vperm.slane %v879_v41, 1  ;;  %v881_v45 = vperm.slane %v879_v41, 0 }
0x13a5   :  { %968 = vmatpush.bf16.msrb.mxu3 %v3126_v15 }
0x13a6   :  { %981 = vmatpush.bf16.msrb.mxu0 %v3130_v16 }
0x13a9   :  { %969 = vmatpush.bf16.msrb.mxu3 %v3118_v20 }
0x13aa   :  { %982 = vmatpush.bf16.msrb.mxu0 %v3122_v21 }
0x13ad   :  { %970 = vmatpush.bf16.msrb.mxu3 %v3110_v26 }
0x13ae   :  { %983 = vmatpush.bf16.msrb.mxu0 %v3114_v27 }
0x13b1   :  { %971 = vmatpush.bf16.msrb.mxu3 %v3102_v32 }
0x13b2   :  { %984 = vmatpush.bf16.msrb.mxu0 %v3106_v33 }
0x13b5   :  { %972 = vmatpush.bf16.msrb.mxu3 %v3094_v39 }
0x13b6   :  { %985 = vmatpush.bf16.msrb.mxu0 %v3098_v37 }
0x13b8   :  { %973 = vmatmul.bf16.vlgmr.msrb.gmra.mxu3 %v862_v40 }
0x13b9   :  { %986 = vmatmul.bf16.vlgmr.msrb.gmra.mxu0 %v862_v40 }
0x1436   :  { %v987_v43 = vpop.f32.mrf.mxu0 }
0x1437   :  { %v4922_v44 = vadd.f32 %v987_v43, %v882_v42 }
0x1439   :  { %v992_v46 = vmax.f32 %v4922_v44, 0.0 }
0x143b   :  { %v974_v47 = vpop.f32.mrf.mxu3 }
0x143c   :  { %v4925_v48 = vadd.f32 %v974_v47, %v881_v45 }
0x143e   :  { %v991_v49 = vmax.f32 %v4925_v48, 0.0  ;;  %v989_v50 = vpop.f32.mrf.mxu0 }
0x1443   :  { %v976_v51 = vpop.f32.mrf.mxu3 }
0x1444   :  { %4639 = dma.done.wait [#allocation5 + $0x1], 8192 }
0x1445   :  { %4640 = vsyncadd [#allocation5 + $0x1], 4294959104  ;;  %v3269_v52 = vld [vmem:[#allocation3 + $0xe0] sm:$0xf]  ;;  %v4238_v53 = vld [vmem:[#allocation3 + $0xec] sm:$0xf0] }
0x1446   :  { %v3397_v54 = vld [vmem:[#allocation3 + $0x1e0] sm:$0xf]  ;;  %v3270_v55 = vor.u32 %v4238_v53, %v3269_v52  ;;  %v4270_v56 = vld [vmem:[#allocation3 + $0x1ec] sm:$0xf0]  ;;  %v4236_v57 = vld [vmem:[#allocation3 + $0xe4] sm:$0xf] }
0x1447   :  { %v3271_v58 = vld [vmem:[#allocation3 + $0xf0] sm:$0xf0]  ;;  %v3398_v59 = vor.u32 %v4270_v56, %v3397_v54  ;;  %v4268_v61 = vld [vmem:[#allocation3 + $0x1e4] sm:$0xf]  ;;  %v3253_v63 = vld [vmem:[#allocation3 + $0xc0] sm:$0xf] }
0x1448   :  { %v3274_v60 = vor.u32 %v4236_v57, %v3271_v58  ;;  %v3399_v62 = vld [vmem:[#allocation3 + $0x1f0] sm:$0xf0]  ;;  %1393 = vmatpush.bf16.msra.mxu1 %v3270_v55  ;;  %v4234_v1 = vld [vmem:[#allocation3 + $0xcc] sm:$0xf0]  ;;  %v3381_v2 = vld [vmem:[#allocation3 + $0x1c0] sm:$0xf] }
0x1449   :  { %v3402_v0 = vor.u32 %v4268_v61, %v3399_v62  ;;  %v4266_v3 = vld [vmem:[#allocation3 + $0x1cc] sm:$0xf0]  ;;  %1406 = vmatpush.bf16.msra.mxu2 %v3398_v59  ;;  %v3254_v4 = vor.u32 %v4234_v1, %v3253_v63  ;;  %v4232_v6 = vld [vmem:[#allocation3 + $0xc4] sm:$0xf]  ;;  %v3255_v7 = vld [vmem:[#allocation3 + $0xd0] sm:$0xf0] }
0x144a   :  { %1419 = vmatpush.bf16.msra.mxu3 %v3274_v60  ;;  %v3382_v5 = vor.u32 %v4266_v3, %v3381_v2  ;;  %v4264_v8 = vld [vmem:[#allocation3 + $0x1c4] sm:$0xf]  ;;  %v3258_v9 = vor.u32 %v4232_v6, %v3255_v7  ;;  %v3383_v10 = vld [vmem:[#allocation3 + $0x1d0] sm:$0xf0]  ;;  %v3237_v11 = vld [vmem:[#allocation3 + $0xa0] sm:$0xf] }
0x144b   :  { %1432 = vmatpush.bf16.msra.mxu0 %v3402_v0  ;;  %v4230_v12 = vld [vmem:[#allocation3 + $0xac] sm:$0xf0]  ;;  %v3386_v14 = vor.u32 %v4264_v8, %v3383_v10  ;;  %v3365_v15 = vld [vmem:[#allocation3 + $0x1a0] sm:$0xf]  ;;  %v4228_v17 = vld [vmem:[#allocation3 + $0xa4] sm:$0xf] }
0x144c   :  { %v4262_v16 = vld [vmem:[#allocation3 + $0x1ac] sm:$0xf0]  ;;  %1394 = vmatpush.bf16.msra.mxu1 %v3254_v4  ;;  %v3238_v13 = vor.u32 %v4230_v12, %v3237_v11  ;;  %v3239_v18 = vld [vmem:[#allocation3 + $0xb0] sm:$0xf0]  ;;  %v4260_v19 = vld [vmem:[#allocation3 + $0x1a4] sm:$0xf] }
0x144d   :  { %v3367_v20 = vld [vmem:[#allocation3 + $0x1b0] sm:$0xf0]  ;;  %1407 = vmatpush.bf16.msra.mxu2 %v3382_v5  ;;  %v3366_v21 = vor.u32 %v4262_v16, %v3365_v15  ;;  %v3242_v22 = vor.u32 %v4228_v17, %v3239_v18  ;;  %v3221_v23 = vld [vmem:[#allocation3 + $0x80] sm:$0xf]  ;;  %v4226_v24 = vld [vmem:[#allocation3 + $0x8c] sm:$0xf0] }
0x144e   :  { %1420 = vmatpush.bf16.msra.mxu3 %v3258_v9  ;;  %v3349_v25 = vld [vmem:[#allocation3 + $0x180] sm:$0xf]  ;;  %v3370_v26 = vor.u32 %v4260_v19, %v3367_v20  ;;  %v4258_v27 = vld [vmem:[#allocation3 + $0x18c] sm:$0xf0]  ;;  %v4224_v28 = vld [vmem:[#allocation3 + $0x84] sm:$0xf]  ;;  %v3222_v32 = vor.u32 %v4226_v24, %v3221_v23 }
0x144f   :  { %1433 = vmatpush.bf16.msra.mxu0 %v3386_v14  ;;  %v3223_v29 = vld [vmem:[#allocation3 + $0x90] sm:$0xf0]  ;;  %v4256_v30 = vld [vmem:[#allocation3 + $0x184] sm:$0xf]  ;;  %v3350_v33 = vor.u32 %v4258_v27, %v3349_v25  ;;  %v3205_v35 = vld [vmem:[#allocation3 + $0x60] sm:$0xf] }
0x1450   :  { %v3351_v31 = vld [vmem:[#allocation3 + $0x190] sm:$0xf0]  ;;  %1395 = vmatpush.bf16.msra.mxu1 %v3238_v13  ;;  %v3226_v34 = vor.u32 %v4224_v28, %v3223_v29  ;;  %v4222_v36 = vld [vmem:[#allocation3 + $0x6c] sm:$0xf0]  ;;  %v3333_v38 = vld [vmem:[#allocation3 + $0x160] sm:$0xf] }
0x1451   :  { %1408 = vmatpush.bf16.msra.mxu2 %v3366_v21  ;;  %v3354_v39 = vor.u32 %v4256_v30, %v3351_v31  ;;  %v4254_v37 = vld [vmem:[#allocation3 + $0x16c] sm:$0xf0]  ;;  %v4220_v40 = vld [vmem:[#allocation3 + $0x64] sm:$0xf]  ;;  %v3207_v41 = vld [vmem:[#allocation3 + $0x70] sm:$0xf0]  ;;  %v3206_v45 = vor.u32 %v4222_v36, %v3205_v35 }
0x1452   :  { %1421 = vmatpush.bf16.msra.mxu3 %v3242_v22  ;;  %v4252_v42 = vld [vmem:[#allocation3 + $0x164] sm:$0xf]  ;;  %v3335_v43 = vld [vmem:[#allocation3 + $0x170] sm:$0xf0]  ;;  %v3334_v47 = vor.u32 %v4254_v37, %v3333_v38  ;;  %v3210_v50 = vor.u32 %v4220_v40, %v3207_v41  ;;  %v3189_v51 = vld [vmem:[#allocation3 + $0x40] sm:$0xf] }
0x1453   :  { %1434 = vmatpush.bf16.msra.mxu0 %v3370_v26  ;;  %v4218_v52 = vld [vmem:[#allocation3 + $0x4c] sm:$0xf0]  ;;  %v3317_v53 = vld [vmem:[#allocation3 + $0x140] sm:$0xf]  ;;  %v3338_v54 = vor.u32 %v4252_v42, %v3335_v43  ;;  %v4216_v56 = vld [vmem:[#allocation3 + $0x44] sm:$0xf]  ;;  %v4931_v42 = vpack.c.bf16 %v992_v46, %v992_v46 }
0x1454   :  { %1396 = vmatpush.bf16.msra.mxu1 %v3222_v32  ;;  %v4250_v55 = vld [vmem:[#allocation3 + $0x14c] sm:$0xf0]  ;;  %v3191_v57 = vld [vmem:[#allocation3 + $0x50] sm:$0xf0]  ;;  %v4248_v58 = vld [vmem:[#allocation3 + $0x144] sm:$0xf]  ;;  %v3190_v60 = vor.u32 %v4218_v52, %v3189_v51 }
0x1455   :  { %1409 = vmatpush.bf16.msra.mxu2 %v3350_v33  ;;  %v3319_v59 = vld [vmem:[#allocation3 + $0x150] sm:$0xf0]  ;;  %v3318_v61 = vor.u32 %v4250_v55, %v3317_v53  ;;  %v3194_v62 = vor.u32 %v4216_v56, %v3191_v57  ;;  %v3173_v63 = vld [vmem:[#allocation3 + $0x20] sm:$0xf]  ;;  %v4214_v0 = vld [vmem:[#allocation3 + $0x2c] sm:$0xf0] }
0x1456   :  { %1422 = vmatpush.bf16.msra.mxu3 %v3226_v34  ;;  %v3301_v1 = vld [vmem:[#allocation3 + $0x120] sm:$0xf]  ;;  %v3322_v2 = vor.u32 %v4248_v58, %v3319_v59  ;;  %v4246_v3 = vld [vmem:[#allocation3 + $0x12c] sm:$0xf0]  ;;  %v4212_v4 = vld [vmem:[#allocation3 + $0x24] sm:$0xf]  ;;  %v3174_v8 = vor.u32 %v4214_v0, %v3173_v63 }
0x1457   :  { %1435 = vmatpush.bf16.msra.mxu0 %v3354_v39  ;;  %v3175_v5 = vld [vmem:[#allocation3 + $0x30] sm:$0xf0]  ;;  %v4244_v6 = vld [vmem:[#allocation3 + $0x124] sm:$0xf]  ;;  %v3157_v9 = vld [vmem:[#allocation3] sm:$0xf]  ;;  %v3302_v11 = vor.u32 %v4246_v3, %v3301_v1 }
0x1458   :  { %1397 = vmatpush.bf16.msra.mxu1 %v3206_v45  ;;  %v3303_v7 = vld [vmem:[#allocation3 + $0x130] sm:$0xf0]  ;;  %v4210_v10 = vld [vmem:[#allocation3 + $0xc] sm:$0xf0]  ;;  %v3178_v12 = vor.u32 %v4212_v4, %v3175_v5  ;;  %v3285_v14 = vld [vmem:[#allocation3 + $0x100] sm:$0xf] }
0x1459   :  { %1410 = vmatpush.bf16.msra.mxu2 %v3334_v47  ;;  %v4242_v15 = vld [vmem:[#allocation3 + $0x10c] sm:$0xf0]  ;;  %v4208_v16 = vld [vmem:[#allocation3 + $0x4] sm:$0xf]  ;;  %v3306_v17 = vor.u32 %v4244_v6, %v3303_v7  ;;  %v3159_v13 = vld [vmem:[#allocation3 + $0x10] sm:$0xf0]  ;;  %v3158_v23 = vor.u32 %v4210_v10, %v3157_v9  ;;  %v4936_v47 = vpack.c.bf16 %v991_v49, %v991_v49 }
0x145a   :  { %1423 = vmatpush.bf16.msra.mxu3 %v3210_v50  ;;  %v4240_v18 = vld [vmem:[#allocation3 + $0x104] sm:$0xf]  ;;  %v3287_v19 = vld [vmem:[#allocation3 + $0x110] sm:$0xf0]  ;;  %v3277_v20 = vld [vmem:[#allocation3 + $0xe8] sm:$0xf]  ;;  %v3286_v27 = vor.u32 %v4242_v15, %v3285_v14  ;;  %v3162_v28 = vor.u32 %v4208_v16, %v3159_v13 }
0x145b   :  { %1436 = vmatpush.bf16.msra.mxu0 %v3338_v54  ;;  %v4239_v21 = vld [vmem:[#allocation3 + $0xf4] sm:$0xf0]  ;;  %v3405_v22 = vld [vmem:[#allocation3 + $0x1e8] sm:$0xf]  ;;  %v4237_v25 = vld [vmem:[#allocation3 + $0xec] sm:$0xf]  ;;  %v3290_v31 = vor.u32 %v4240_v18, %v3287_v19 }
0x145c   :  { %1398 = vmatpush.bf16.msra.mxu1 %v3190_v60  ;;  %v4271_v24 = vld [vmem:[#allocation3 + $0x1f4] sm:$0xf0]  ;;  %v3279_v26 = vld [vmem:[#allocation3 + $0xf8] sm:$0xf0]  ;;  %v4269_v29 = vld [vmem:[#allocation3 + $0x1ec] sm:$0xf]  ;;  %v3278_v32 = vor.u32 %v4239_v21, %v3277_v20 }
0x145d   :  { %1411 = vmatpush.bf16.msra.mxu2 %v3318_v61  ;;  %v3407_v30 = vld [vmem:[#allocation3 + $0x1f8] sm:$0xf0]  ;;  %v3406_v33 = vor.u32 %v4271_v24, %v3405_v22  ;;  %v3282_v34 = vor.u32 %v4237_v25, %v3279_v26  ;;  %v3261_v35 = vld [vmem:[#allocation3 + $0xc8] sm:$0xf]  ;;  %v4235_v36 = vld [vmem:[#allocation3 + $0xd4] sm:$0xf0] }
0x145e   :  { %1424 = vmatpush.bf16.msra.mxu3 %v3194_v62  ;;  %v3389_v38 = vld [vmem:[#allocation3 + $0x1c8] sm:$0xf]  ;;  %v3410_v39 = vor.u32 %v4269_v29, %v3407_v30  ;;  %v4267_v37 = vld [vmem:[#allocation3 + $0x1d4] sm:$0xf0]  ;;  %v4233_v40 = vld [vmem:[#allocation3 + $0xcc] sm:$0xf]  ;;  %v3262_v50 = vor.u32 %v4235_v36, %v3261_v35 }
0x145f   :  { %1437 = vmatpush.bf16.msra.mxu0 %v3322_v2  ;;  %v3263_v41 = vld [vmem:[#allocation3 + $0xd8] sm:$0xf0]  ;;  %v4265_v43 = vld [vmem:[#allocation3 + $0x1cc] sm:$0xf]  ;;  %v3390_v51 = vor.u32 %v4267_v37, %v3389_v38  ;;  %v3245_v44 = vld [vmem:[#allocation3 + $0xa8] sm:$0xf] }
0x1460   :  { %1399 = vmatpush.bf16.msra.mxu1 %v3174_v8  ;;  %v3391_v45 = vld [vmem:[#allocation3 + $0x1d8] sm:$0xf0]  ;;  %v3266_v52 = vor.u32 %v4233_v40, %v3263_v41  ;;  %v4231_v53 = vld [vmem:[#allocation3 + $0xb4] sm:$0xf0]  ;;  %v3373_v46 = vld [vmem:[#allocation3 + $0x1a8] sm:$0xf] }
0x1461   :  { %1412 = vmatpush.bf16.msra.mxu2 %v3302_v11  ;;  %v3394_v54 = vor.u32 %v4265_v43, %v3391_v45  ;;  %v4263_v55 = vld [vmem:[#allocation3 + $0x1b4] sm:$0xf0]  ;;  %v4229_v56 = vld [vmem:[#allocation3 + $0xac] sm:$0xf]  ;;  %v3247_v48 = vld [vmem:[#allocation3 + $0xb8] sm:$0xf0]  ;;  %v3246_v58 = vor.u32 %v4231_v53, %v3245_v44 }
0x1462   :  { %1425 = vmatpush.bf16.msra.mxu3 %v3178_v12  ;;  %v4261_v49 = vld [vmem:[#allocation3 + $0x1ac] sm:$0xf]  ;;  %v3375_v57 = vld [vmem:[#allocation3 + $0x1b8] sm:$0xf0]  ;;  %v3374_v59 = vor.u32 %v4263_v55, %v3373_v46  ;;  %v3250_v60 = vor.u32 %v4229_v56, %v3247_v48  ;;  %v3229_v61 = vld [vmem:[#allocation3 + $0x88] sm:$0xf] }
0x1463   :  { %1438 = vmatpush.bf16.msra.mxu0 %v3306_v17  ;;  %v4227_v62 = vld [vmem:[#allocation3 + $0x94] sm:$0xf0]  ;;  %v3357_v63 = vld [vmem:[#allocation3 + $0x188] sm:$0xf]  ;;  %v3378_v0 = vor.u32 %v4261_v49, %v3375_v57  ;;  %v4225_v2 = vld [vmem:[#allocation3 + $0x8c] sm:$0xf] }
0x1464   :  { %1400 = vmatpush.bf16.msra.mxu1 %v3158_v23  ;;  %v4259_v1 = vld [vmem:[#allocation3 + $0x194] sm:$0xf0]  ;;  %v3231_v3 = vld [vmem:[#allocation3 + $0x98] sm:$0xf0]  ;;  %v4257_v4 = vld [vmem:[#allocation3 + $0x18c] sm:$0xf]  ;;  %v3230_v6 = vor.u32 %v4227_v62, %v3229_v61 }
0x1465   :  { %1413 = vmatpush.bf16.msra.mxu2 %v3286_v27  ;;  %v3359_v5 = vld [vmem:[#allocation3 + $0x198] sm:$0xf0]  ;;  %v3358_v7 = vor.u32 %v4259_v1, %v3357_v63  ;;  %v3234_v8 = vor.u32 %v4225_v2, %v3231_v3  ;;  %v3213_v9 = vld [vmem:[#allocation3 + $0x68] sm:$0xf]  ;;  %v4223_v10 = vld [vmem:[#allocation3 + $0x74] sm:$0xf0] }
0x1466   :  { %1426 = vmatpush.bf16.msra.mxu3 %v3162_v28  ;;  %v3341_v11 = vld [vmem:[#allocation3 + $0x168] sm:$0xf]  ;;  %v3362_v12 = vor.u32 %v4257_v4, %v3359_v5  ;;  %v4255_v14 = vld [vmem:[#allocation3 + $0x174] sm:$0xf0]  ;;  %v4221_v15 = vld [vmem:[#allocation3 + $0x6c] sm:$0xf]  ;;  %v3214_v18 = vor.u32 %v4223_v10, %v3213_v9 }
0x1467   :  { %1439 = vmatpush.bf16.msra.mxu0 %v3290_v31  ;;  %1401 = vmatmul.bf16.vlgmr.msra.gmra.mxu1 %v4936_v47  ;;  %v3215_v16 = vld [vmem:[#allocation3 + $0x78] sm:$0xf0]  ;;  %v4253_v17 = vld [vmem:[#allocation3 + $0x16c] sm:$0xf]  ;;  %v3342_v19 = vor.u32 %v4255_v14, %v3341_v11  ;;  %v3197_v21 = vld [vmem:[#allocation3 + $0x48] sm:$0xf] }
0x1468   :  { %1445 = vmatpush.bf16.msrb.mxu1 %v3278_v32  ;;  %1414 = vmatmul.bf16.vlgmr.msra.gmra.mxu2 %v4931_v42  ;;  %v3343_v13 = vld [vmem:[#allocation3 + $0x178] sm:$0xf0]  ;;  %v3218_v20 = vor.u32 %v4221_v15, %v3215_v16  ;;  %v4219_v22 = vld [vmem:[#allocation3 + $0x54] sm:$0xf0]  ;;  %v3325_v23 = vld [vmem:[#allocation3 + $0x148] sm:$0xf] }
0x1469   :  { %1458 = vmatpush.bf16.msrb.mxu2 %v3406_v33  ;;  %1427 = vmatmul.bf16.vlgmr.msra.gmra.mxu3 %v4936_v47  ;;  %v3346_v24 = vor.u32 %v4253_v17, %v3343_v13  ;;  %v4251_v25 = vld [vmem:[#allocation3 + $0x154] sm:$0xf0]  ;;  %v4217_v26 = vld [vmem:[#allocation3 + $0x4c] sm:$0xf]  ;;  %v3199_v27 = vld [vmem:[#allocation3 + $0x58] sm:$0xf0]  ;;  %v3198_v30 = vor.u32 %v4219_v22, %v3197_v21 }
0x146a   :  { %1471 = vmatpush.bf16.msrb.mxu3 %v3282_v34  ;;  %1440 = vmatmul.bf16.vlgmr.msra.gmra.mxu0 %v4931_v42  ;;  %v4249_v28 = vld [vmem:[#allocation3 + $0x14c] sm:$0xf]  ;;  %v3327_v29 = vld [vmem:[#allocation3 + $0x158] sm:$0xf0]  ;;  %v3326_v31 = vor.u32 %v4251_v25, %v3325_v23  ;;  %v3202_v32 = vor.u32 %v4217_v26, %v3199_v27  ;;  %v3181_v33 = vld [vmem:[#allocation3 + $0x28] sm:$0xf] }
0x146b   :  { %1484 = vmatpush.bf16.msrb.mxu0 %v3410_v39  ;;  %v4215_v34 = vld [vmem:[#allocation3 + $0x34] sm:$0xf0]  ;;  %v3309_v35 = vld [vmem:[#allocation3 + $0x128] sm:$0xf]  ;;  %v3330_v36 = vor.u32 %v4249_v28, %v3327_v29  ;;  %v4213_v39 = vld [vmem:[#allocation3 + $0x2c] sm:$0xf] }
0x146c   :  { %1446 = vmatpush.bf16.msrb.mxu1 %v3262_v50  ;;  %v4247_v38 = vld [vmem:[#allocation3 + $0x134] sm:$0xf0]  ;;  %v3183_v37 = vld [vmem:[#allocation3 + $0x38] sm:$0xf0]  ;;  %v4245_v40 = vld [vmem:[#allocation3 + $0x12c] sm:$0xf]  ;;  %v3182_v43 = vor.u32 %v4215_v34, %v3181_v33 }
0x146d   :  { %1459 = vmatpush.bf16.msrb.mxu2 %v3390_v51  ;;  %v3311_v41 = vld [vmem:[#allocation3 + $0x138] sm:$0xf0]  ;;  %v3310_v45 = vor.u32 %v4247_v38, %v3309_v35  ;;  %v3186_v50 = vor.u32 %v4213_v39, %v3183_v37  ;;  %v3165_v51 = vld [vmem:[#allocation3 + $0x8] sm:$0xf]  ;;  %v4243_v46 = vld [vmem:[#allocation3 + $0x114] sm:$0xf0] }
0x146e   :  { %1472 = vmatpush.bf16.msrb.mxu3 %v3266_v52  ;;  %v4211_v52 = vld [vmem:[#allocation3 + $0x14] sm:$0xf0]  ;;  %v3293_v44 = vld [vmem:[#allocation3 + $0x108] sm:$0xf]  ;;  %v3314_v53 = vor.u32 %v4245_v40, %v3311_v41  ;;  %v3167_v55 = vld [vmem:[#allocation3 + $0x18] sm:$0xf0] }
0x146f   :  { %1485 = vmatpush.bf16.msrb.mxu0 %v3394_v54  ;;  %v4209_v54 = vld [vmem:[#allocation3 + $0xc] sm:$0xf]  ;;  %v3295_v48 = vld [vmem:[#allocation3 + $0x118] sm:$0xf0]  ;;  %v3166_v49 = vor.u32 %v4211_v52, %v3165_v51  ;;  %v3294_v57 = vor.u32 %v4243_v46, %v3293_v44 }
0x1470   :  { %1447 = vmatpush.bf16.msrb.mxu1 %v3246_v58  ;;  %v4241_v56 = vld [vmem:[#allocation3 + $0x10c] sm:$0xf]  ;;  %v3170_v58 = vor.u32 %v4209_v54, %v3167_v55 }
0x1471   :  { %1460 = vmatpush.bf16.msrb.mxu2 %v3374_v59  ;;  %v3298_v59 = vor.u32 %v4241_v56, %v3295_v48 }
0x1472   :  { %1473 = vmatpush.bf16.msrb.mxu3 %v3250_v60  ;;  %v1063_v60 = vld [vmem:[%s5033_s14] sm:$0xf] }
0x1473   :  { %1486 = vmatpush.bf16.msrb.mxu0 %v3378_v0  ;;  %v1065_v61 = vperm.slane %v1063_v60, 0  ;;  %v1066_v1 = vperm.slane %v1063_v60, 1  ;;  %v1067_v11 = vperm.slane %v1063_v60, 2  ;;  %v1068_v16 = vperm.slane %v1063_v60, 3 }
0x1474   :  { %1448 = vmatpush.bf16.msrb.mxu1 %v3230_v6 }
0x1475   :  { %1461 = vmatpush.bf16.msrb.mxu2 %v3358_v7 }
0x1476   :  { %1474 = vmatpush.bf16.msrb.mxu3 %v3234_v8 }
0x1477   :  { %1487 = vmatpush.bf16.msrb.mxu0 %v3362_v12 }
0x1478   :  { %1449 = vmatpush.bf16.msrb.mxu1 %v3214_v18 }
0x1479   :  { %1462 = vmatpush.bf16.msrb.mxu2 %v3342_v19 }
0x147a   :  { %1475 = vmatpush.bf16.msrb.mxu3 %v3218_v20 }
0x147b   :  { %1488 = vmatpush.bf16.msrb.mxu0 %v3346_v24 }
0x147c   :  { %1450 = vmatpush.bf16.msrb.mxu1 %v3198_v30 }
0x147d   :  { %1463 = vmatpush.bf16.msrb.mxu2 %v3326_v31 }
0x147e   :  { %1476 = vmatpush.bf16.msrb.mxu3 %v3202_v32 }
0x147f   :  { %1489 = vmatpush.bf16.msrb.mxu0 %v3330_v36 }
0x1480   :  { %1451 = vmatpush.bf16.msrb.mxu1 %v3182_v43 }
0x1481   :  { %1464 = vmatpush.bf16.msrb.mxu2 %v3310_v45 }
0x1482   :  { %1477 = vmatpush.bf16.msrb.mxu3 %v3186_v50 }
0x1483   :  { %1490 = vmatpush.bf16.msrb.mxu0 %v3314_v53 }
0x1484   :  { %1452 = vmatpush.bf16.msrb.mxu1 %v3166_v49 }
0x1485   :  { %1465 = vmatpush.bf16.msrb.mxu2 %v3294_v57 }
0x1486   :  { %1478 = vmatpush.bf16.msrb.mxu3 %v3170_v58 }
0x1487   :  { %1491 = vmatpush.bf16.msrb.mxu0 %v3298_v59  ;;  %1453 = vmatmul.bf16.vlgmr.msrb.gmra.mxu1 %v4936_v47 }
0x1488   :  { %1466 = vmatmul.bf16.vlgmr.msrb.gmra.mxu2 %v4931_v42 }
0x1489   :  { %1479 = vmatmul.bf16.vlgmr.msrb.gmra.mxu3 %v4936_v47 }
0x148a   :  { %1492 = vmatmul.bf16.vlgmr.msrb.gmra.mxu0 %v4931_v42 }
0x14e4   :  { %v1402_v62 = vpop.f32.mrf.mxu1 }
0x14e5   :  { %v1403_v0 = vadd.f32 %v1402_v62, %v1065_v61 }
0x14e7   :  { %v1441_v63 = vpop.f32.mrf.mxu0 }
0x14eb   :  { %v1415_v2 = vpop.f32.mrf.mxu2 }
0x14ec   :  { %v4949_v3 = vadd.f32 %v1415_v2, %v1403_v0  ;;  %v1428_v4 = vpop.f32.mrf.mxu3  ;;  %v1404_v7 = vpop.f32.mrf.mxu1 }
0x14ed   :  { %v1429_v5 = vadd.f32 %v1428_v4, %v1066_v1 }
0x14ee   :  { %v1497_v6 = vmax.f32 %v4949_v3, 0.0 }
0x14ef   :  { %v4952_v47 = vadd.f32 %v1441_v63, %v1429_v5  ;;  %v1443_v42 = vpop.f32.mrf.mxu0 }
0x14f1   :  { %v1498_v8 = vmax.f32 %v4952_v47, 0.0 }
0x14f3   :  { %v1417_v9 = vpop.f32.mrf.mxu2 }
0x14f4   :  { %v1430_v10 = vpop.f32.mrf.mxu3 }
0x1504   :  { %v1454_v12 = vpop.f32.mrf.mxu1 }
0x1505   :  { %v1455_v15 = vadd.f32 %v1454_v12, %v1067_v11 }
0x1507   :  { %v1493_v14 = vpop.f32.mrf.mxu0 }
0x150b   :  { %v1467_v17 = vpop.f32.mrf.mxu2 }
0x150c   :  { %v1480_v13 = vpop.f32.mrf.mxu3  ;;  %v4955_v18 = vadd.f32 %v1467_v17, %v1455_v15  ;;  %v1456_v20 = vpop.f32.mrf.mxu1 }
0x150d   :  { %v1481_v19 = vadd.f32 %v1480_v13, %v1068_v16 }
0x150e   :  { %v1499_v21 = vmax.f32 %v4955_v18, 0.0 }
0x150f   :  { %v4958_v22 = vadd.f32 %v1493_v14, %v1481_v19  ;;  %v1495_v23 = vpop.f32.mrf.mxu0 }
0x1511   :  { %v1500_v24 = vmax.f32 %v4958_v22, 0.0 }
0x1513   :  { %v1469_v25 = vpop.f32.mrf.mxu2 }
0x1514   :  { %v1482_v26 = vpop.f32.mrf.mxu3 }
0x1515   :  { %4641 = dma.done.wait [#allocation5 + $0x2], 24576 }
0x1516   :  { %4642 = vsyncadd [#allocation5 + $0x2], 4294942720  ;;  %v3581_v27 = vld [vmem:[#allocation4 + $0x150] sm:$0xf]  ;;  %v4317_v28 = vld [vmem:[#allocation4 + $0x164] sm:$0xf0] }
0x1517   :  { %v3773_v29 = vld [vmem:[#allocation4 + $0x2d0] sm:$0xf]  ;;  %v3582_v30 = vor.u32 %v4317_v28, %v3581_v27  ;;  %v4365_v31 = vld [vmem:[#allocation4 + $0x2e4] sm:$0xf0]  ;;  %v3557_v39 = vld [vmem:[#allocation4 + $0x120] sm:$0xf] }
0x1518   :  { %v3965_v32 = vld [vmem:[#allocation4 + $0x450] sm:$0xf]  ;;  %v4413_v33 = vld [vmem:[#allocation4 + $0x464] sm:$0xf0]  ;;  %v3774_v34 = vor.u32 %v4365_v31, %v3773_v29  ;;  %v4311_v40 = vld [vmem:[#allocation4 + $0x134] sm:$0xf0] }
0x1519   :  { %v3966_v35 = vor.u32 %v4413_v33, %v3965_v32  ;;  %v4157_v36 = vld [vmem:[#allocation4 + $0x5d0] sm:$0xf]  ;;  %v4461_v38 = vld [vmem:[#allocation4 + $0x5e4] sm:$0xf0]  ;;  %2675 = vmatpush.bf16.msra.mxu1 %v3582_v30  ;;  %v3749_v41 = vld [vmem:[#allocation4 + $0x2a0] sm:$0xf]  ;;  %v3558_v45 = vor.u32 %v4311_v40, %v3557_v39 }
0x151a   :  { %v4158_v37 = vor.u32 %v4461_v38, %v4157_v36  ;;  %v4359_v43 = vld [vmem:[#allocation4 + $0x2b4] sm:$0xf0]  ;;  %2688 = vmatpush.bf16.msra.mxu2 %v3774_v34  ;;  %v3941_v51 = vld [vmem:[#allocation4 + $0x420] sm:$0xf]  ;;  %v3533_v54 = vld [vmem:[#allocation4 + $0xf0] sm:$0xf] }
0x151b   :  { %2701 = vmatpush.bf16.msra.mxu3 %v3966_v35  ;;  %v3750_v50 = vor.u32 %v4359_v43, %v3749_v41  ;;  %v4407_v52 = vld [vmem:[#allocation4 + $0x434] sm:$0xf0]  ;;  %v4133_v44 = vld [vmem:[#allocation4 + $0x5a0] sm:$0xf]  ;;  %v4305_v55 = vld [vmem:[#allocation4 + $0x104] sm:$0xf0] }
0x151c   :  { %2714 = vmatpush.bf16.msra.mxu0 %v4158_v37  ;;  %v3942_v53 = vor.u32 %v4407_v52, %v3941_v51  ;;  %v4455_v46 = vld [vmem:[#allocation4 + $0x5b4] sm:$0xf0]  ;;  %v3725_v48 = vld [vmem:[#allocation4 + $0x270] sm:$0xf]  ;;  %v4353_v49 = vld [vmem:[#allocation4 + $0x284] sm:$0xf0]  ;;  %v3534_v58 = vor.u32 %v4305_v55, %v3533_v54 }
0x151d   :  { %v4134_v56 = vor.u32 %v4455_v46, %v4133_v44  ;;  %v3917_v57 = vld [vmem:[#allocation4 + $0x3f0] sm:$0xf]  ;;  %2676 = vmatpush.bf16.msra.mxu1 %v3558_v45  ;;  %v4401_v59 = vld [vmem:[#allocation4 + $0x404] sm:$0xf0]  ;;  %v3726_v62 = vor.u32 %v4353_v49, %v3725_v48  ;;  %v3509_v0 = vld [vmem:[#allocation4 + $0xc0] sm:$0xf] }
0x151e   :  { %v4109_v60 = vld [vmem:[#allocation4 + $0x570] sm:$0xf]  ;;  %v4449_v61 = vld [vmem:[#allocation4 + $0x584] sm:$0xf0]  ;;  %2689 = vmatpush.bf16.msra.mxu2 %v3750_v50  ;;  %v3918_v63 = vor.u32 %v4401_v59, %v3917_v57  ;;  %v4299_v1 = vld [vmem:[#allocation4 + $0xd4] sm:$0xf0] }
0x151f   :  { %2702 = vmatpush.bf16.msra.mxu3 %v3942_v53  ;;  %v3701_v2 = vld [vmem:[#allocation4 + $0x240] sm:$0xf]  ;;  %v4110_v4 = vor.u32 %v4449_v61, %v4109_v60  ;;  %v4347_v5 = vld [vmem:[#allocation4 + $0x254] sm:$0xf0]  ;;  %v3510_v11 = vor.u32 %v4299_v1, %v3509_v0  ;;  %v3485_v15 = vld [vmem:[#allocation4 + $0x90] sm:$0xf] }
0x1520   :  { %2715 = vmatpush.bf16.msra.mxu0 %v4134_v56  ;;  %v3893_v7 = vld [vmem:[#allocation4 + $0x3c0] sm:$0xf]  ;;  %v4395_v42 = vld [vmem:[#allocation4 + $0x3d4] sm:$0xf0]  ;;  %v3702_v12 = vor.u32 %v4347_v5, %v3701_v2  ;;  %v4293_v16 = vld [vmem:[#allocation4 + $0xa4] sm:$0xf0] }
0x1521   :  { %v4085_v9 = vld [vmem:[#allocation4 + $0x540] sm:$0xf]  ;;  %v4443_v10 = vld [vmem:[#allocation4 + $0x554] sm:$0xf0]  ;;  %2677 = vmatpush.bf16.msra.mxu1 %v3534_v58  ;;  %v3894_v14 = vor.u32 %v4395_v42, %v3893_v7  ;;  %v3677_v17 = vld [vmem:[#allocation4 + $0x210] sm:$0xf]  ;;  %v3486_v27 = vor.u32 %v4293_v16, %v3485_v15 }
0x1522   :  { %2690 = vmatpush.bf16.msra.mxu2 %v3726_v62  ;;  %v4086_v13 = vor.u32 %v4443_v10, %v4085_v9  ;;  %v4341_v19 = vld [vmem:[#allocation4 + $0x224] sm:$0xf0]  ;;  %v3869_v20 = vld [vmem:[#allocation4 + $0x390] sm:$0xf]  ;;  %v3461_v30 = vld [vmem:[#allocation4 + $0x60] sm:$0xf] }
0x1523   :  { %2703 = vmatpush.bf16.msra.mxu3 %v3918_v63  ;;  %v4389_v23 = vld [vmem:[#allocation4 + $0x3a4] sm:$0xf0]  ;;  %v4061_v25 = vld [vmem:[#allocation4 + $0x510] sm:$0xf]  ;;  %v3678_v28 = vor.u32 %v4341_v19, %v3677_v17  ;;  %v4287_v31 = vld [vmem:[#allocation4 + $0x74] sm:$0xf0] }
0x1524   :  { %2716 = vmatpush.bf16.msra.mxu0 %v4110_v4  ;;  %v4437_v26 = vld [vmem:[#allocation4 + $0x524] sm:$0xf0]  ;;  %v3870_v29 = vor.u32 %v4389_v23, %v3869_v20  ;;  %v3653_v32 = vld [vmem:[#allocation4 + $0x1e0] sm:$0xf]  ;;  %v4335_v34 = vld [vmem:[#allocation4 + $0x1f4] sm:$0xf0]  ;;  %v3462_v37 = vor.u32 %v4287_v31, %v3461_v30 }
0x1525   :  { %2678 = vmatpush.bf16.msra.mxu1 %v3510_v11  ;;  %v4062_v33 = vor.u32 %v4437_v26, %v4061_v25  ;;  %v3845_v35 = vld [vmem:[#allocation4 + $0x360] sm:$0xf]  ;;  %v4383_v36 = vld [vmem:[#allocation4 + $0x374] sm:$0xf0]  ;;  %v3654_v40 = vor.u32 %v4335_v34, %v3653_v32  ;;  %v3437_v43 = vld [vmem:[#allocation4 + $0x30] sm:$0xf]  ;;  %v4969_v32 = vpack.c.bf16 %v1499_v21, %v1499_v21 }
0x1526   :  { %2691 = vmatpush.bf16.msra.mxu2 %v3702_v12  ;;  %v4037_v38 = vld [vmem:[#allocation4 + $0x4e0] sm:$0xf]  ;;  %v4431_v39 = vld [vmem:[#allocation4 + $0x4f4] sm:$0xf0]  ;;  %v3846_v41 = vor.u32 %v4383_v36, %v3845_v35  ;;  %v4281_v45 = vld [vmem:[#allocation4 + $0x44] sm:$0xf0] }
0x1527   :  { %2704 = vmatpush.bf16.msra.mxu3 %v3894_v14  ;;  %v3629_v50 = vld [vmem:[#allocation4 + $0x1b0] sm:$0xf]  ;;  %v4038_v51 = vor.u32 %v4431_v39, %v4037_v38  ;;  %v4329_v52 = vld [vmem:[#allocation4 + $0x1c4] sm:$0xf0]  ;;  %v3438_v55 = vor.u32 %v4281_v45, %v3437_v43  ;;  %v3413_v56 = vld [vmem:[#allocation4] sm:$0xf] }
0x1528   :  { %2717 = vmatpush.bf16.msra.mxu0 %v4086_v13  ;;  %v3821_v44 = vld [vmem:[#allocation4 + $0x330] sm:$0xf]  ;;  %v4377_v53 = vld [vmem:[#allocation4 + $0x344] sm:$0xf0]  ;;  %v4275_v48 = vld [vmem:[#allocation4 + $0x14] sm:$0xf0]  ;;  %v3630_v49 = vor.u32 %v4329_v52, %v3629_v50 }
0x1529   :  { %2679 = vmatpush.bf16.msra.mxu1 %v3486_v27  ;;  %v4013_v46 = vld [vmem:[#allocation4 + $0x4b0] sm:$0xf]  ;;  %v4425_v54 = vld [vmem:[#allocation4 + $0x4c4] sm:$0xf0]  ;;  %v3822_v57 = vor.u32 %v4377_v53, %v3821_v44  ;;  %v3605_v58 = vld [vmem:[#allocation4 + $0x180] sm:$0xf]  ;;  %v3414_v5 = vor.u32 %v4275_v48, %v3413_v56 }
0x152a   :  { %2692 = vmatpush.bf16.msra.mxu2 %v3678_v28  ;;  %v4323_v59 = vld [vmem:[#allocation4 + $0x194] sm:$0xf0]  ;;  %v3797_v60 = vld [vmem:[#allocation4 + $0x300] sm:$0xf]  ;;  %v4014_v61 = vor.u32 %v4425_v54, %v4013_v46  ;;  %v4314_v1 = vld [vmem:[#allocation4 + $0x154] sm:$0xf] }
0x152b   :  { %2705 = vmatpush.bf16.msra.mxu3 %v3870_v29  ;;  %v4371_v62 = vld [vmem:[#allocation4 + $0x314] sm:$0xf0]  ;;  %v3989_v63 = vld [vmem:[#allocation4 + $0x480] sm:$0xf]  ;;  %v3583_v2 = vld [vmem:[#allocation4 + $0x168] sm:$0xf0]  ;;  %v3606_v10 = vor.u32 %v4323_v59, %v3605_v58  ;;  %v4964_v29 = vpack.c.bf16 %v1498_v8, %v1498_v8  ;;  %v4979_v8 = vpack.c.bf16 %v1500_v24, %v1500_v24 }
0x152c   :  { %2718 = vmatpush.bf16.msra.mxu0 %v4062_v33  ;;  %v4419_v0 = vld [vmem:[#allocation4 + $0x494] sm:$0xf0]  ;;  %v4362_v4 = vld [vmem:[#allocation4 + $0x2d4] sm:$0xf]  ;;  %v3775_v7 = vld [vmem:[#allocation4 + $0x2e8] sm:$0xf0]  ;;  %v3798_v11 = vor.u32 %v4371_v62, %v3797_v60  ;;  %v3586_v16 = vor.u32 %v4314_v1, %v3583_v2  ;;  %v4974_v33 = vpack.c.bf16 %v1497_v6, %v1497_v6 }
0x152d   :  { %2680 = vmatpush.bf16.msra.mxu1 %v3462_v37  ;;  %v4410_v42 = vld [vmem:[#allocation4 + $0x454] sm:$0xf]  ;;  %v3967_v9 = vld [vmem:[#allocation4 + $0x468] sm:$0xf0]  ;;  %v3990_v15 = vor.u32 %v4419_v0, %v3989_v63  ;;  %v3778_v17 = vor.u32 %v4362_v4, %v3775_v7  ;;  %v4308_v19 = vld [vmem:[#allocation4 + $0x124] sm:$0xf] }
0x152e   :  { %2693 = vmatpush.bf16.msra.mxu2 %v3654_v40  ;;  %v4458_v12 = vld [vmem:[#allocation4 + $0x5d4] sm:$0xf]  ;;  %v4159_v14 = vld [vmem:[#allocation4 + $0x5e8] sm:$0xf0]  ;;  %v3970_v13 = vor.u32 %v4410_v42, %v3967_v9  ;;  %v3559_v20 = vld [vmem:[#allocation4 + $0x138] sm:$0xf0] }
0x152f   :  { %2706 = vmatpush.bf16.msra.mxu3 %v3846_v41  ;;  %v4356_v23 = vld [vmem:[#allocation4 + $0x2a4] sm:$0xf]  ;;  %v4162_v25 = vor.u32 %v4458_v12, %v4159_v14  ;;  %v3751_v26 = vld [vmem:[#allocation4 + $0x2b8] sm:$0xf0]  ;;  %v3562_v47 = vor.u32 %v4308_v19, %v3559_v20  ;;  %v4302_v35 = vld [vmem:[#allocation4 + $0xf4] sm:$0xf] }
0x1530   :  { %2719 = vmatpush.bf16.msra.mxu0 %v4038_v51  ;;  %v4404_v27 = vld [vmem:[#allocation4 + $0x424] sm:$0xf]  ;;  %v3943_v28 = vld [vmem:[#allocation4 + $0x438] sm:$0xf0]  ;;  %v3754_v34 = vor.u32 %v4356_v23, %v3751_v26  ;;  %v3535_v21 = vld [vmem:[#allocation4 + $0x108] sm:$0xf0] }
0x1531   :  { %2681 = vmatpush.bf16.msra.mxu1 %v3438_v55  ;;  %v4452_v30 = vld [vmem:[#allocation4 + $0x5a4] sm:$0xf]  ;;  %v4135_v31 = vld [vmem:[#allocation4 + $0x5b8] sm:$0xf0]  ;;  %v3946_v18 = vor.u32 %v4404_v27, %v3943_v28  ;;  %v4350_v36 = vld [vmem:[#allocation4 + $0x274] sm:$0xf]  ;;  %v3538_v22 = vor.u32 %v4302_v35, %v3535_v21 }
0x1532   :  { %2694 = vmatpush.bf16.msra.mxu2 %v3630_v49  ;;  %v4138_v3 = vor.u32 %v4452_v30, %v4135_v31  ;;  %v3727_v38 = vld [vmem:[#allocation4 + $0x288] sm:$0xf0]  ;;  %v4398_v6 = vld [vmem:[#allocation4 + $0x3f4] sm:$0xf]  ;;  %v4296_v43 = vld [vmem:[#allocation4 + $0xc4] sm:$0xf] }
0x1533   :  { %2707 = vmatpush.bf16.msra.mxu3 %v3822_v57  ;;  %v3919_v39 = vld [vmem:[#allocation4 + $0x408] sm:$0xf0]  ;;  %v4446_v37 = vld [vmem:[#allocation4 + $0x574] sm:$0xf]  ;;  %v3730_v24 = vor.u32 %v4350_v36, %v3727_v38  ;;  %v3511_v45 = vld [vmem:[#allocation4 + $0xd8] sm:$0xf0] }
0x1534   :  { %2720 = vmatpush.bf16.msra.mxu0 %v4014_v61  ;;  %v4111_v40 = vld [vmem:[#allocation4 + $0x588] sm:$0xf0]  ;;  %v3922_v41 = vor.u32 %v4398_v6, %v3919_v39  ;;  %v4344_v50 = vld [vmem:[#allocation4 + $0x244] sm:$0xf]  ;;  %v3703_v52 = vld [vmem:[#allocation4 + $0x258] sm:$0xf0]  ;;  %v3514_v55 = vor.u32 %v4296_v43, %v3511_v45 }
0x1535   :  { %2682 = vmatpush.bf16.msra.mxu1 %v3414_v5  ;;  %v4114_v51 = vor.u32 %v4446_v37, %v4111_v40  ;;  %v4392_v44 = vld [vmem:[#allocation4 + $0x3c4] sm:$0xf]  ;;  %v3895_v53 = vld [vmem:[#allocation4 + $0x3d8] sm:$0xf0]  ;;  %v3706_v56 = vor.u32 %v4344_v50, %v3703_v52  ;;  %v4290_v49 = vld [vmem:[#allocation4 + $0x94] sm:$0xf] }
0x1536   :  { %2695 = vmatpush.bf16.msra.mxu2 %v3606_v10  ;;  %v4440_v46 = vld [vmem:[#allocation4 + $0x544] sm:$0xf]  ;;  %v4087_v54 = vld [vmem:[#allocation4 + $0x558] sm:$0xf0]  ;;  %v3898_v48 = vor.u32 %v4392_v44, %v3895_v53  ;;  %v3487_v57 = vld [vmem:[#allocation4 + $0xa8] sm:$0xf0] }
0x1537   :  { %2708 = vmatpush.bf16.msra.mxu3 %v3798_v11  ;;  %v4338_v58 = vld [vmem:[#allocation4 + $0x214] sm:$0xf]  ;;  %v4090_v59 = vor.u32 %v4440_v46, %v4087_v54  ;;  %v3679_v60 = vld [vmem:[#allocation4 + $0x228] sm:$0xf0]  ;;  %v3490_v1 = vor.u32 %v4290_v49, %v3487_v57  ;;  %v4284_v5 = vld [vmem:[#allocation4 + $0x64] sm:$0xf] }
0x1538   :  { %2721 = vmatpush.bf16.msra.mxu0 %v3990_v15  ;;  %2683 = vmatmul.bf16.vlgmr.msra.gmra.mxu1 %v4974_v33  ;;  %v4386_v61 = vld [vmem:[#allocation4 + $0x394] sm:$0xf]  ;;  %v3871_v62 = vld [vmem:[#allocation4 + $0x3a8] sm:$0xf0]  ;;  %v3682_v2 = vor.u32 %v4338_v58, %v3679_v60  ;;  %v3463_v7 = vld [vmem:[#allocation4 + $0x78] sm:$0xf0] }
0x1539   :  { %2727 = vmatpush.bf16.msrb.mxu1 %v3586_v16  ;;  %2696 = vmatmul.bf16.vlgmr.msra.gmra.mxu2 %v4964_v29  ;;  %v4434_v63 = vld [vmem:[#allocation4 + $0x514] sm:$0xf]  ;;  %v4063_v0 = vld [vmem:[#allocation4 + $0x528] sm:$0xf0]  ;;  %v3874_v4 = vor.u32 %v4386_v61, %v3871_v62  ;;  %v4332_v42 = vld [vmem:[#allocation4 + $0x1e4] sm:$0xf]  ;;  %v3466_v16 = vor.u32 %v4284_v5, %v3463_v7 }
0x153a   :  { %2740 = vmatpush.bf16.msrb.mxu2 %v3778_v17  ;;  %2709 = vmatmul.bf16.vlgmr.msra.gmra.mxu3 %v4969_v32  ;;  %v4066_v9 = vor.u32 %v4434_v63, %v4063_v0  ;;  %v3655_v10 = vld [vmem:[#allocation4 + $0x1f8] sm:$0xf0]  ;;  %v4380_v11 = vld [vmem:[#allocation4 + $0x364] sm:$0xf]  ;;  %v4278_v19 = vld [vmem:[#allocation4 + $0x34] sm:$0xf] }
0x153b   :  { %2753 = vmatpush.bf16.msrb.mxu3 %v3970_v13  ;;  %2722 = vmatmul.bf16.vlgmr.msra.gmra.mxu0 %v4979_v8  ;;  %v3847_v12 = vld [vmem:[#allocation4 + $0x378] sm:$0xf0]  ;;  %v4428_v14 = vld [vmem:[#allocation4 + $0x4e4] sm:$0xf]  ;;  %v3658_v17 = vor.u32 %v4332_v42, %v3655_v10  ;;  %v3439_v20 = vld [vmem:[#allocation4 + $0x48] sm:$0xf0] }
0x153c   :  { %2766 = vmatpush.bf16.msrb.mxu0 %v4162_v25  ;;  %v4039_v15 = vld [vmem:[#allocation4 + $0x4f8] sm:$0xf0]  ;;  %v3850_v13 = vor.u32 %v4380_v11, %v3847_v12  ;;  %v4326_v23 = vld [vmem:[#allocation4 + $0x1b4] sm:$0xf]  ;;  %v3631_v26 = vld [vmem:[#allocation4 + $0x1c8] sm:$0xf0] }
0x153d   :  { %2728 = vmatpush.bf16.msrb.mxu1 %v3562_v47  ;;  %v4042_v25 = vor.u32 %v4428_v14, %v4039_v15  ;;  %v4374_v27 = vld [vmem:[#allocation4 + $0x334] sm:$0xf]  ;;  %v3823_v28 = vld [vmem:[#allocation4 + $0x348] sm:$0xf0]  ;;  %v3442_v47 = vor.u32 %v4278_v19, %v3439_v20  ;;  %v3634_v35 = vor.u32 %v4326_v23, %v3631_v26  ;;  %v4320_v36 = vld [vmem:[#allocation4 + $0x184] sm:$0xf] }
0x153e   :  { %2741 = vmatpush.bf16.msrb.mxu2 %v3754_v34  ;;  %v4422_v30 = vld [vmem:[#allocation4 + $0x4b4] sm:$0xf]  ;;  %v4015_v31 = vld [vmem:[#allocation4 + $0x4c8] sm:$0xf0]  ;;  %v4272_v34 = vld [vmem:[#allocation4 + $0x4] sm:$0xf]  ;;  %v3826_v21 = vor.u32 %v4374_v27, %v3823_v28 }
0x153f   :  { %2754 = vmatpush.bf16.msrb.mxu3 %v3946_v18  ;;  %v3415_v18 = vld [vmem:[#allocation4 + $0x18] sm:$0xf0]  ;;  %v4368_v38 = vld [vmem:[#allocation4 + $0x304] sm:$0xf]  ;;  %v4018_v6 = vor.u32 %v4422_v30, %v4015_v31  ;;  %v4366_v45 = vld [vmem:[#allocation4 + $0x2ec] sm:$0xf0] }
0x1540   :  { %2767 = vmatpush.bf16.msrb.mxu0 %v4138_v3  ;;  %v3607_v3 = vld [vmem:[#allocation4 + $0x198] sm:$0xf0]  ;;  %v4416_v37 = vld [vmem:[#allocation4 + $0x484] sm:$0xf]  ;;  %v3418_v43 = vor.u32 %v4272_v34, %v3415_v18  ;;  %v3973_v50 = vld [vmem:[#allocation4 + $0x458] sm:$0xf] }
0x1541   :  { %2729 = vmatpush.bf16.msrb.mxu1 %v3538_v22  ;;  %v3799_v39 = vld [vmem:[#allocation4 + $0x318] sm:$0xf0]  ;;  %v3589_v22 = vld [vmem:[#allocation4 + $0x158] sm:$0xf]  ;;  %v3610_v52 = vor.u32 %v4320_v36, %v3607_v3  ;;  %v4462_v46 = vld [vmem:[#allocation4 + $0x5ec] sm:$0xf0] }
0x1542   :  { %2742 = vmatpush.bf16.msrb.mxu2 %v3730_v24  ;;  %v3991_v40 = vld [vmem:[#allocation4 + $0x498] sm:$0xf0]  ;;  %v4318_v24 = vld [vmem:[#allocation4 + $0x16c] sm:$0xf0]  ;;  %v3802_v44 = vor.u32 %v4368_v38, %v3799_v39  ;;  %v4165_v53 = vld [vmem:[#allocation4 + $0x5d8] sm:$0xf] }
0x1543   :  { %2755 = vmatpush.bf16.msrb.mxu3 %v3922_v41  ;;  %v3781_v41 = vld [vmem:[#allocation4 + $0x2d8] sm:$0xf]  ;;  %v3994_v54 = vor.u32 %v4416_v37, %v3991_v40  ;;  %v3565_v49 = vld [vmem:[#allocation4 + $0x128] sm:$0xf]  ;;  %v4312_v57 = vld [vmem:[#allocation4 + $0x13c] sm:$0xf0] }
0x1544   :  { %2768 = vmatpush.bf16.msrb.mxu0 %v4114_v51  ;;  %v4414_v51 = vld [vmem:[#allocation4 + $0x46c] sm:$0xf0]  ;;  %v3757_v58 = vld [vmem:[#allocation4 + $0x2a8] sm:$0xf]  ;;  %v4360_v60 = vld [vmem:[#allocation4 + $0x2bc] sm:$0xf0] }
0x1545   :  { %2730 = vmatpush.bf16.msrb.mxu1 %v3514_v55  ;;  %v3590_v55 = vor.u32 %v4318_v24, %v3589_v22  ;;  %v3949_v61 = vld [vmem:[#allocation4 + $0x428] sm:$0xf]  ;;  %v4408_v62 = vld [vmem:[#allocation4 + $0x43c] sm:$0xf0]  ;;  %v3541_v5 = vld [vmem:[#allocation4 + $0xf8] sm:$0xf] }
0x1546   :  { %2743 = vmatpush.bf16.msrb.mxu2 %v3706_v56  ;;  %v3782_v56 = vor.u32 %v4366_v45, %v3781_v41  ;;  %v4141_v63 = vld [vmem:[#allocation4 + $0x5a8] sm:$0xf]  ;;  %v4456_v0 = vld [vmem:[#allocation4 + $0x5bc] sm:$0xf0]  ;;  %v4306_v7 = vld [vmem:[#allocation4 + $0x10c] sm:$0xf0] }
0x1547   :  { %2756 = vmatpush.bf16.msrb.mxu3 %v3898_v48  ;;  %v3974_v48 = vor.u32 %v4414_v51, %v3973_v50  ;;  %v3733_v42 = vld [vmem:[#allocation4 + $0x278] sm:$0xf]  ;;  %v4354_v10 = vld [vmem:[#allocation4 + $0x28c] sm:$0xf0]  ;;  %v3517_v19 = vld [vmem:[#allocation4 + $0xc8] sm:$0xf] }
0x1548   :  { %2769 = vmatpush.bf16.msrb.mxu0 %v4090_v59  ;;  %v4166_v59 = vor.u32 %v4462_v46, %v4165_v53  ;;  %v3925_v11 = vld [vmem:[#allocation4 + $0x3f8] sm:$0xf]  ;;  %v4402_v12 = vld [vmem:[#allocation4 + $0x40c] sm:$0xf0]  ;;  %v4300_v20 = vld [vmem:[#allocation4 + $0xdc] sm:$0xf0] }
0x1549   :  { %2731 = vmatpush.bf16.msrb.mxu1 %v3490_v1  ;;  %v3566_v1 = vor.u32 %v4312_v57, %v3565_v49  ;;  %v4117_v14 = vld [vmem:[#allocation4 + $0x578] sm:$0xf]  ;;  %v4450_v15 = vld [vmem:[#allocation4 + $0x58c] sm:$0xf0]  ;;  %v3709_v23 = vld [vmem:[#allocation4 + $0x248] sm:$0xf] }
0x154a   :  { %2744 = vmatpush.bf16.msrb.mxu2 %v3682_v2  ;;  %v3758_v2 = vor.u32 %v4360_v60, %v3757_v58  ;;  %v4348_v26 = vld [vmem:[#allocation4 + $0x25c] sm:$0xf0]  ;;  %v3901_v27 = vld [vmem:[#allocation4 + $0x3c8] sm:$0xf]  ;;  %v3685_v36 = vld [vmem:[#allocation4 + $0x218] sm:$0xf] }
0x154b   :  { %2757 = vmatpush.bf16.msrb.mxu3 %v3874_v4  ;;  %v3950_v4 = vor.u32 %v4408_v62, %v3949_v61  ;;  %v4396_v28 = vld [vmem:[#allocation4 + $0x3dc] sm:$0xf0]  ;;  %v4093_v30 = vld [vmem:[#allocation4 + $0x548] sm:$0xf]  ;;  %v3710_v34 = vor.u32 %v4348_v26, %v3709_v23  ;;  %v4342_v38 = vld [vmem:[#allocation4 + $0x22c] sm:$0xf0] }
0x154c   :  { %2770 = vmatpush.bf16.msrb.mxu0 %v4066_v9  ;;  %v4142_v9 = vor.u32 %v4456_v0, %v4141_v63  ;;  %v4444_v31 = vld [vmem:[#allocation4 + $0x55c] sm:$0xf0]  ;;  %v3902_v18 = vor.u32 %v4396_v28, %v3901_v27  ;;  %v4390_v39 = vld [vmem:[#allocation4 + $0x3ac] sm:$0xf0]  ;;  %v4069_v37 = vld [vmem:[#allocation4 + $0x518] sm:$0xf]  ;;  %v3686_v24 = vor.u32 %v4342_v38, %v3685_v36 }
0x154d   :  { %2732 = vmatpush.bf16.msrb.mxu1 %v3466_v16  ;;  %v3542_v16 = vor.u32 %v4306_v7, %v3541_v5  ;;  %v4094_v3 = vor.u32 %v4444_v31, %v4093_v30  ;;  %v4438_v40 = vld [vmem:[#allocation4 + $0x52c] sm:$0xf0]  ;;  %v4288_v45 = vld [vmem:[#allocation4 + $0x7c] sm:$0xf0]  ;;  %v3661_v50 = vld [vmem:[#allocation4 + $0x1e8] sm:$0xf] }
0x154e   :  { %2745 = vmatpush.bf16.msrb.mxu2 %v3658_v17  ;;  %v3734_v17 = vor.u32 %v4354_v10, %v3733_v42  ;;  %v4070_v51 = vor.u32 %v4438_v40, %v4069_v37  ;;  %v4384_v53 = vld [vmem:[#allocation4 + $0x37c] sm:$0xf0]  ;;  %v4045_v46 = vld [vmem:[#allocation4 + $0x4e8] sm:$0xf]  ;;  %v3445_v49 = vld [vmem:[#allocation4 + $0x38] sm:$0xf] }
0x154f   :  { %2758 = vmatpush.bf16.msrb.mxu3 %v3850_v13  ;;  %v3926_v13 = vor.u32 %v4402_v12, %v3925_v11  ;;  %v4282_v57 = vld [vmem:[#allocation4 + $0x4c] sm:$0xf0]  ;;  %v3637_v58 = vld [vmem:[#allocation4 + $0x1b8] sm:$0xf]  ;;  %v3613_v42 = vld [vmem:[#allocation4 + $0x188] sm:$0xf] }
0x1550   :  { %2771 = vmatpush.bf16.msrb.mxu0 %v4042_v25  ;;  %v4118_v25 = vor.u32 %v4450_v15, %v4117_v14  ;;  %v4330_v60 = vld [vmem:[#allocation4 + $0x1cc] sm:$0xf0]  ;;  %v3829_v61 = vld [vmem:[#allocation4 + $0x338] sm:$0xf]  ;;  %v3805_v10 = vld [vmem:[#allocation4 + $0x308] sm:$0xf] }
0x1551   :  { %2733 = vmatpush.bf16.msrb.mxu1 %v3442_v47  ;;  %v3518_v47 = vor.u32 %v4300_v20, %v3517_v19  ;;  %v4378_v62 = vld [vmem:[#allocation4 + $0x34c] sm:$0xf0]  ;;  %v4021_v63 = vld [vmem:[#allocation4 + $0x4b8] sm:$0xf]  ;;  %v3638_v5 = vor.u32 %v4330_v60, %v3637_v58  ;;  %v4372_v12 = vld [vmem:[#allocation4 + $0x31c] sm:$0xf0] }
0x1552   :  { %2746 = vmatpush.bf16.msrb.mxu2 %v3634_v35  ;;  %v3493_v35 = vld [vmem:[#allocation4 + $0x98] sm:$0xf]  ;;  %v4426_v0 = vld [vmem:[#allocation4 + $0x4cc] sm:$0xf0]  ;;  %v3830_v7 = vor.u32 %v4378_v62, %v3829_v61  ;;  %v3997_v14 = vld [vmem:[#allocation4 + $0x488] sm:$0xf]  ;;  %v3806_v27 = vor.u32 %v4372_v12, %v3805_v10 }
0x1553   :  { %2759 = vmatpush.bf16.msrb.mxu3 %v3826_v21  ;;  %v4294_v21 = vld [vmem:[#allocation4 + $0xac] sm:$0xf0]  ;;  %v4022_v11 = vor.u32 %v4426_v0, %v4021_v63  ;;  %v4420_v15 = vld [vmem:[#allocation4 + $0x49c] sm:$0xf0]  ;;  %v3783_v20 = vld [vmem:[#allocation4 + $0x2f0] sm:$0xf0] }
0x1554   :  { %2772 = vmatpush.bf16.msrb.mxu0 %v4018_v6  ;;  %v3877_v6 = vld [vmem:[#allocation4 + $0x398] sm:$0xf]  ;;  %v3494_v22 = vor.u32 %v4294_v21, %v3493_v35  ;;  %v4411_v23 = vld [vmem:[#allocation4 + $0x45c] sm:$0xf]  ;;  %v4167_v30 = vld [vmem:[#allocation4 + $0x5f0] sm:$0xf0]  ;;  %v3998_v31 = vor.u32 %v4420_v15, %v3997_v14 }
0x1555   :  { %2734 = vmatpush.bf16.msrb.mxu1 %v3418_v43  ;;  %v3878_v41 = vor.u32 %v4390_v39, %v3877_v6  ;;  %v3469_v43 = vld [vmem:[#allocation4 + $0x68] sm:$0xf]  ;;  %v4459_v28 = vld [vmem:[#allocation4 + $0x5dc] sm:$0xf]  ;;  %v4309_v35 = vld [vmem:[#allocation4 + $0x12c] sm:$0xf] }
0x1556   :  { %2747 = vmatpush.bf16.msrb.mxu2 %v3610_v52  ;;  %v4336_v52 = vld [vmem:[#allocation4 + $0x1fc] sm:$0xf0]  ;;  %v3567_v21 = vld [vmem:[#allocation4 + $0x140] sm:$0xf0]  ;;  %v4357_v36 = vld [vmem:[#allocation4 + $0x2ac] sm:$0xf] }
0x1557   :  { %2760 = vmatpush.bf16.msrb.mxu3 %v3802_v44  ;;  %v3853_v44 = vld [vmem:[#allocation4 + $0x368] sm:$0xf]  ;;  %v3759_v38 = vld [vmem:[#allocation4 + $0x2c0] sm:$0xf0]  ;;  %v4405_v6 = vld [vmem:[#allocation4 + $0x42c] sm:$0xf] }
0x1558   :  { %2773 = vmatpush.bf16.msrb.mxu0 %v3994_v54  ;;  %2735 = vmatmul.bf16.vlgmr.msrb.gmra.mxu1 %v4974_v33  ;;  %v4432_v54 = vld [vmem:[#allocation4 + $0x4fc] sm:$0xf0]  ;;  %v3951_v39 = vld [vmem:[#allocation4 + $0x440] sm:$0xf0]  ;;  %v4453_v37 = vld [vmem:[#allocation4 + $0x5ac] sm:$0xf] }
0x1559   :  { %2779 = vmatpush.bf16.msra.mxu1 %v3590_v55  ;;  %2748 = vmatmul.bf16.vlgmr.msrb.gmra.mxu2 %v4964_v29  ;;  %v3470_v55 = vor.u32 %v4288_v45, %v3469_v43  ;;  %v4143_v40 = vld [vmem:[#allocation4 + $0x5c0] sm:$0xf0]  ;;  %v4303_v43 = vld [vmem:[#allocation4 + $0xfc] sm:$0xf]  ;;  %v3543_v45 = vld [vmem:[#allocation4 + $0x110] sm:$0xf0] }
0x155a   :  { %2792 = vmatpush.bf16.msra.mxu2 %v3782_v56  ;;  %2761 = vmatmul.bf16.vlgmr.msrb.gmra.mxu3 %v4969_v32  ;;  %v3662_v56 = vor.u32 %v4336_v52, %v3661_v50  ;;  %v4351_v50 = vld [vmem:[#allocation4 + $0x27c] sm:$0xf]  ;;  %v3735_v52 = vld [vmem:[#allocation4 + $0x290] sm:$0xf0]  ;;  %v4345_v58 = vld [vmem:[#allocation4 + $0x24c] sm:$0xf] }
0x155b   :  { %2805 = vmatpush.bf16.msra.mxu3 %v3974_v48  ;;  %2774 = vmatmul.bf16.vlgmr.msrb.gmra.mxu0 %v4979_v8  ;;  %v3854_v48 = vor.u32 %v4384_v53, %v3853_v44  ;;  %v4399_v44 = vld [vmem:[#allocation4 + $0x3fc] sm:$0xf]  ;;  %v3927_v53 = vld [vmem:[#allocation4 + $0x410] sm:$0xf0]  ;;  %v3711_v60 = vld [vmem:[#allocation4 + $0x260] sm:$0xf0] }
0x155c   :  { %2818 = vmatpush.bf16.msra.mxu0 %v4166_v59  ;;  %v4046_v59 = vor.u32 %v4432_v54, %v4045_v46  ;;  %v4447_v46 = vld [vmem:[#allocation4 + $0x57c] sm:$0xf]  ;;  %v4119_v54 = vld [vmem:[#allocation4 + $0x590] sm:$0xf0]  ;;  %v4393_v61 = vld [vmem:[#allocation4 + $0x3cc] sm:$0xf] }
0x155d   :  { %2780 = vmatpush.bf16.msra.mxu1 %v3566_v1  ;;  %v3446_v1 = vor.u32 %v4282_v57, %v3445_v49  ;;  %v4297_v49 = vld [vmem:[#allocation4 + $0xcc] sm:$0xf]  ;;  %v3519_v57 = vld [vmem:[#allocation4 + $0xe0] sm:$0xf0]  ;;  %v3687_v10 = vld [vmem:[#allocation4 + $0x230] sm:$0xf0] }
0x155e   :  { %2793 = vmatpush.bf16.msra.mxu2 %v3758_v2  ;;  %v3421_v2 = vld [vmem:[#allocation4 + $0x8] sm:$0xf]  ;;  %v3903_v62 = vld [vmem:[#allocation4 + $0x3e0] sm:$0xf0]  ;;  %v4441_v63 = vld [vmem:[#allocation4 + $0x54c] sm:$0xf] }
0x155f   :  { %2806 = vmatpush.bf16.msra.mxu3 %v3950_v4  ;;  %v4276_v4 = vld [vmem:[#allocation4 + $0x1c] sm:$0xf0]  ;;  %v4095_v0 = vld [vmem:[#allocation4 + $0x560] sm:$0xf0]  ;;  %v3879_v12 = vld [vmem:[#allocation4 + $0x3b0] sm:$0xf0] }
0x1560   :  { %2819 = vmatpush.bf16.msra.mxu0 %v4142_v9  ;;  %v4324_v9 = vld [vmem:[#allocation4 + $0x19c] sm:$0xf0]  ;;  %v3422_v19 = vor.u32 %v4276_v4, %v3421_v2  ;;  %v3714_v2 = vor.u32 %v4345_v58, %v3711_v60  ;;  %v3906_v4 = vor.u32 %v4393_v61, %v3903_v62  ;;  %v4435_v14 = vld [vmem:[#allocation4 + $0x51c] sm:$0xf]  ;;  %v4071_v15 = vld [vmem:[#allocation4 + $0x530] sm:$0xf0] }
0x1561   :  { %2781 = vmatpush.bf16.msra.mxu1 %v3542_v16  ;;  %v4315_v16 = vld [vmem:[#allocation4 + $0x15c] sm:$0xf]  ;;  %v3614_v26 = vor.u32 %v4324_v9, %v3613_v42  ;;  %v4098_v9 = vor.u32 %v4441_v63, %v4095_v0  ;;  %v3981_v58 = vld [vmem:[#allocation4 + $0x460] sm:$0xf]  ;;  %v4463_v63 = vld [vmem:[#allocation4 + $0x5f4] sm:$0xf0] }
0x1562   :  { %2794 = vmatpush.bf16.msra.mxu2 %v3734_v17  ;;  %v3591_v17 = vld [vmem:[#allocation4 + $0x170] sm:$0xf0]  ;;  %v4339_v42 = vld [vmem:[#allocation4 + $0x21c] sm:$0xf]  ;;  %v4173_v62 = vld [vmem:[#allocation4 + $0x5e0] sm:$0xf] }
0x1563   :  { %2807 = vmatpush.bf16.msra.mxu3 %v3926_v13  ;;  %v4363_v13 = vld [vmem:[#allocation4 + $0x2dc] sm:$0xf]  ;;  %s3000_s20 = sshll.u32 %s5036_s17, 4  ;;  %s3001_s20 = int_to_ptr.hbm [resolvable:$true] %s3000_s20 }
0x1564   :  { %2820 = vmatpush.bf16.msra.mxu0 %v4118_v25  ;;  %v3975_v25 = vld [vmem:[#allocation4 + $0x470] sm:$0xf0] }
0x1565   :  { %2782 = vmatpush.bf16.msra.mxu1 %v3518_v47  ;;  %v3594_v47 = vor.u32 %v4315_v16, %v3591_v17  ;;  %v3690_v17 = vor.u32 %v4339_v42, %v3687_v10  ;;  %v3765_v42 = vld [vmem:[#allocation4 + $0x2b0] sm:$0xf]  ;;  %v4361_v10 = vld [vmem:[#allocation4 + $0x2c4] sm:$0xf0] }
0x1566   :  { %2795 = vmatpush.bf16.msra.mxu2 %v3710_v34  ;;  %v3786_v34 = vor.u32 %v4363_v13, %v3783_v20  ;;  %v3471_v20 = vld [vmem:[#allocation4 + $0x80] sm:$0xf0] }
0x1567   :  { %2808 = vmatpush.bf16.msra.mxu3 %v3902_v18  ;;  %v3978_v18 = vor.u32 %v4411_v23, %v3975_v25  ;;  %v4333_v23 = vld [vmem:[#allocation4 + $0x1ec] sm:$0xf]  ;;  %v4074_v25 = vor.u32 %v4435_v14, %v4071_v15  ;;  %v4149_v14 = vld [vmem:[#allocation4 + $0x5b0] sm:$0xf]  ;;  %v4457_v15 = vld [vmem:[#allocation4 + $0x5c4] sm:$0xf0] }
0x1568   :  { %2821 = vmatpush.bf16.msra.mxu0 %v4094_v3  ;;  %v4170_v3 = vor.u32 %v4459_v28, %v4167_v30  ;;  %v3855_v28 = vld [vmem:[#allocation4 + $0x380] sm:$0xf0]  ;;  %v4429_v30 = vld [vmem:[#allocation4 + $0x4ec] sm:$0xf] }
0x1569   :  { %2783 = vmatpush.bf16.msra.mxu1 %v3494_v22  ;;  %v3570_v22 = vor.u32 %v4309_v35, %v3567_v21  ;;  %v4279_v35 = vld [vmem:[#allocation4 + $0x3c] sm:$0xf]  ;;  %v3447_v21 = vld [vmem:[#allocation4 + $0x50] sm:$0xf0] }
0x156a   :  { %2796 = vmatpush.bf16.msra.mxu2 %v3686_v24  ;;  %v3762_v24 = vor.u32 %v4357_v36, %v3759_v38  ;;  %v4327_v36 = vld [vmem:[#allocation4 + $0x1bc] sm:$0xf]  ;;  %v3639_v38 = vld [vmem:[#allocation4 + $0x1d0] sm:$0xf0] }
0x156b   :  { %2809 = vmatpush.bf16.msra.mxu3 %v3878_v41  ;;  %v3954_v41 = vor.u32 %v4405_v6, %v3951_v39  ;;  %v4375_v6 = vld [vmem:[#allocation4 + $0x33c] sm:$0xf]  ;;  %v3831_v39 = vld [vmem:[#allocation4 + $0x350] sm:$0xf0] }
0x156c   :  { %2822 = vmatpush.bf16.msra.mxu0 %v4070_v51  ;;  %v4146_v51 = vor.u32 %v4453_v37, %v4143_v40  ;;  %v4423_v37 = vld [vmem:[#allocation4 + $0x4bc] sm:$0xf]  ;;  %v4023_v40 = vld [vmem:[#allocation4 + $0x4d0] sm:$0xf0] }
0x156d   :  { %2784 = vmatpush.bf16.msra.mxu1 %v3470_v55  ;;  %v3546_v55 = vor.u32 %v4303_v43, %v3543_v45  ;;  %v3642_v43 = vor.u32 %v4327_v36, %v3639_v38  ;;  %v3834_v45 = vor.u32 %v4375_v6, %v3831_v39  ;;  %v3717_v36 = vld [vmem:[#allocation4 + $0x250] sm:$0xf]  ;;  %v4349_v38 = vld [vmem:[#allocation4 + $0x264] sm:$0xf0] }
0x156e   :  { %2797 = vmatpush.bf16.msra.mxu2 %v3662_v56  ;;  %v3738_v56 = vor.u32 %v4351_v50, %v3735_v52  ;;  %v4321_v50 = vld [vmem:[#allocation4 + $0x18c] sm:$0xf]  ;;  %v3909_v6 = vld [vmem:[#allocation4 + $0x3d0] sm:$0xf]  ;;  %v4397_v39 = vld [vmem:[#allocation4 + $0x3e4] sm:$0xf0] }
0x156f   :  { %2810 = vmatpush.bf16.msra.mxu3 %v3854_v48  ;;  %v3930_v48 = vor.u32 %v4399_v44, %v3927_v53  ;;  %v4369_v52 = vld [vmem:[#allocation4 + $0x30c] sm:$0xf]  ;;  %v4026_v44 = vor.u32 %v4423_v37, %v4023_v40  ;;  %v3807_v53 = vld [vmem:[#allocation4 + $0x320] sm:$0xf0]  ;;  %v4101_v37 = vld [vmem:[#allocation4 + $0x550] sm:$0xf] }
0x1570   :  { %2823 = vmatpush.bf16.msra.mxu0 %v4046_v59  ;;  %v4122_v59 = vor.u32 %v4447_v46, %v4119_v54  ;;  %v4417_v46 = vld [vmem:[#allocation4 + $0x48c] sm:$0xf]  ;;  %v3999_v54 = vld [vmem:[#allocation4 + $0x4a0] sm:$0xf0]  ;;  %v3810_v61 = vor.u32 %v4369_v52, %v3807_v53  ;;  %v4445_v40 = vld [vmem:[#allocation4 + $0x564] sm:$0xf0] }
0x1571   :  { %2785 = vmatpush.bf16.msra.mxu1 %v3446_v1  ;;  %v3522_v1 = vor.u32 %v4297_v49, %v3519_v57  ;;  %v4367_v57 = vld [vmem:[#allocation4 + $0x2f4] sm:$0xf0]  ;;  %v4002_v0 = vor.u32 %v4417_v46, %v3999_v54  ;;  %v4077_v46 = vld [vmem:[#allocation4 + $0x520] sm:$0xf] }
0x1572   :  { %2798 = vmatpush.bf16.msra.mxu2 %v3638_v5  ;;  %v4291_v5 = vld [vmem:[#allocation4 + $0x9c] sm:$0xf]  ;;  %v4343_v52 = vld [vmem:[#allocation4 + $0x234] sm:$0xf0] }
0x1573   :  { %2811 = vmatpush.bf16.msra.mxu3 %v3830_v7  ;;  %v3495_v7 = vld [vmem:[#allocation4 + $0xb0] sm:$0xf0]  ;;  %v4391_v53 = vld [vmem:[#allocation4 + $0x3b4] sm:$0xf0] }
0x1574   :  { %2824 = vmatpush.bf16.msra.mxu0 %v4022_v11  ;;  %v4387_v11 = vld [vmem:[#allocation4 + $0x39c] sm:$0xf]  ;;  %v3498_v16 = vor.u32 %v4291_v5, %v3495_v7  ;;  %v3573_v5 = vld [vmem:[#allocation4 + $0x130] sm:$0xf]  ;;  %v4313_v7 = vld [vmem:[#allocation4 + $0x144] sm:$0xf0] }
0x1575   :  { %2786 = vmatpush.bf16.msra.mxu1 %v3422_v19  ;;  %v3882_v13 = vor.u32 %v4387_v11, %v3879_v12  ;;  %v4285_v19 = vld [vmem:[#allocation4 + $0x6c] sm:$0xf]  ;;  %v3957_v11 = vld [vmem:[#allocation4 + $0x430] sm:$0xf]  ;;  %v4409_v12 = vld [vmem:[#allocation4 + $0x444] sm:$0xf0] }
0x1576   :  { %2799 = vmatpush.bf16.msra.mxu2 %v3614_v26  ;;  %v3663_v26 = vld [vmem:[#allocation4 + $0x200] sm:$0xf0]  ;;  %v4439_v54 = vld [vmem:[#allocation4 + $0x534] sm:$0xf0] }
0x1577   :  { %2812 = vmatpush.bf16.msra.mxu3 %v3806_v27  ;;  %v4381_v27 = vld [vmem:[#allocation4 + $0x36c] sm:$0xf] }
0x1578   :  { %2825 = vmatpush.bf16.msra.mxu0 %v3998_v31  ;;  %2787 = vmatmul.bf16.vlgmr.msra.gmra.mxu1 %v4974_v33  ;;  %v4047_v31 = vld [vmem:[#allocation4 + $0x500] sm:$0xf0] }
0x1579   :  { %2831 = vmatpush.bf16.msrb.mxu1 %v3594_v47  ;;  %2800 = vmatmul.bf16.vlgmr.msra.gmra.mxu2 %v4964_v29  ;;  %v3474_v47 = vor.u32 %v4285_v19, %v3471_v20  ;;  %v3549_v19 = vld [vmem:[#allocation4 + $0x100] sm:$0xf]  ;;  %v4307_v20 = vld [vmem:[#allocation4 + $0x114] sm:$0xf0] }
0x157a   :  { %2844 = vmatpush.bf16.msrb.mxu2 %v3786_v34  ;;  %2813 = vmatmul.bf16.vlgmr.msra.gmra.mxu3 %v4969_v32  ;;  %v3666_v34 = vor.u32 %v4333_v23, %v3663_v26  ;;  %v3741_v23 = vld [vmem:[#allocation4 + $0x280] sm:$0xf]  ;;  %v4355_v26 = vld [vmem:[#allocation4 + $0x294] sm:$0xf0] }
0x157b   :  { %2857 = vmatpush.bf16.msrb.mxu3 %v3978_v18  ;;  %2826 = vmatmul.bf16.vlgmr.msra.gmra.mxu0 %v4979_v8  ;;  %v3858_v18 = vor.u32 %v4381_v27, %v3855_v28  ;;  %v3933_v27 = vld [vmem:[#allocation4 + $0x400] sm:$0xf]  ;;  %v4403_v28 = vld [vmem:[#allocation4 + $0x414] sm:$0xf0] }
0x157c   :  { %2870 = vmatpush.bf16.msrb.mxu0 %v4170_v3  ;;  %v4050_v3 = vor.u32 %v4429_v30, %v4047_v31  ;;  %v4125_v30 = vld [vmem:[#allocation4 + $0x580] sm:$0xf]  ;;  %v4451_v31 = vld [vmem:[#allocation4 + $0x594] sm:$0xf0] }
0x157d   :  { %2832 = vmatpush.bf16.msrb.mxu1 %v3570_v22  ;;  %v3450_v22 = vor.u32 %v4279_v35, %v3447_v21  ;;  %v3525_v35 = vld [vmem:[#allocation4 + $0xd0] sm:$0xf]  ;;  %v4301_v21 = vld [vmem:[#allocation4 + $0xe4] sm:$0xf0] }
0x157e   :  { %2845 = vmatpush.bf16.msrb.mxu2 %v3762_v24  ;;  %v4273_v24 = vld [vmem:[#allocation4 + $0xc] sm:$0xf] }
0x157f   :  { %2858 = vmatpush.bf16.msrb.mxu3 %v3954_v41  ;;  %v3423_v41 = vld [vmem:[#allocation4 + $0x20] sm:$0xf0] }
0x1580   :  { %2871 = vmatpush.bf16.msrb.mxu0 %v4146_v51  ;;  %v3615_v51 = vld [vmem:[#allocation4 + $0x1a0] sm:$0xf0]  ;;  %v3426_v49 = vor.u32 %v4273_v24, %v3423_v41  ;;  %v3718_v24 = vor.u32 %v4349_v38, %v3717_v36  ;;  %v3910_v41 = vor.u32 %v4397_v39, %v3909_v6 }
0x1581   :  { %2833 = vmatpush.bf16.msrb.mxu1 %v3546_v55  ;;  %v3597_v55 = vld [vmem:[#allocation4 + $0x160] sm:$0xf]  ;;  %v3618_v60 = vor.u32 %v4321_v50, %v3615_v51  ;;  %v4102_v51 = vor.u32 %v4445_v40, %v4101_v37  ;;  %v4412_v36 = vld [vmem:[#allocation4 + $0x464] sm:$0xf]  ;;  %v4175_v37 = vld [vmem:[#allocation4 + $0x5f8] sm:$0xf0] }
0x1582   :  { %2846 = vmatpush.bf16.msrb.mxu2 %v3738_v56  ;;  %v4319_v56 = vld [vmem:[#allocation4 + $0x174] sm:$0xf0]  ;;  %v3693_v50 = vld [vmem:[#allocation4 + $0x220] sm:$0xf]  ;;  %v4460_v39 = vld [vmem:[#allocation4 + $0x5e4] sm:$0xf] }
0x1583   :  { %2859 = vmatpush.bf16.msrb.mxu3 %v3930_v48  ;;  %v3789_v48 = vld [vmem:[#allocation4 + $0x2e0] sm:$0xf] }
0x1584   :  { %2872 = vmatpush.bf16.msrb.mxu0 %v4122_v59  ;;  %v4415_v59 = vld [vmem:[#allocation4 + $0x474] sm:$0xf0] }
0x1585   :  { %2834 = vmatpush.bf16.msrb.mxu1 %v3522_v1  ;;  %v3598_v1 = vor.u32 %v4319_v56, %v3597_v55  ;;  %v3694_v56 = vor.u32 %v4343_v52, %v3693_v50  ;;  %v4358_v50 = vld [vmem:[#allocation4 + $0x2b4] sm:$0xf]  ;;  %v3767_v52 = vld [vmem:[#allocation4 + $0x2c8] sm:$0xf0] }
0x1586   :  { %2847 = vmatpush.bf16.msrb.mxu2 %v3714_v2  ;;  %v3790_v2 = vor.u32 %v4367_v57, %v3789_v48  ;;  %v4289_v57 = vld [vmem:[#allocation4 + $0x84] sm:$0xf0] }
0x1587   :  { %2860 = vmatpush.bf16.msrb.mxu3 %v3906_v4  ;;  %v3982_v4 = vor.u32 %v4415_v59, %v3981_v58  ;;  %v3669_v58 = vld [vmem:[#allocation4 + $0x1f0] sm:$0xf]  ;;  %v4078_v59 = vor.u32 %v4439_v54, %v4077_v46  ;;  %v4454_v46 = vld [vmem:[#allocation4 + $0x5b4] sm:$0xf]  ;;  %v4151_v54 = vld [vmem:[#allocation4 + $0x5c8] sm:$0xf0] }
0x1588   :  { %2873 = vmatpush.bf16.msrb.mxu0 %v4098_v9  ;;  %v4174_v9 = vor.u32 %v4463_v63, %v4173_v62  ;;  %v4385_v62 = vld [vmem:[#allocation4 + $0x384] sm:$0xf0]  ;;  %v4053_v63 = vld [vmem:[#allocation4 + $0x4f0] sm:$0xf] }
0x1589   :  { %2835 = vmatpush.bf16.msrb.mxu1 %v3498_v16  ;;  %v3574_v16 = vor.u32 %v4313_v7, %v3573_v5  ;;  %v3453_v5 = vld [vmem:[#allocation4 + $0x40] sm:$0xf]  ;;  %v4283_v7 = vld [vmem:[#allocation4 + $0x54] sm:$0xf0] }
0x158a   :  { %2848 = vmatpush.bf16.msrb.mxu2 %v3690_v17  ;;  %v3766_v17 = vor.u32 %v4361_v10, %v3765_v42  ;;  %v3645_v42 = vld [vmem:[#allocation4 + $0x1c0] sm:$0xf]  ;;  %v4331_v10 = vld [vmem:[#allocation4 + $0x1d4] sm:$0xf0] }
0x158b   :  { %2861 = vmatpush.bf16.msrb.mxu3 %v3882_v13  ;;  %v3958_v13 = vor.u32 %v4409_v12, %v3957_v11  ;;  %v3837_v11 = vld [vmem:[#allocation4 + $0x340] sm:$0xf]  ;;  %v4379_v12 = vld [vmem:[#allocation4 + $0x354] sm:$0xf0] }
0x158c   :  { %2874 = vmatpush.bf16.msrb.mxu0 %v4074_v25  ;;  %v4150_v25 = vor.u32 %v4457_v15, %v4149_v14  ;;  %v4029_v14 = vld [vmem:[#allocation4 + $0x4c0] sm:$0xf]  ;;  %v4427_v15 = vld [vmem:[#allocation4 + $0x4d4] sm:$0xf0] }
0x158d   :  { %2836 = vmatpush.bf16.msrb.mxu1 %v3474_v47  ;;  %v3550_v47 = vor.u32 %v4307_v20, %v3549_v19  ;;  %v3646_v19 = vor.u32 %v4331_v10, %v3645_v42  ;;  %v3838_v20 = vor.u32 %v4379_v12, %v3837_v11  ;;  %v3527_v42 = vld [vmem:[#allocation4 + $0xe8] sm:$0xf0]  ;;  %v4394_v12 = vld [vmem:[#allocation4 + $0x3d4] sm:$0xf] }
0x158e   :  { %2849 = vmatpush.bf16.msrb.mxu2 %v3666_v34  ;;  %v3742_v34 = vor.u32 %v4355_v26, %v3741_v23  ;;  %v3621_v23 = vld [vmem:[#allocation4 + $0x190] sm:$0xf]  ;;  %v3719_v10 = vld [vmem:[#allocation4 + $0x268] sm:$0xf0] }
0x158f   :  { %2862 = vmatpush.bf16.msrb.mxu3 %v3858_v18  ;;  %v3934_v18 = vor.u32 %v4403_v28, %v3933_v27  ;;  %v3813_v26 = vld [vmem:[#allocation4 + $0x310] sm:$0xf]  ;;  %v4030_v27 = vor.u32 %v4427_v15, %v4029_v14  ;;  %v4373_v28 = vld [vmem:[#allocation4 + $0x324] sm:$0xf0]  ;;  %v3911_v14 = vld [vmem:[#allocation4 + $0x3e8] sm:$0xf0] }
0x1590   :  { %2875 = vmatpush.bf16.msrb.mxu0 %v4050_v3  ;;  %v4126_v3 = vor.u32 %v4451_v31, %v4125_v30  ;;  %v4005_v30 = vld [vmem:[#allocation4 + $0x490] sm:$0xf]  ;;  %v4421_v31 = vld [vmem:[#allocation4 + $0x4a4] sm:$0xf0]  ;;  %v3814_v6 = vor.u32 %v4373_v28, %v3813_v26  ;;  %v3503_v26 = vld [vmem:[#allocation4 + $0xb8] sm:$0xf0] }
0x1591   :  { %2837 = vmatpush.bf16.msrb.mxu1 %v3450_v22  ;;  %v3526_v22 = vor.u32 %v4301_v21, %v3525_v35  ;;  %v3791_v21 = vld [vmem:[#allocation4 + $0x2f8] sm:$0xf0]  ;;  %v4006_v40 = vor.u32 %v4421_v31, %v4005_v30 }
0x1592   :  { %2850 = vmatpush.bf16.msrb.mxu2 %v3642_v43  ;;  %v3501_v43 = vld [vmem:[#allocation4 + $0xa0] sm:$0xf]  ;;  %v3695_v31 = vld [vmem:[#allocation4 + $0x238] sm:$0xf0] }
0x1593   :  { %2863 = vmatpush.bf16.msrb.mxu3 %v3834_v45  ;;  %v4295_v45 = vld [vmem:[#allocation4 + $0xb4] sm:$0xf0] }
0x1594   :  { %2876 = vmatpush.bf16.msrb.mxu0 %v4026_v44  ;;  %v3885_v44 = vld [vmem:[#allocation4 + $0x3a0] sm:$0xf]  ;;  %v3502_v55 = vor.u32 %v4295_v45, %v3501_v43  ;;  %v4310_v43 = vld [vmem:[#allocation4 + $0x134] sm:$0xf]  ;;  %v3575_v45 = vld [vmem:[#allocation4 + $0x148] sm:$0xf0] }
0x1595   :  { %2838 = vmatpush.bf16.msrb.mxu1 %v3426_v49  ;;  %v3886_v48 = vor.u32 %v4391_v53, %v3885_v44  ;;  %v3477_v49 = vld [vmem:[#allocation4 + $0x70] sm:$0xf]  ;;  %v4406_v44 = vld [vmem:[#allocation4 + $0x434] sm:$0xf]  ;;  %v3959_v53 = vld [vmem:[#allocation4 + $0x448] sm:$0xf0] }
0x1596   :  { %2851 = vmatpush.bf16.msrb.mxu2 %v3618_v60  ;;  %v4337_v60 = vld [vmem:[#allocation4 + $0x204] sm:$0xf0] }
0x1597   :  { %2864 = vmatpush.bf16.msrb.mxu3 %v3810_v61  ;;  %v3861_v61 = vld [vmem:[#allocation4 + $0x370] sm:$0xf] }
0x1598   :  { %2877 = vmatpush.bf16.msrb.mxu0 %v4002_v0  ;;  %2839 = vmatmul.bf16.vlgmr.msrb.gmra.mxu1 %v4974_v33  ;;  %v4433_v0 = vld [vmem:[#allocation4 + $0x504] sm:$0xf0] }
0x1599   :  { %2883 = vmatpush.bf16.msra.mxu1 %v3598_v1  ;;  %2852 = vmatmul.bf16.vlgmr.msrb.gmra.mxu2 %v4964_v29  ;;  %v3478_v1 = vor.u32 %v4289_v57, %v3477_v49  ;;  %v4304_v49 = vld [vmem:[#allocation4 + $0x104] sm:$0xf]  ;;  %v3551_v57 = vld [vmem:[#allocation4 + $0x118] sm:$0xf0] }
0x159a   :  { %2896 = vmatpush.bf16.msra.mxu2 %v3790_v2  ;;  %2865 = vmatmul.bf16.vlgmr.msrb.gmra.mxu3 %v4969_v32  ;;  %v3670_v2 = vor.u32 %v4337_v60, %v3669_v58  ;;  %v4352_v58 = vld [vmem:[#allocation4 + $0x284] sm:$0xf]  ;;  %v3743_v60 = vld [vmem:[#allocation4 + $0x298] sm:$0xf0] }
0x159b   :  { %2909 = vmatpush.bf16.msra.mxu3 %v3982_v4  ;;  %2878 = vmatmul.bf16.vlgmr.msrb.gmra.mxu0 %v4979_v8  ;;  %v3862_v4 = vor.u32 %v4385_v62, %v3861_v61  ;;  %v4400_v61 = vld [vmem:[#allocation4 + $0x404] sm:$0xf]  ;;  %v3935_v62 = vld [vmem:[#allocation4 + $0x418] sm:$0xf0] }
0x159c   :  { %2922 = vmatpush.bf16.msra.mxu0 %v4174_v9  ;;  %v4054_v9 = vor.u32 %v4433_v0, %v4053_v63  ;;  %v4448_v63 = vld [vmem:[#allocation4 + $0x584] sm:$0xf]  ;;  %v4127_v0 = vld [vmem:[#allocation4 + $0x598] sm:$0xf0] }
0x159d   :  { %2884 = vmatpush.bf16.msra.mxu1 %v3574_v16  ;;  %v3454_v16 = vor.u32 %v4283_v7, %v3453_v5  ;;  %v3746_v5 = vor.u32 %v4352_v58, %v3743_v60  ;;  %v3938_v7 = vor.u32 %v4400_v61, %v3935_v62  ;;  %v4130_v11 = vor.u32 %v4448_v63, %v4127_v0  ;;  %v4376_v60 = vld [vmem:[#allocation4 + $0x344] sm:$0xf]  ;;  %v3839_v61 = vld [vmem:[#allocation4 + $0x358] sm:$0xf0] }
0x159e   :  { %2897 = vmatpush.bf16.msra.mxu2 %v3766_v17  ;;  %v3429_v17 = vld [vmem:[#allocation4 + $0x10] sm:$0xf]  ;;  %v4424_v63 = vld [vmem:[#allocation4 + $0x4c4] sm:$0xf]  ;;  %v4031_v0 = vld [vmem:[#allocation4 + $0x4d8] sm:$0xf0] }
0x159f   :  { %2910 = vmatpush.bf16.msra.mxu3 %v3958_v13  ;;  %v4277_v13 = vld [vmem:[#allocation4 + $0x24] sm:$0xf0] }
0x15a0   :  { %2923 = vmatpush.bf16.msra.mxu0 %v4150_v25  ;;  %v4325_v25 = vld [vmem:[#allocation4 + $0x1a4] sm:$0xf0]  ;;  %v3430_v35 = vor.u32 %v4277_v13, %v3429_v17  ;;  %v4103_v17 = vld [vmem:[#allocation4 + $0x568] sm:$0xf0] }
0x15a1   :  { %2885 = vmatpush.bf16.msra.mxu1 %v3550_v47  ;;  %v4316_v47 = vld [vmem:[#allocation4 + $0x164] sm:$0xf]  ;;  %v3622_v38 = vor.u32 %v4325_v25, %v3621_v23  ;;  %v3914_v23 = vor.u32 %v4394_v12, %v3911_v14  ;;  %v3623_v12 = vld [vmem:[#allocation4 + $0x1a8] sm:$0xf0]  ;;  %v4370_v14 = vld [vmem:[#allocation4 + $0x314] sm:$0xf] }
0x15a2   :  { %2898 = vmatpush.bf16.msra.mxu2 %v3742_v34  ;;  %v3599_v34 = vld [vmem:[#allocation4 + $0x178] sm:$0xf0]  ;;  %v4292_v25 = vld [vmem:[#allocation4 + $0xa4] sm:$0xf] }
0x15a3   :  { %2911 = vmatpush.bf16.msra.mxu3 %v3934_v18  ;;  %v4364_v18 = vld [vmem:[#allocation4 + $0x2e4] sm:$0xf] }
0x15a4   :  { %2924 = vmatpush.bf16.msra.mxu0 %v4126_v3  ;;  %v3983_v3 = vld [vmem:[#allocation4 + $0x478] sm:$0xf0] }
0x15a5   :  { %2886 = vmatpush.bf16.msra.mxu1 %v3526_v22  ;;  %v3602_v22 = vor.u32 %v4316_v47, %v3599_v34  ;;  %v4388_v47 = vld [vmem:[#allocation4 + $0x3a4] sm:$0xf]  ;;  %v3887_v34 = vld [vmem:[#allocation4 + $0x3b8] sm:$0xf0] }
0x15a6   :  { %2899 = vmatpush.bf16.msra.mxu2 %v3718_v24  ;;  %v3794_v24 = vor.u32 %v4364_v18, %v3791_v21  ;;  %v4079_v21 = vld [vmem:[#allocation4 + $0x538] sm:$0xf0] }
0x15a7   :  { %2912 = vmatpush.bf16.msra.mxu3 %v3910_v41  ;;  %v3986_v41 = vor.u32 %v4412_v36, %v3983_v3  ;;  %v3506_v36 = vor.u32 %v4292_v25, %v3503_v26 }
0x15a8   :  { %2925 = vmatpush.bf16.msra.mxu0 %v4102_v51  ;;  %v4178_v51 = vor.u32 %v4460_v39, %v4175_v37  ;;  %v3479_v39 = vld [vmem:[#allocation4 + $0x88] sm:$0xf0]  ;;  %v4334_v37 = vld [vmem:[#allocation4 + $0x1f4] sm:$0xf] }
0x15a9   :  { %2887 = vmatpush.bf16.msra.mxu1 %v3502_v55  ;;  %v3578_v55 = vor.u32 %v4310_v43, %v3575_v45  ;;  %v3863_v43 = vld [vmem:[#allocation4 + $0x388] sm:$0xf0] }
0x15aa   :  { %2900 = vmatpush.bf16.msra.mxu2 %v3694_v56  ;;  %v3770_v56 = vor.u32 %v4358_v50, %v3767_v52  ;;  %v4055_v52 = vld [vmem:[#allocation4 + $0x508] sm:$0xf0] }
0x15ab   :  { %2913 = vmatpush.bf16.msra.mxu3 %v3886_v48  ;;  %v3962_v48 = vor.u32 %v4406_v44, %v3959_v53 }
0x15ac   :  { %2926 = vmatpush.bf16.msra.mxu0 %v4078_v59  ;;  %v4154_v59 = vor.u32 %v4454_v46, %v4151_v54 }
0x15ad   :  { %2888 = vmatpush.bf16.msra.mxu1 %v3478_v1  ;;  %v5003_v1 = vld [vmem:[%s5035_s16] sm:$0x3f]  ;;  %s4653_s16 = smov [#allocation6]  }
0x15ae   :  { %2901 = vmatpush.bf16.msra.mxu2 %v3670_v2  ;;  %v3554_v2 = vor.u32 %v4304_v49, %v3551_v57  ;;  %v1703_v15 = vperm.slane %v5003_v1, 0  ;;  %v4328_v49 = vld [vmem:[#allocation4 + $0x1c4] sm:$0xf]  ;;  %v1704_v26 = vperm.slane %v5003_v1, 1  ;;  %s2998_s30 = sshll.u32 %s4653_s16, 4  ;;  %s2999_s30 = int_to_ptr.vmem [resolvable:$true] %s2998_s30 }
0x15af   :  { %2914 = vmatpush.bf16.msra.mxu3 %v3862_v4  ;;  %v4298_v4 = vld [vmem:[#allocation4 + $0xd4] sm:$0xf] }
0x15b0   :  { %2927 = vmatpush.bf16.msra.mxu0 %v4054_v9  ;;  %v4346_v9 = vld [vmem:[#allocation4 + $0x254] sm:$0xf]  ;;  %v3530_v13 = vor.u32 %v4298_v4, %v3527_v42  ;;  %v3431_v42 = vld [vmem:[#allocation4 + $0x28] sm:$0xf0] }
0x15b1   :  { %2889 = vmatpush.bf16.msra.mxu1 %v3454_v16  ;;  %v4442_v16 = vld [vmem:[#allocation4 + $0x554] sm:$0xf] }
0x15b2   :  { %2902 = vmatpush.bf16.msra.mxu2 %v3646_v19  ;;  %v4106_v30 = vor.u32 %v4442_v16, %v4103_v17  ;;  %v4418_v17 = vld [vmem:[#allocation4 + $0x494] sm:$0xf] }
0x15b3   :  { %2915 = vmatpush.bf16.msra.mxu3 %v3838_v20  ;;  %v3722_v20 = vor.u32 %v4346_v9, %v3719_v10  ;;  %v4322_v9 = vld [vmem:[#allocation4 + $0x194] sm:$0xf] }
0x15b4   :  { %2928 = vmatpush.bf16.msra.mxu0 %v4030_v27  ;;  %v4340_v27 = vld [vmem:[#allocation4 + $0x224] sm:$0xf] }
0x15b5   :  { %2890 = vmatpush.bf16.msra.mxu1 %v3430_v35  ;;  %v2684_v19 = vpop.f32.mrf.mxu1  ;;  %v4436_v35 = vld [vmem:[#allocation4 + $0x524] sm:$0xf]  ;;  %v3698_v3 = vor.u32 %v4340_v27, %v3695_v31 }
0x15b6   :  { %2903 = vmatpush.bf16.msra.mxu2 %v3622_v38  ;;  %v2685_v18 = vadd.f32 %v2684_v19, %v1703_v15  ;;  %v3890_v38 = vor.u32 %v4388_v47, %v3887_v34  ;;  %v3815_v15 = vld [vmem:[#allocation4 + $0x328] sm:$0xf0] }
0x15b7   :  { %2916 = vmatpush.bf16.msra.mxu3 %v3814_v6  ;;  %v4286_v6 = vld [vmem:[#allocation4 + $0x74] sm:$0xf] }
0x15b8   :  { %2929 = vmatpush.bf16.msra.mxu0 %v4006_v40  ;;  %2891 = vmatmul.bf16.vlgmr.msra.gmra.mxu1 %v4974_v33  ;;  %v2723_v28 = vpop.f32.mrf.mxu0  ;;  %v3482_v44 = vor.u32 %v4286_v6, %v3479_v39 }
0x15b9   :  { %2935 = vmatpush.bf16.msrb.mxu1 %v3602_v22  ;;  %2904 = vmatmul.bf16.vlgmr.msra.gmra.mxu2 %v4964_v29  ;;  %v4082_v22 = vor.u32 %v4436_v35, %v4079_v21 }
0x15ba   :  { %2948 = vmatpush.bf16.msrb.mxu2 %v3794_v24  ;;  %2917 = vmatmul.bf16.vlgmr.msra.gmra.mxu3 %v4969_v32  ;;  %v3671_v24 = vld [vmem:[#allocation4 + $0x208] sm:$0xf0] }
0x15bb   :  { %2961 = vmatpush.bf16.msrb.mxu3 %v3986_v41  ;;  %2930 = vmatmul.bf16.vlgmr.msra.gmra.mxu0 %v4979_v8  ;;  %v4382_v41 = vld [vmem:[#allocation4 + $0x374] sm:$0xf]  ;;  %v3674_v54 = vor.u32 %v4334_v37, %v3671_v24 }
0x15bc   :  { %2974 = vmatpush.bf16.msrb.mxu0 %v4178_v51  ;;  %v2697_v40 = vpop.f32.mrf.mxu2  ;;  %v4430_v51 = vld [vmem:[#allocation4 + $0x4f4] sm:$0xf] }
0x15bd   :  { %2936 = vmatpush.bf16.msrb.mxu1 %v3578_v55  ;;  %v2698_v45 = vadd.f32 %v2697_v40, %v2685_v18  ;;  %v2710_v50 = vpop.f32.mrf.mxu3  ;;  %v2686_v46 = vpop.f32.mrf.mxu1  ;;  %v3866_v55 = vor.u32 %v4382_v41, %v3863_v43  ;;  %v4058_v58 = vor.u32 %v4430_v51, %v4055_v52 }
0x15be   :  { %2949 = vmatpush.bf16.msrb.mxu2 %v3770_v56  ;;  %v4280_v56 = vld [vmem:[#allocation4 + $0x44] sm:$0xf] }
0x15bf   :  { %2962 = vmatpush.bf16.msrb.mxu3 %v3962_v48  ;;  %v2711_v53 = vadd.f32 %v2710_v50, %v2698_v45  ;;  %v3455_v48 = vld [vmem:[#allocation4 + $0x58] sm:$0xf0]  ;;  %v1706_v50 = vperm.slane %v5003_v1, 3 }
0x15c0   :  { %2975 = vmatpush.bf16.msrb.mxu0 %v4154_v59  ;;  %v2725_v57 = vpop.f32.mrf.mxu0  ;;  %v3647_v59 = vld [vmem:[#allocation4 + $0x1d8] sm:$0xf0] }
0x15c1   :  { %2937 = vmatpush.bf16.msrb.mxu1 %v3554_v2  ;;  %v2724_v62 = vadd.f32 %v2723_v28, %v2711_v53  ;;  %v3458_v2 = vor.u32 %v4280_v56, %v3455_v48  ;;  %v3650_v4 = vor.u32 %v4328_v49, %v3647_v59  ;;  %v1707_v59 = vperm.slane %v5003_v1, 4 }
0x15c2   :  { %2950 = vmatpush.bf16.msrb.mxu2 %v3746_v5  ;;  %v3842_v5 = vor.u32 %v4376_v60, %v3839_v61 }
0x15c3   :  { %2963 = vmatpush.bf16.msrb.mxu3 %v3938_v7  ;;  %2987 = vst [vmem:[#allocation6] sm:$0xff] %v2724_v62  ;;  %v4274_v7 = vld [vmem:[#allocation4 + $0x14] sm:$0xf] }
0x15c4   :  { %2976 = vmatpush.bf16.msrb.mxu0 %v4130_v11  ;;  %v2699_v10 = vpop.f32.mrf.mxu2  ;;  %v4034_v11 = vor.u32 %v4424_v63, %v4031_v0  ;;  %v3434_v19 = vor.u32 %v4274_v7, %v3431_v42 }
0x15c5   :  { %2938 = vmatpush.bf16.msrb.mxu1 %v3530_v13  ;;  %v2712_v16 = vpop.f32.mrf.mxu3  ;;  %v4007_v13 = vld [vmem:[#allocation4 + $0x4a8] sm:$0xf0] }
0x15c6   :  { %2951 = vmatpush.bf16.msrb.mxu2 %v3722_v20  ;;  %v3626_v20 = vor.u32 %v4322_v9, %v3623_v12  ;;  %v4010_v25 = vor.u32 %v4418_v17, %v4007_v13 }
0x15c7   :  { %2964 = vmatpush.bf16.msrb.mxu3 %v3914_v23  ;;  %v3818_v23 = vor.u32 %v4370_v14, %v3815_v15 }
0x15c8   :  { %2977 = vmatpush.bf16.msrb.mxu0 %v4106_v30 }
0x15c9   :  { %2939 = vmatpush.bf16.msrb.mxu1 %v3506_v36 }
0x15ca   :  { %2952 = vmatpush.bf16.msrb.mxu2 %v3698_v3 }
0x15cb   :  { %2965 = vmatpush.bf16.msrb.mxu3 %v3890_v38 }
0x15cc   :  { %2978 = vmatpush.bf16.msrb.mxu0 %v4082_v22 }
0x15cd   :  { %2940 = vmatpush.bf16.msrb.mxu1 %v3482_v44 }
0x15ce   :  { %2953 = vmatpush.bf16.msrb.mxu2 %v3674_v54 }
0x15cf   :  { %2966 = vmatpush.bf16.msrb.mxu3 %v3866_v55 }
0x15d0   :  { %2979 = vmatpush.bf16.msrb.mxu0 %v4058_v58 }
0x15d1   :  { %2941 = vmatpush.bf16.msrb.mxu1 %v3458_v2 }
0x15d2   :  { %2954 = vmatpush.bf16.msrb.mxu2 %v3650_v4 }
0x15d3   :  { %2967 = vmatpush.bf16.msrb.mxu3 %v3842_v5 }
0x15d4   :  { %2980 = vmatpush.bf16.msrb.mxu0 %v4034_v11  ;;  %v1708_v11 = vperm.slane %v5003_v1, 5 }
0x15d5   :  { %2942 = vmatpush.bf16.msrb.mxu1 %v3434_v19  ;;  %v2736_v27 = vpop.f32.mrf.mxu1 }
0x15d6   :  { %2955 = vmatpush.bf16.msrb.mxu2 %v3626_v20  ;;  %v2737_v30 = vadd.f32 %v2736_v27, %v1704_v26 }
0x15d7   :  { %2968 = vmatpush.bf16.msrb.mxu3 %v3818_v23 }
0x15d8   :  { %2981 = vmatpush.bf16.msrb.mxu0 %v4010_v25  ;;  %2943 = vmatmul.bf16.vlgmr.msrb.gmra.mxu1 %v4974_v33  ;;  %v2775_v28 = vpop.f32.mrf.mxu0 }
0x15d9   :  { %2956 = vmatmul.bf16.vlgmr.msrb.gmra.mxu2 %v4964_v29  ;;  %v1705_v29 = vperm.slane %v5003_v1, 2 }
0x15da   :  { %2969 = vmatmul.bf16.vlgmr.msrb.gmra.mxu3 %v4969_v32 }
0x15db   :  { %2982 = vmatmul.bf16.vlgmr.msrb.gmra.mxu0 %v4979_v8 }
0x15dc   :  { %v2749_v31 = vpop.f32.mrf.mxu2 }
0x15dd   :  { %v2750_v47 = vadd.f32 %v2749_v31, %v2737_v30  ;;  %v2762_v34 = vpop.f32.mrf.mxu3  ;;  %v2738_v35 = vpop.f32.mrf.mxu1 }
0x15df   :  { %v2763_v18 = vadd.f32 %v2762_v34, %v2750_v47 }
0x15e0   :  { %v2777_v21 = vpop.f32.mrf.mxu0 }
0x15e1   :  { %v2776_v36 = vadd.f32 %v2775_v28, %v2763_v18 }
0x15e3   :  { %2988 = vst [vmem:[#allocation6 + $0x8] sm:$0xff] %v2776_v36 }
0x15e4   :  { %v2751_v33 = vpop.f32.mrf.mxu2 }
0x15e5   :  { %v2764_v3 = vpop.f32.mrf.mxu3 }
0x15f5   :  { %v2788_v32 = vpop.f32.mrf.mxu1 }
0x15f6   :  { %v2789_v8 = vadd.f32 %v2788_v32, %v1705_v29 }
0x15f8   :  { %v2827_v38 = vpop.f32.mrf.mxu0 }
0x15fc   :  { %v2801_v6 = vpop.f32.mrf.mxu2 }
0x15fd   :  { %v2802_v39 = vadd.f32 %v2801_v6, %v2789_v8  ;;  %v2814_v37 = vpop.f32.mrf.mxu3  ;;  %v2790_v22 = vpop.f32.mrf.mxu1 }
0x15ff   :  { %v2815_v40 = vadd.f32 %v2814_v37, %v2802_v39 }
0x1600   :  { %v2829_v24 = vpop.f32.mrf.mxu0 }
0x1601   :  { %v2828_v41 = vadd.f32 %v2827_v38, %v2815_v40 }
0x1603   :  { %2989 = vst [vmem:[#allocation6 + $0x10] sm:$0xff] %v2828_v41 }
0x1604   :  { %v2803_v43 = vpop.f32.mrf.mxu2 }
0x1605   :  { %v2816_v45 = vpop.f32.mrf.mxu3 }
0x1615   :  { %v2840_v51 = vpop.f32.mrf.mxu1 }
0x1616   :  { %v2841_v44 = vadd.f32 %v2840_v51, %v1706_v50 }
0x1618   :  { %v2879_v52 = vpop.f32.mrf.mxu0 }
0x161c   :  { %v2853_v53 = vpop.f32.mrf.mxu2 }
0x161d   :  { %v2854_v46 = vadd.f32 %v2853_v53, %v2841_v44  ;;  %v2866_v54 = vpop.f32.mrf.mxu3  ;;  %v2842_v56 = vpop.f32.mrf.mxu1 }
0x161f   :  { %v2867_v55 = vadd.f32 %v2866_v54, %v2854_v46 }
0x1620   :  { %v2881_v48 = vpop.f32.mrf.mxu0 }
0x1621   :  { %v2880_v49 = vadd.f32 %v2879_v52, %v2867_v55 }
0x1623   :  { %2990 = vst [vmem:[#allocation6 + $0x18] sm:$0xff] %v2880_v49 }
0x1624   :  { %v2855_v57 = vpop.f32.mrf.mxu2 }
0x1625   :  { %v2868_v58 = vpop.f32.mrf.mxu3 }
0x1635   :  { %v2892_v60 = vpop.f32.mrf.mxu1 }
0x1636   :  { %v2893_v62 = vadd.f32 %v2892_v60, %v1707_v59 }
0x1638   :  { %v2931_v61 = vpop.f32.mrf.mxu0 }
0x163c   :  { %v2905_v63 = vpop.f32.mrf.mxu2 }
0x163d   :  { %v2906_v0 = vadd.f32 %v2905_v63, %v2893_v62  ;;  %v2918_v2 = vpop.f32.mrf.mxu3  ;;  %v2894_v5 = vpop.f32.mrf.mxu1 }
0x163f   :  { %v2919_v4 = vadd.f32 %v2918_v2, %v2906_v0 }
0x1640   :  { %v2933_v7 = vpop.f32.mrf.mxu0 }
0x1641   :  { %v2932_v42 = vadd.f32 %v2931_v61, %v2919_v4 }
0x1643   :  { %2991 = vst [vmem:[#allocation6 + $0x20] sm:$0xff] %v2932_v42 }
0x1644   :  { %v2907_v9 = vpop.f32.mrf.mxu2 }
0x1645   :  { %v2920_v10 = vpop.f32.mrf.mxu3 }
0x1655   :  { %v2944_v12 = vpop.f32.mrf.mxu1 }
0x1656   :  { %v2945_v15 = vadd.f32 %v2944_v12, %v1708_v11 }
0x1658   :  { %v2983_v14 = vpop.f32.mrf.mxu0 }
0x165c   :  { %v2957_v16 = vpop.f32.mrf.mxu2 }
0x165d   :  { %v2970_v17 = vpop.f32.mrf.mxu3  ;;  %v2958_v13 = vadd.f32 %v2957_v16, %v2945_v15  ;;  %v2946_v19 = vpop.f32.mrf.mxu1 }
0x165f   :  { %v2971_v20 = vadd.f32 %v2970_v17, %v2958_v13 }
0x1660   :  { %v2985_v23 = vpop.f32.mrf.mxu0 }
0x1661   :  { %v2984_v25 = vadd.f32 %v2983_v14, %v2971_v20 }
0x1663   :  { %2992 = vst [vmem:[#allocation6 + $0x28] sm:$0xff] %v2984_v25 }
0x1664   :  { %v2959_v1 = vpop.f32.mrf.mxu2  ;;  %3003 = dma.vmem_to_hbm [thread:$0]  %s2999_s30, 768, %s3001_s20, [#allocation7]  }
0x1665   :  { %v2972_v26 = vpop.f32.mrf.mxu3 }
0x1666   :  { %4643 = dma.done.wait [#allocation7], 768  }
0x1667   :  { %4644 = vsyncadd [#allocation7], 4294966528 }
0x1668   :  { %3008 = vsyncpa [#allocation7], 1 }
0x1669   :  { %3009 = vsyncmov [#allocation5] }
0x166c   :  { %s3010_s21 = vpop.sfrf %3009 }
0x166d   :  { %p4179_p0 = scmp.ne.s32.totalorder %s3010_s21, 0 }
0x166f   :  { %3014 = shalt.err (%p4179_p0)  }
0x1670   :  { %3016 = vsyncmov [#allocation5 + $0x1] }
0x1673   :  { %s3017_s22 = vpop.sfrf %3016 }
0x1674   :  { %p4180_p1 = scmp.ne.s32.totalorder %s3017_s22, 0 }
0x1676   :  { %3021 = shalt.err (%p4180_p1)  }
0x1677   :  { %3023 = vsyncmov [#allocation5 + $0x2] }
0x167a   :  { %s3024_s17 = vpop.sfrf %3023 }
0x167b   :  { %p4181_p2 = scmp.ne.s32.totalorder %s3024_s17, 0 }
0x167d   :  { %3028 = shalt.err (%p4181_p2)  }

</bundles_post_ra>
